<compile_context>
chip_gen: v7x
topology: tpu7x:2x2x1
jax: 0.10.0
libtpu: 0.0.40
codegen_flags: <defaults>
</compile_context>

<pallas_src>
import functools

import numpy as np
import jax
import jax.numpy as jnp
from jax.experimental import pallas as pl
from jax.experimental.pallas import tpu as pltpu


# ------------------------------------------------------------------
# Fused Pallas kernel: GroupNorm + QKV + attention + to_out + residual
# ------------------------------------------------------------------

def _fused_attn_kernel(x_ref, gmat_ref, gamma_ref, beta_ref,
                       wqkv_ref, wout_ref, bout_ref, o_ref,
                       qkv_ref, outc_ref,
                       *, C, nh, hd, eps, HW, kv_tile):
    x = x_ref[0]                                            # (C, HW) f32

    # ---- GroupNorm: single fused group-stat matmul, affine folded into a/b.
    s1 = jnp.sum(x, axis=1, keepdims=True)                  # (C, 1) sum
    s2 = jnp.sum(x * x, axis=1, keepdims=True)              # (C, 1) sum of squares
    s12 = jnp.concatenate([s1, s2], axis=1)                 # (C, 2)
    stats = jnp.dot(gmat_ref[...], s12,
                    preferred_element_type=jnp.float32)     # (C, 2) group E[x], E[x^2]
    mean = stats[:, 0:1]
    var = stats[:, 1:2] - mean * mean
    a = gamma_ref[...] * jax.lax.rsqrt(var + eps)           # (C, 1)
    b = beta_ref[...] - mean * a                            # (C, 1)
    h = x * a + b                                           # (C, HW) — 2 VPU slab ops

    # ---- to_qkv 1x1 conv (bias=False): bf16 MXU operands, f32 accumulate,
    #      result staged in a bf16 VMEM scratch (half the resident footprint).
    qkv_ref[...] = jnp.dot(wqkv_ref[...], h.astype(jnp.bfloat16),
                           preferred_element_type=jnp.float32).astype(jnp.bfloat16)

    n_kv = HW // kv_tile

    # ---- multi-head attention; scale already folded into the q rows of W_qkv.
    for hh in range(nh):                                    # nh <= 8, unrolled
        lo = hh * hd
        qh = qkv_ref[lo:lo + hd, :]                         # (hd, HW) bf16 (ref slice)

        if n_kv == 1:
            # Fully-resident scores path (small HW).
            kh = qkv_ref[C + lo:C + lo + hd, :]             # (hd, HW) bf16
            vh = qkv_ref[2 * C + lo:2 * C + lo + hd, :]     # (hd, HW) bf16
            # s = q^T k without any materialized transpose.
            s = jax.lax.dot_general(
                qh, kh, (((0,), (0,)), ((), ())),
                preferred_element_type=jnp.float32)         # (HW, HW) f32
            s = s - jnp.max(s, axis=-1, keepdims=True)
            p = jnp.exp(s)
            p = p * pl.reciprocal(jnp.sum(p, axis=-1, keepdims=True), approx=True)
            # Dropout(0.05) on attention probs: inference mode -> identity.
            # out_h = v @ p^T -> (hd, HW), already channel-major for the merge.
            out_h = jax.lax.dot_general(
                vh, p.astype(jnp.bfloat16), (((1,), (1,)), ((), ())),
                preferred_element_type=jnp.float32)
        else:
            # Key-tiled online-softmax (flash) path for large HW: never
            # materializes the full (HW, HW) score matrix.
            m_i = jnp.full((1, HW), -jnp.inf, jnp.float32)
            l_i = jnp.zeros((1, HW), jnp.float32)
            acc = jnp.zeros((hd, HW), jnp.float32)
            for t in range(n_kv):
                ks = t * kv_tile
                kh = qkv_ref[C + lo:C + lo + hd, ks:ks + kv_tile]       # (hd, tk)
                vh = qkv_ref[2 * C + lo:2 * C + lo + hd, ks:ks + kv_tile]
                # s_t[j, i] = sum_d k[d, j] * q[d, i]  -> (tk, HW), m/l stay rows.
                s_t = jax.lax.dot_general(
                    kh, qh, (((0,), (0,)), ((), ())),
                    preferred_element_type=jnp.float32)
                m_new = jnp.maximum(m_i, jnp.max(s_t, axis=0, keepdims=True))
                alpha = jnp.exp(m_i - m_new)                            # (1, HW)
                p_t = jnp.exp(s_t - m_new)                              # (tk, HW)
                l_i = alpha * l_i + jnp.sum(p_t, axis=0, keepdims=True)
                acc = acc * alpha + jnp.dot(vh, p_t.astype(jnp.bfloat16),
                                            preferred_element_type=jnp.float32)
                m_i = m_new
            out_h = acc * pl.reciprocal(l_i, approx=True)

        outc_ref[lo:lo + hd, :] = out_h.astype(jnp.bfloat16)

    # ---- to_out 1x1 conv + bias + residual (Dropout -> identity); lane-dense store.
    proj = jnp.dot(wout_ref[...], outc_ref[...],
                   preferred_element_type=jnp.float32)      # (C, HW) f32
    o_ref[0] = x + proj + bout_ref[...]


# ------------------------------------------------------------------
# Wrapper
# ------------------------------------------------------------------

def _pick_kv_tile(HW):
    """Fully resident scores for small HW; key-tiled flash path for large HW."""
    if HW <= 1024:
        return HW
    for t in (1024, 512, 256, 128):
        if HW % t == 0:
            return t
    return HW


def _vmem_limit_bytes(C, HW, kv_tile):
    f32, bf16 = 4, 2
    est = 0
    est += 2 * 2 * C * HW * f32            # double-buffered x in + out blocks
    est += 3 * C * HW * bf16               # qkv scratch
    est += C * HW * bf16                   # merged-head scratch
    est += 2 * C * HW * f32                # normalized slab / f32 temporaries
    est += HW * kv_tile * (f32 + bf16)     # score block (f32) + probs (bf16)
    est += C * C * f32 + 4 * C * C * bf16  # gmat + W_qkv + W_out
    est = int(2 * est)                     # headroom for compiler temporaries
    # Raise above v5e's 16 MiB default scoped limit; stay under v7x's 64 MiB physical.
    return max(32 << 20, min(est, 56 << 20))


def enhanced_self_attention(params, x, *, num_heads=8, eps=1e-5):
    """x: (B, C, H, W) float32. Mirrors the PyTorch EnhancedSelfAttention.forward."""
    B, C, H, W = x.shape
    nh = min(num_heads, max(1, C // 16))
    assert C % nh == 0, "channels must be divisible by num_heads"
    hd = C // nh
    scale = hd ** (-0.5)
    G = 32 if C >= 32 else C
    assert C % G == 0, "channels must be divisible by the GroupNorm group count"
    Cg = C // G
    HW = H * W
    kv_tile = _pick_kv_tile(HW)

    # Block-diagonal group-averaging matrix (built once at trace time).
    gm = np.zeros((C, C), np.float32)
    for g in range(G):
        gm[g * Cg:(g + 1) * Cg, g * Cg:(g + 1) * Cg] = 1.0 / (Cg * HW)
    gmat = jnp.asarray(gm)

    x2 = x.reshape(B, C, HW).astype(jnp.float32)
    gamma = params['norm_g'].reshape(C, 1).astype(jnp.float32)
    beta = params['norm_b'].reshape(C, 1).astype(jnp.float32)
    # Fold the attention scale into the q rows of W_qkv, then cast to bf16 once.
    wqkv = params['wqkv'].astype(jnp.float32)
    wqkv = wqkv.at[:C].multiply(scale).astype(jnp.bfloat16)
    wout = params['wout'].astype(jnp.bfloat16)
    bout = params['bout'].reshape(C, 1).astype(jnp.float32)

    kern = functools.partial(_fused_attn_kernel,
                             C=C, nh=nh, hd=hd, eps=eps, HW=HW, kv_tile=kv_tile)
    out = pl.pallas_call(
        kern,
        out_shape=jax.ShapeDtypeStruct((B, C, HW), jnp.float32),
        grid=(B,),
        in_specs=[
            pl.BlockSpec((1, C, HW), lambda b: (b, 0, 0)),   # x
            pl.BlockSpec((C, C), lambda b: (0, 0)),          # group-avg matrix
            pl.BlockSpec((C, 1), lambda b: (0, 0)),          # gamma
            pl.BlockSpec((C, 1), lambda b: (0, 0)),          # beta
            pl.BlockSpec((3 * C, C), lambda b: (0, 0)),      # W_qkv (bf16, scale folded)
            pl.BlockSpec((C, C), lambda b: (0, 0)),          # W_out (bf16)
            pl.BlockSpec((C, 1), lambda b: (0, 0)),          # b_out
        ],
        out_specs=pl.BlockSpec((1, C, HW), lambda b: (b, 0, 0)),
        scratch_shapes=[
            pltpu.VMEM((3 * C, HW), jnp.bfloat16),           # qkv staging
            pltpu.VMEM((C, HW), jnp.bfloat16),               # merged per-head outputs
        ],
        input_output_aliases={0: 0},                         # x block fully read first
        compiler_params=pltpu.CompilerParams(
            dimension_semantics=("parallel",),
            vmem_limit_bytes=_vmem_limit_bytes(C, HW, kv_tile)),
    )(x2, gmat, gamma, beta, wqkv, wout, bout)
    return out.reshape(B, C, H, W)


# ------------------------------------------------------------------
# Pure-JAX reference (for a loose numerical check) and param init
# ------------------------------------------------------------------

def reference(params, x, *, num_heads=8, eps=1e-5):
    B, C, H, W = x.shape
    nh = min(num_heads, max(1, C // 16))
    hd = C // nh
    scale = hd ** (-0.5)
    G = 32 if C >= 32 else C
    L = H * W

    xg = x.reshape(B, G, C // G, L)
    mean = xg.mean(axis=(2, 3), keepdims=True)
    var = xg.var(axis=(2, 3), keepdims=True)
    h = ((xg - mean) / jnp.sqrt(var + eps)).reshape(B, C, L)
    h = h * params['norm_g'][None, :, None] + params['norm_b'][None, :, None]

    qkv = jnp.einsum('oc,bcl->bol', params['wqkv'], h)
    q, k, v = jnp.split(qkv, 3, axis=1)

    def heads(t):
        return t.reshape(B, nh, hd, L).transpose(0, 1, 3, 2)   # (B, nh, L, hd)

    q, k, v = heads(q), heads(k), heads(v)
    attn = jax.nn.softmax(jnp.einsum('bhqd,bhkd->bhqk', q, k) * scale, axis=-1)
    out = jnp.einsum('bhqk,bhkd->bhqd', attn, v)
    out = out.transpose(0, 1, 3, 2).reshape(B, C, L)
    out = jnp.einsum('oc,bcl->bol', params['wout'], out) + params['bout'][None, :, None]
    return x + out.reshape(B, C, H, W)


def init_params(key, C):
    k1, k2, k3 = jax.random.split(key, 3)
    bound = 1.0 / (C ** 0.5)                # 1x1 conv fan_in = C
    return {
        'norm_g': jnp.ones((C,), jnp.float32),
        'norm_b': jnp.zeros((C,), jnp.float32),
        'wqkv': jax.random.uniform(k1, (3 * C, C), jnp.float32, -bound, bound),
        'wout': jax.random.uniform(k2, (C, C), jnp.float32, -bound, bound),
        'bout': jax.random.uniform(k3, (C,), jnp.float32, -bound, bound),
    }


# ------------------------------------------------------------------
# Demo
# ------------------------------------------------------------------

if __name__ == "__main__":
    key = jax.random.PRNGKey(0)
    kp, kx = jax.random.split(key)

    B, C, H, W = 2, 64, 16, 16              # -> num_heads=4, head_dim=16, G=32
    params = init_params(kp, C)
    x = jax.random.normal(kx, (B, C, H, W), jnp.float32)

    fwd = jax.jit(enhanced_self_attention)
    out = jax.block_until_ready(fwd(params, x))

    assert out.shape == (B, C, H, W)
    assert bool(jnp.all(jnp.isfinite(out)))

    # Loose check vs f32 reference (kernel uses bf16 MXU operands + bf16 staging).
    ref = reference(params, x)
    err = float(jnp.max(jnp.abs(out - ref)))
    assert err < 1e-1, f"max abs err {err}"

    print("KERNEL_OK")
</pallas_src>

<mosaic_0001>
module attributes {stable_mosaic.version = 11 : i64} {
  func.func @_fused_attn_kernel(%arg0: i32, %arg1: memref<1x64x256xf32, #tpu.memory_space<vmem>>, %arg2: memref<64x64xf32, #tpu.memory_space<vmem>>, %arg3: memref<64x1xf32, #tpu.memory_space<vmem>>, %arg4: memref<64x1xf32, #tpu.memory_space<vmem>>, %arg5: memref<192x64xbf16, #tpu.memory_space<vmem>>, %arg6: memref<64x64xbf16, #tpu.memory_space<vmem>>, %arg7: memref<64x1xf32, #tpu.memory_space<vmem>>, %arg8: memref<1x64x256xf32, #tpu.memory_space<vmem>>, %arg9: memref<192x256xbf16, #tpu.memory_space<vmem>>, %arg10: memref<64x256xbf16, #tpu.memory_space<vmem>>) attributes {dimension_semantics = [#tpu.dimension_semantics<parallel>], iteration_bounds = array<i64: 2>, scalar_prefetch = 0 : i64, scratch_operands = 2 : i64, tpu.core_type = #tpu.core_type<tc>, window_params = [{transform_indices = @transform_0, window_bounds = array<i64: 1, 64, 256>}, {pipeline_mode = #tpu.pipeline_mode<synchronous>, transform_indices = @transform_1, window_bounds = array<i64: 64, 64>}, {pipeline_mode = #tpu.pipeline_mode<synchronous>, transform_indices = @transform_2, window_bounds = array<i64: 64, 1>}, {pipeline_mode = #tpu.pipeline_mode<synchronous>, transform_indices = @transform_3, window_bounds = array<i64: 64, 1>}, {pipeline_mode = #tpu.pipeline_mode<synchronous>, transform_indices = @transform_4, window_bounds = array<i64: 192, 64>}, {pipeline_mode = #tpu.pipeline_mode<synchronous>, transform_indices = @transform_5, window_bounds = array<i64: 64, 64>}, {pipeline_mode = #tpu.pipeline_mode<synchronous>, transform_indices = @transform_6, window_bounds = array<i64: 64, 1>}, {transform_indices = @transform_7, window_bounds = array<i64: 1, 64, 256>}]} {
    %c0 = arith.constant 0 : index
    %c0_0 = arith.constant 0 : index
    %c0_1 = arith.constant 0 : index
    %0 = vector.load %arg1[%c0, %c0_0, %c0_1] : memref<1x64x256xf32, #tpu.memory_space<vmem>>, vector<1x64x256xf32>
    %1 = vector.shape_cast %0 : vector<1x64x256xf32> to vector<64x256xf32>
    %cst = arith.constant dense<0.000000e+00> : vector<64xf32>
    %2 = vector.multi_reduction <add>, %1, %cst [1] : vector<64x256xf32> to vector<64xf32>
    %3 = vector.shape_cast %2 : vector<64xf32> to vector<64x1xf32>
    %4 = arith.mulf %1, %1 : vector<64x256xf32>
    %cst_2 = arith.constant dense<0.000000e+00> : vector<64xf32>
    %5 = vector.multi_reduction <add>, %4, %cst_2 [1] : vector<64x256xf32> to vector<64xf32>
    %6 = vector.shape_cast %5 : vector<64xf32> to vector<64x1xf32>
    %7 = tpu.concatenate %3, %6 in 1 : vector<64x1xf32>, vector<64x1xf32> -> vector<64x2xf32>
    %c0_3 = arith.constant 0 : index
    %c0_4 = arith.constant 0 : index
    %8 = vector.load %arg2[%c0_3, %c0_4] : memref<64x64xf32, #tpu.memory_space<vmem>>, vector<64x64xf32>
    %cst_5 = arith.constant dense<0.000000e+00> : vector<64x2xf32>
    %9 = tpu.matmul %8, %7, %cst_5 {dimension_numbers = #tpu.dot_dimension_numbers<[1], [0], [0], [1], [0, 0, 1, 1], [], []>} : vector<64x64xf32>, vector<64x2xf32>, vector<64x2xf32> -> vector<64x2xf32>
    %10 = vector.extract_strided_slice %9 {offsets = [0, 0], sizes = [64, 1], strides = [1, 1]} : vector<64x2xf32> to vector<64x1xf32>
    %11 = vector.extract_strided_slice %9 {offsets = [0, 1], sizes = [64, 1], strides = [1, 1]} : vector<64x2xf32> to vector<64x1xf32>
    %12 = arith.mulf %10, %10 : vector<64x1xf32>
    %13 = arith.subf %11, %12 : vector<64x1xf32>
    %c0_6 = arith.constant 0 : index
    %c0_7 = arith.constant 0 : index
    %14 = vector.load %arg3[%c0_6, %c0_7] : memref<64x1xf32, #tpu.memory_space<vmem>>, vector<64x1xf32>
    %cst_8 = arith.constant 9.99999974E-6 : f32
    %15 = vector.broadcast %cst_8 : f32 to vector<64x1xf32>
    %16 = arith.addf %13, %15 : vector<64x1xf32>
    %17 = math.rsqrt %16 : vector<64x1xf32>
    %18 = arith.mulf %14, %17 : vector<64x1xf32>
    %c0_9 = arith.constant 0 : index
    %c0_10 = arith.constant 0 : index
    %19 = vector.load %arg4[%c0_9, %c0_10] : memref<64x1xf32, #tpu.memory_space<vmem>>, vector<64x1xf32>
    %20 = arith.mulf %10, %18 : vector<64x1xf32>
    %21 = arith.subf %19, %20 : vector<64x1xf32>
    %22 = vector.broadcast %18 : vector<64x1xf32> to vector<64x256xf32>
    %23 = arith.mulf %1, %22 : vector<64x256xf32>
    %24 = vector.broadcast %21 : vector<64x1xf32> to vector<64x256xf32>
    %25 = arith.addf %23, %24 : vector<64x256xf32>
    %c0_11 = arith.constant 0 : index
    %c0_12 = arith.constant 0 : index
    %26 = vector.load %arg5[%c0_11, %c0_12] : memref<192x64xbf16, #tpu.memory_space<vmem>>, vector<192x64xbf16>
    %27 = arith.truncf %25 : vector<64x256xf32> to vector<64x256xbf16>
    %cst_13 = arith.constant dense<0.000000e+00> : vector<192x256xf32>
    %28 = tpu.matmul %26, %27, %cst_13 {dimension_numbers = #tpu.dot_dimension_numbers<[1], [0], [0], [1], [0, 0, 1, 1], [], []>} : vector<192x64xbf16>, vector<64x256xbf16>, vector<192x256xf32> -> vector<192x256xf32>
    %29 = arith.truncf %28 : vector<192x256xf32> to vector<192x256xbf16>
    %c0_14 = arith.constant 0 : index
    %c0_15 = arith.constant 0 : index
    %30 = vector.load %arg9[%c0_14, %c0_15] : memref<192x256xbf16, #tpu.memory_space<vmem>>, vector<192x256xbf16>
    tpu.vector_store %arg9[%c0_14, %c0_15], %29 {strides = array<i32>} : memref<192x256xbf16, #tpu.memory_space<vmem>>, vector<192x256xbf16>,
    %c0_16 = arith.constant 0 : index
    %c0_17 = arith.constant 0 : index
    %31 = vector.load %arg9[%c0_16, %c0_17] : memref<192x256xbf16, #tpu.memory_space<vmem>>, vector<16x256xbf16>
    %c64 = arith.constant 64 : index
    %c0_18 = arith.constant 0 : index
    %32 = vector.load %arg9[%c64, %c0_18] : memref<192x256xbf16, #tpu.memory_space<vmem>>, vector<16x256xbf16>
    %c128 = arith.constant 128 : index
    %c0_19 = arith.constant 0 : index
    %33 = vector.load %arg9[%c128, %c0_19] : memref<192x256xbf16, #tpu.memory_space<vmem>>, vector<16x256xbf16>
    %cst_20 = arith.constant dense<0.000000e+00> : vector<256x256xf32>
    %34 = tpu.matmul %31, %32, %cst_20 {dimension_numbers = #tpu.dot_dimension_numbers<[0], [0], [1], [1], [0, 1, 1, 1], [], []>} : vector<16x256xbf16>, vector<16x256xbf16>, vector<256x256xf32> -> vector<256x256xf32>
    %cst_21 = arith.constant dense<0xFF800000> : vector<256xf32>
    %35 = vector.multi_reduction <maximumf>, %34, %cst_21 [1] : vector<256x256xf32> to vector<256xf32>
    %36 = vector.shape_cast %35 : vector<256xf32> to vector<256x1xf32>
    %37 = vector.broadcast %36 : vector<256x1xf32> to vector<256x256xf32>
    %38 = arith.subf %34, %37 : vector<256x256xf32>
    %39 = math.exp %38 : vector<256x256xf32>
    %cst_22 = arith.constant dense<0.000000e+00> : vector<256xf32>
    %40 = vector.multi_reduction <add>, %39, %cst_22 [1] : vector<256x256xf32> to vector<256xf32>
    %41 = vector.shape_cast %40 : vector<256xf32> to vector<256x1xf32>
    %42 = tpu.reciprocal %41 {approx = true} : vector<256x1xf32> -> vector<256x1xf32>
    %43 = vector.broadcast %42 : vector<256x1xf32> to vector<256x256xf32>
    %44 = arith.mulf %39, %43 : vector<256x256xf32>
    %45 = arith.truncf %44 : vector<256x256xf32> to vector<256x256xbf16>
    %cst_23 = arith.constant dense<0.000000e+00> : vector<16x256xf32>
    %46 = tpu.matmul %33, %45, %cst_23 {dimension_numbers = #tpu.dot_dimension_numbers<[1], [1], [0], [0], [0, 0, 1, 0], [], []>} : vector<16x256xbf16>, vector<256x256xbf16>, vector<16x256xf32> -> vector<16x256xf32>
    %47 = arith.truncf %46 : vector<16x256xf32> to vector<16x256xbf16>
    %c0_24 = arith.constant 0 : index
    %c0_25 = arith.constant 0 : index
    %48 = vector.load %arg10[%c0_24, %c0_25] : memref<64x256xbf16, #tpu.memory_space<vmem>>, vector<16x256xbf16>
    tpu.vector_store %arg10[%c0_24, %c0_25], %47 {strides = array<i32>} : memref<64x256xbf16, #tpu.memory_space<vmem>>, vector<16x256xbf16>,
    %c16 = arith.constant 16 : index
    %c0_26 = arith.constant 0 : index
    %49 = vector.load %arg9[%c16, %c0_26] : memref<192x256xbf16, #tpu.memory_space<vmem>>, vector<16x256xbf16>
    %c80 = arith.constant 80 : index
    %c0_27 = arith.constant 0 : index
    %50 = vector.load %arg9[%c80, %c0_27] : memref<192x256xbf16, #tpu.memory_space<vmem>>, vector<16x256xbf16>
    %c144 = arith.constant 144 : index
    %c0_28 = arith.constant 0 : index
    %51 = vector.load %arg9[%c144, %c0_28] : memref<192x256xbf16, #tpu.memory_space<vmem>>, vector<16x256xbf16>
    %cst_29 = arith.constant dense<0.000000e+00> : vector<256x256xf32>
    %52 = tpu.matmul %49, %50, %cst_29 {dimension_numbers = #tpu.dot_dimension_numbers<[0], [0], [1], [1], [0, 1, 1, 1], [], []>} : vector<16x256xbf16>, vector<16x256xbf16>, vector<256x256xf32> -> vector<256x256xf32>
    %cst_30 = arith.constant dense<0xFF800000> : vector<256xf32>
    %53 = vector.multi_reduction <maximumf>, %52, %cst_30 [1] : vector<256x256xf32> to vector<256xf32>
    %54 = vector.shape_cast %53 : vector<256xf32> to vector<256x1xf32>
    %55 = vector.broadcast %54 : vector<256x1xf32> to vector<256x256xf32>
    %56 = arith.subf %52, %55 : vector<256x256xf32>
    %57 = math.exp %56 : vector<256x256xf32>
    %cst_31 = arith.constant dense<0.000000e+00> : vector<256xf32>
    %58 = vector.multi_reduction <add>, %57, %cst_31 [1] : vector<256x256xf32> to vector<256xf32>
    %59 = vector.shape_cast %58 : vector<256xf32> to vector<256x1xf32>
    %60 = tpu.reciprocal %59 {approx = true} : vector<256x1xf32> -> vector<256x1xf32>
    %61 = vector.broadcast %60 : vector<256x1xf32> to vector<256x256xf32>
    %62 = arith.mulf %57, %61 : vector<256x256xf32>
    %63 = arith.truncf %62 : vector<256x256xf32> to vector<256x256xbf16>
    %cst_32 = arith.constant dense<0.000000e+00> : vector<16x256xf32>
    %64 = tpu.matmul %51, %63, %cst_32 {dimension_numbers = #tpu.dot_dimension_numbers<[1], [1], [0], [0], [0, 0, 1, 0], [], []>} : vector<16x256xbf16>, vector<256x256xbf16>, vector<16x256xf32> -> vector<16x256xf32>
    %65 = arith.truncf %64 : vector<16x256xf32> to vector<16x256xbf16>
    %c16_33 = arith.constant 16 : index
    %c0_34 = arith.constant 0 : index
    %66 = vector.load %arg10[%c16_33, %c0_34] : memref<64x256xbf16, #tpu.memory_space<vmem>>, vector<16x256xbf16>
    tpu.vector_store %arg10[%c16_33, %c0_34], %65 {strides = array<i32>} : memref<64x256xbf16, #tpu.memory_space<vmem>>, vector<16x256xbf16>,
    %c32 = arith.constant 32 : index
    %c0_35 = arith.constant 0 : index
    %67 = vector.load %arg9[%c32, %c0_35] : memref<192x256xbf16, #tpu.memory_space<vmem>>, vector<16x256xbf16>
    %c96 = arith.constant 96 : index
    %c0_36 = arith.constant 0 : index
    %68 = vector.load %arg9[%c96, %c0_36] : memref<192x256xbf16, #tpu.memory_space<vmem>>, vector<16x256xbf16>
    %c160 = arith.constant 160 : index
    %c0_37 = arith.constant 0 : index
    %69 = vector.load %arg9[%c160, %c0_37] : memref<192x256xbf16, #tpu.memory_space<vmem>>, vector<16x256xbf16>
    %cst_38 = arith.constant dense<0.000000e+00> : vector<256x256xf32>
    %70 = tpu.matmul %67, %68, %cst_38 {dimension_numbers = #tpu.dot_dimension_numbers<[0], [0], [1], [1], [0, 1, 1, 1], [], []>} : vector<16x256xbf16>, vector<16x256xbf16>, vector<256x256xf32> -> vector<256x256xf32>
    %cst_39 = arith.constant dense<0xFF800000> : vector<256xf32>
    %71 = vector.multi_reduction <maximumf>, %70, %cst_39 [1] : vector<256x256xf32> to vector<256xf32>
    %72 = vector.shape_cast %71 : vector<256xf32> to vector<256x1xf32>
    %73 = vector.broadcast %72 : vector<256x1xf32> to vector<256x256xf32>
    %74 = arith.subf %70, %73 : vector<256x256xf32>
    %75 = math.exp %74 : vector<256x256xf32>
    %cst_40 = arith.constant dense<0.000000e+00> : vector<256xf32>
    %76 = vector.multi_reduction <add>, %75, %cst_40 [1] : vector<256x256xf32> to vector<256xf32>
    %77 = vector.shape_cast %76 : vector<256xf32> to vector<256x1xf32>
    %78 = tpu.reciprocal %77 {approx = true} : vector<256x1xf32> -> vector<256x1xf32>
    %79 = vector.broadcast %78 : vector<256x1xf32> to vector<256x256xf32>
    %80 = arith.mulf %75, %79 : vector<256x256xf32>
    %81 = arith.truncf %80 : vector<256x256xf32> to vector<256x256xbf16>
    %cst_41 = arith.constant dense<0.000000e+00> : vector<16x256xf32>
    %82 = tpu.matmul %69, %81, %cst_41 {dimension_numbers = #tpu.dot_dimension_numbers<[1], [1], [0], [0], [0, 0, 1, 0], [], []>} : vector<16x256xbf16>, vector<256x256xbf16>, vector<16x256xf32> -> vector<16x256xf32>
    %83 = arith.truncf %82 : vector<16x256xf32> to vector<16x256xbf16>
    %c32_42 = arith.constant 32 : index
    %c0_43 = arith.constant 0 : index
    %84 = vector.load %arg10[%c32_42, %c0_43] : memref<64x256xbf16, #tpu.memory_space<vmem>>, vector<16x256xbf16>
    tpu.vector_store %arg10[%c32_42, %c0_43], %83 {strides = array<i32>} : memref<64x256xbf16, #tpu.memory_space<vmem>>, vector<16x256xbf16>,
    %c48 = arith.constant 48 : index
    %c0_44 = arith.constant 0 : index
    %85 = vector.load %arg9[%c48, %c0_44] : memref<192x256xbf16, #tpu.memory_space<vmem>>, vector<16x256xbf16>
    %c112 = arith.constant 112 : index
    %c0_45 = arith.constant 0 : index
    %86 = vector.load %arg9[%c112, %c0_45] : memref<192x256xbf16, #tpu.memory_space<vmem>>, vector<16x256xbf16>
    %c176 = arith.constant 176 : index
    %c0_46 = arith.constant 0 : index
    %87 = vector.load %arg9[%c176, %c0_46] : memref<192x256xbf16, #tpu.memory_space<vmem>>, vector<16x256xbf16>
    %cst_47 = arith.constant dense<0.000000e+00> : vector<256x256xf32>
    %88 = tpu.matmul %85, %86, %cst_47 {dimension_numbers = #tpu.dot_dimension_numbers<[0], [0], [1], [1], [0, 1, 1, 1], [], []>} : vector<16x256xbf16>, vector<16x256xbf16>, vector<256x256xf32> -> vector<256x256xf32>
    %cst_48 = arith.constant dense<0xFF800000> : vector<256xf32>
    %89 = vector.multi_reduction <maximumf>, %88, %cst_48 [1] : vector<256x256xf32> to vector<256xf32>
    %90 = vector.shape_cast %89 : vector<256xf32> to vector<256x1xf32>
    %91 = vector.broadcast %90 : vector<256x1xf32> to vector<256x256xf32>
    %92 = arith.subf %88, %91 : vector<256x256xf32>
    %93 = math.exp %92 : vector<256x256xf32>
    %cst_49 = arith.constant dense<0.000000e+00> : vector<256xf32>
    %94 = vector.multi_reduction <add>, %93, %cst_49 [1] : vector<256x256xf32> to vector<256xf32>
    %95 = vector.shape_cast %94 : vector<256xf32> to vector<256x1xf32>
    %96 = tpu.reciprocal %95 {approx = true} : vector<256x1xf32> -> vector<256x1xf32>
    %97 = vector.broadcast %96 : vector<256x1xf32> to vector<256x256xf32>
    %98 = arith.mulf %93, %97 : vector<256x256xf32>
    %99 = arith.truncf %98 : vector<256x256xf32> to vector<256x256xbf16>
    %cst_50 = arith.constant dense<0.000000e+00> : vector<16x256xf32>
    %100 = tpu.matmul %87, %99, %cst_50 {dimension_numbers = #tpu.dot_dimension_numbers<[1], [1], [0], [0], [0, 0, 1, 0], [], []>} : vector<16x256xbf16>, vector<256x256xbf16>, vector<16x256xf32> -> vector<16x256xf32>
    %101 = arith.truncf %100 : vector<16x256xf32> to vector<16x256xbf16>
    %c48_51 = arith.constant 48 : index
    %c0_52 = arith.constant 0 : index
    %102 = vector.load %arg10[%c48_51, %c0_52] : memref<64x256xbf16, #tpu.memory_space<vmem>>, vector<16x256xbf16>
    tpu.vector_store %arg10[%c48_51, %c0_52], %101 {strides = array<i32>} : memref<64x256xbf16, #tpu.memory_space<vmem>>, vector<16x256xbf16>,
    %c0_53 = arith.constant 0 : index
    %c0_54 = arith.constant 0 : index
    %103 = vector.load %arg6[%c0_53, %c0_54] : memref<64x64xbf16, #tpu.memory_space<vmem>>, vector<64x64xbf16>
    %c0_55 = arith.constant 0 : index
    %c0_56 = arith.constant 0 : index
    %104 = vector.load %arg10[%c0_55, %c0_56] : memref<64x256xbf16, #tpu.memory_space<vmem>>, vector<64x256xbf16>
    %cst_57 = arith.constant dense<0.000000e+00> : vector<64x256xf32>
    %105 = tpu.matmul %103, %104, %cst_57 {dimension_numbers = #tpu.dot_dimension_numbers<[1], [0], [0], [1], [0, 0, 1, 1], [], []>} : vector<64x64xbf16>, vector<64x256xbf16>, vector<64x256xf32> -> vector<64x256xf32>
    %106 = arith.addf %1, %105 : vector<64x256xf32>
    %c0_58 = arith.constant 0 : index
    %c0_59 = arith.constant 0 : index
    %107 = vector.load %arg7[%c0_58, %c0_59] : memref<64x1xf32, #tpu.memory_space<vmem>>, vector<64x1xf32>
    %108 = vector.broadcast %107 : vector<64x1xf32> to vector<64x256xf32>
    %109 = arith.addf %106, %108 : vector<64x256xf32>
    %c0_60 = arith.constant 0 : index
    %c0_61 = arith.constant 0 : index
    %c0_62 = arith.constant 0 : index
    %110 = vector.load %arg8[%c0_60, %c0_61, %c0_62] : memref<1x64x256xf32, #tpu.memory_space<vmem>>, vector<1x64x256xf32>
    %111 = vector.shape_cast %110 : vector<1x64x256xf32> to vector<64x256xf32>
    %112 = vector.shape_cast %109 : vector<64x256xf32> to vector<1x64x256xf32>
    tpu.vector_store %arg8[%c0_60, %c0_61, %c0_62], %112 {strides = array<i32>} : memref<1x64x256xf32, #tpu.memory_space<vmem>>, vector<1x64x256xf32>,
    return
  }
  func.func @transform_0(%arg0: i32) -> (i32, i32, i32) {
    %c0_i32 = arith.constant 0 : i32
    %c0_i32_0 = arith.constant 0 : i32
    %c0_i32_1 = arith.constant 0 : i32
    return %arg0, %c0_i32, %c0_i32_0 : i32, i32, i32
  }
  func.func @transform_1(%arg0: i32) -> (i32, i32) {
    %c0_i32 = arith.constant 0 : i32
    %c0_i32_0 = arith.constant 0 : i32
    %c0_i32_1 = arith.constant 0 : i32
    return %c0_i32, %c0_i32_0 : i32, i32
  }
  func.func @transform_2(%arg0: i32) -> (i32, i32) {
    %c0_i32 = arith.constant 0 : i32
    %c0_i32_0 = arith.constant 0 : i32
    %c0_i32_1 = arith.constant 0 : i32
    return %c0_i32, %c0_i32_0 : i32, i32
  }
  func.func @transform_3(%arg0: i32) -> (i32, i32) {
    %c0_i32 = arith.constant 0 : i32
    %c0_i32_0 = arith.constant 0 : i32
    %c0_i32_1 = arith.constant 0 : i32
    return %c0_i32, %c0_i32_0 : i32, i32
  }
  func.func @transform_4(%arg0: i32) -> (i32, i32) {
    %c0_i32 = arith.constant 0 : i32
    %c0_i32_0 = arith.constant 0 : i32
    %c0_i32_1 = arith.constant 0 : i32
    return %c0_i32, %c0_i32_0 : i32, i32
  }
  func.func @transform_5(%arg0: i32) -> (i32, i32) {
    %c0_i32 = arith.constant 0 : i32
    %c0_i32_0 = arith.constant 0 : i32
    %c0_i32_1 = arith.constant 0 : i32
    return %c0_i32, %c0_i32_0 : i32, i32
  }
  func.func @transform_6(%arg0: i32) -> (i32, i32) {
    %c0_i32 = arith.constant 0 : i32
    %c0_i32_0 = arith.constant 0 : i32
    %c0_i32_1 = arith.constant 0 : i32
    return %c0_i32, %c0_i32_0 : i32, i32
  }
  func.func @transform_7(%arg0: i32) -> (i32, i32, i32) {
    %c0_i32 = arith.constant 0 : i32
    %c0_i32_0 = arith.constant 0 : i32
    %c0_i32_1 = arith.constant 0 : i32
    return %arg0, %c0_i32, %c0_i32_0 : i32, i32, i32
  }
}

</mosaic_0001>

<bundles_post_ra>
// kernel: enhanced_self_attention.1
= control target key start
LH: loop header
LB: loop body
LE: loop exit
PB: predicated region body
PF: predicated region fallthrough
CT: control target
= control target key end

     0   :  { %s5754_s24 = smov 0   ;;  %s8647_s0 = inlined_call_operand.vmem [shape: f32[2,64,256], index: 0, kind: input, shape index: {}, may-alias: {0,7}]   ;;  %s8648_s1 = inlined_call_operand.vmem [shape: f32[64,64], index: 1, kind: input, shape index: {}]   ;;  %s8649_s2 = inlined_call_operand.vmem [shape: f32[64,1], index: 2, kind: input, shape index: {}]   ;;  %s8650_s3 = inlined_call_operand.vmem [shape: f32[64,1], index: 3, kind: input, shape index: {}]   ;;  %s8651_s4 = inlined_call_operand.vmem [shape: bf16[192,64], index: 4, kind: input, shape index: {}]   ;;  %s8652_s5 = inlined_call_operand.vmem [shape: bf16[64,64], index: 5, kind: input, shape index: {}]   ;;  %s8653_s6 = inlined_call_operand.vmem [shape: f32[64,1], index: 6, kind: input, shape index: {}]   ;;  %s8654_s7 = inlined_call_operand.vmem [shape: f32[2,64,256], index: 7, kind: output, shape index: {}, may-alias: {0,7}]  }
   0x1 LB: > { %s4709_s25 = sadd.s32 4294967295, %s5709_s24   ;;  %p4713_p0 = scmp.ge.s32.totalorder %s5709_s24, 1  ;;  %s5709_s24 = sphi %s5754_s24, %s17_s24  }
   0x2   : > { %p237_p1 = scmp.lt.s32.totalorder %s5709_s24, 3 }
   0x4   : > { %p238_p2 = pnand %p4713_p0, %p237_p1 }
   0x6   : > { %241 = sbr.rel (%p238_p2) target bundleno = 4558 (0x11ce), region = 48 }
   0xd   : > { %p269_p3 = scmp.lt.s32.totalorder %s4709_s25, 1  ;;  %v369_v48 = vld [vmem:[%s8648_s1] sm:$0xff]  ;;  %vm377_vm0 = vcmask 523264   ;;  %vm360_vm1 = vcmask 7168   ;;  %s5711_s23 = smov 1   ;;  %vm1122_vm2 = vcmask 130048  }
   0xe   : > { %4858 = vmatprep.mubr.msk.f32.mxu0 %vm377_vm0, %v369_v48  ;;  %s5713_s27 = smov 127  }
   0xf   : > { %s9197_s25 = smov (!%p269_p3, %s4709_s25), 1 }
  0x10   : > { %s4824_s26 = sshll.u32 %s9197_s25, 7 }
  0x11   : > { %s5770_s29 = scalar_lea.vmem %s8647_s0, %s4824_s26  ;;  %s8611_s12 = scalar_lea.vmem %s8654_s7, %s4824_s26 }
  0x12   : > { %v5773_v0 = vld [vmem:[%s5770_s29 + $0x30] sm:$0xff]  ;;  %v5776_v1 = vld [vmem:[%s5770_s29 + $0x38] sm:$0xff]  ;;  %v5779_v2 = vld [vmem:[%s5770_s29] sm:$0xff] }
  0x13   : > { %8820 = vst [vmem:[#allocation4_spill] sm:$0xff] %v5773_v0  ;;  %8821 = vst [vmem:[#allocation5_spill] sm:$0xff] %v5776_v1  ;;  %v305_v3 = vadd.f32 %v5776_v1, %v5773_v0  ;;  %v5784_v4 = vld [vmem:[%s5770_s29 + $0x8] sm:$0xff]  ;;  %v320_v5 = vmul.f32 %v5779_v2, %v5779_v2  ;;  %v5789_v6 = vld [vmem:[%s5770_s29 + $0x10] sm:$0xff]  ;;  %v326_v17 = vmul.f32 %v5773_v0, %v5773_v0 }
  0x14   : > { %v5792_v7 = vld [vmem:[%s5770_s29 + $0x18] sm:$0xff]  ;;  %v296_v8 = vadd.f32 %v5784_v4, %v5779_v2  ;;  %v321_v9 = vmul.f32 %v5784_v4, %v5784_v4  ;;  %v322_v10 = vmul.f32 %v5789_v6, %v5789_v6  ;;  %v5805_v14 = vld [vmem:[%s5770_s29 + $0x20] sm:$0xff]  ;;  %v5808_v15 = vld [vmem:[%s5770_s29 + $0x28] sm:$0xff]  ;;  %v327_v18 = vmul.f32 %v5776_v1, %v5776_v1 }
  0x15   : > { %306 = vadd.xlane.f32.xlu1 %v305_v3  ;;  %v323_v11 = vmul.f32 %v5792_v7, %v5792_v7  ;;  %v299_v13 = vadd.f32 %v5792_v7, %v5789_v6  ;;  %8822 = vst [vmem:[#allocation6_spill] sm:$0xff] %v5805_v14  ;;  %8823 = vst [vmem:[#allocation7_spill] sm:$0xff] %v5808_v15  ;;  %v302_v19 = vadd.f32 %v5808_v15, %v5805_v14  ;;  %v5821_v24 = vld [vmem:[%s5770_s29 + $0x50] sm:$0xff]  ;;  %v5824_v25 = vld [vmem:[%s5770_s29 + $0x58] sm:$0xff] }
  0x16   : > { %297 = vadd.xlane.f32.xlu0 %v296_v8  ;;  %v336_v12 = vadd.f32 %v321_v9, %v320_v5  ;;  %v324_v20 = vmul.f32 %v5805_v14, %v5805_v14  ;;  %v325_v21 = vmul.f32 %v5808_v15, %v5808_v15  ;;  %v345_v22 = vadd.f32 %v327_v18, %v326_v17  ;;  %v5827_v26 = vld [vmem:[%s5770_s29 + $0x40] sm:$0xff]  ;;  %v5830_v27 = vld [vmem:[%s5770_s29 + $0x48] sm:$0xff]  ;;  %v5845_v36 = vld [vmem:[%s5770_s29 + $0x70] sm:$0xff] }
  0x17   : > { %v339_v16 = vadd.f32 %v323_v11, %v322_v10  ;;  %8824 = vst [vmem:[#allocation8_spill] sm:$0xff] %v5821_v24  ;;  %8825 = vst [vmem:[#allocation9_spill] sm:$0xff] %v5824_v25  ;;  %v311_v28 = vadd.f32 %v5824_v25, %v5821_v24  ;;  %v330_v29 = vmul.f32 %v5821_v24, %v5821_v24  ;;  %v5848_v37 = vld [vmem:[%s5770_s29 + $0x78] sm:$0xff]  ;;  %v5851_v38 = vld [vmem:[%s5770_s29 + $0x60] sm:$0xff] }
  0x18   : > { %v342_v23 = vadd.f32 %v325_v21, %v324_v20  ;;  %8826 = vst [vmem:[#allocation10_spill] sm:$0xff] %v5827_v26  ;;  %8827 = vst [vmem:[#allocation11_spill] sm:$0xff] %v5830_v27  ;;  %v331_v30 = vmul.f32 %v5824_v25, %v5824_v25  ;;  %v308_v31 = vadd.f32 %v5830_v27, %v5827_v26  ;;  %v5854_v39 = vld [vmem:[%s5770_s29 + $0x68] sm:$0xff] }
  0x19   : > { %337 = vadd.xlane.f32.xlu1 %v336_v12  ;;  %v328_v32 = vmul.f32 %v5827_v26, %v5827_v26  ;;  %v329_v33 = vmul.f32 %v5830_v27, %v5830_v27  ;;  %8828 = vst [vmem:[#allocation12_spill] sm:$0xff] %v5845_v36  ;;  %8829 = vst [vmem:[#allocation13_spill] sm:$0xff] %v5848_v37  ;;  %v317_v40 = vadd.f32 %v5848_v37, %v5845_v36  ;;  %v370_v21 = vld [vmem:[%s8648_s1 + $0x8] sm:$0xff] }
  0x1a   : > { %300 = vadd.xlane.f32.xlu0 %v299_v13  ;;  %v351_v34 = vadd.f32 %v331_v30, %v330_v29  ;;  %8830 = vst [vmem:[#allocation14_spill] sm:$0xff] %v5851_v38  ;;  %8831 = vst [vmem:[#allocation15_spill] sm:$0xff] %v5854_v39  ;;  %v334_v41 = vmul.f32 %v5845_v36, %v5845_v36  ;;  %v335_v42 = vmul.f32 %v5848_v37, %v5848_v37  ;;  %v374_v29 = vld [vmem:[%s8648_s1 + $0x28] sm:$0xff]  ;;  %v375_v30 = vld [vmem:[%s8648_s1 + $0x30] sm:$0xff] }
  0x1b   : > { %v348_v35 = vadd.f32 %v329_v33, %v328_v32  ;;  %v314_v43 = vadd.f32 %v5854_v39, %v5851_v38  ;;  %v332_v44 = vmul.f32 %v5851_v38, %v5851_v38  ;;  %v333_v45 = vmul.f32 %v5854_v39, %v5854_v39 }
  0x1c   : > { %v357_v46 = vadd.f32 %v335_v42, %v334_v41 }
  0x1d   : > { %340 = vadd.xlane.f32.xlu1 %v339_v16  ;;  %v354_v47 = vadd.f32 %v333_v45, %v332_v44 }
  0x1e   : > { %303 = vadd.xlane.f32.xlu0 %v302_v19 }
  0x21   : > { %346 = vadd.xlane.f32.xlu1 %v345_v22  ;;  %v371_v22 = vld [vmem:[%s8648_s1 + $0x10] sm:$0xff] }
  0x22   : > { %343 = vadd.xlane.f32.xlu0 %v342_v23  ;;  %v372_v23 = vld [vmem:[%s8648_s1 + $0x18] sm:$0xff] }
  0x25   : > { %312 = vadd.xlane.f32.xlu1 %v311_v28  ;;  %v373_v28 = vld [vmem:[%s8648_s1 + $0x20] sm:$0xff] }
  0x26   : > { %309 = vadd.xlane.f32.xlu0 %v308_v31  ;;  %v376_v31 = vld [vmem:[%s8648_s1 + $0x38] sm:$0xff] }
  0x29   : > { %352 = vadd.xlane.f32.xlu1 %v351_v34 }
  0x2a   : > { %349 = vadd.xlane.f32.xlu0 %v348_v35 }
  0x2d   : > { %318 = vadd.xlane.f32.xlu1 %v317_v40 }
  0x2e   : > { %315 = vadd.xlane.f32.xlu0 %v314_v43 }
  0x31   : > { %358 = vadd.xlane.f32.xlu1 %v357_v46 }
  0x32   : > { %355 = vadd.xlane.f32.xlu0 %v354_v47 }
  0xa2   : > { %v307_v49 = vpop.xlane.xlu1 %306 }
  0xa3   : > { %v298_v50 = vpop.xlane.xlu0 %297 }
  0xa6   : > { %v338_v51 = vpop.xlane.xlu1 %337 }
  0xa7   : > { %v301_v52 = vpop.xlane.xlu0 %300  ;;  %v361_v54 = vsel %vm360_vm1, %v298_v50, %v338_v51 }
  0xaa   : > { %v341_v53 = vpop.xlane.xlu1 %340 }
  0xab   : > { %v362_v55 = vsel %vm360_vm1, %v301_v52, %v341_v53  ;;  %v304_v56 = vpop.xlane.xlu0 %303 }
  0xac   : > { %v4870_v57 = vpack.c.bf16 %v362_v55, %v361_v54 }
  0xae   : > { %v347_v58 = vpop.xlane.xlu1 %346  ;;  %4871 = vmatprep.subr.bf16.mxu0 %v4870_v57 }
  0xaf   : > { %v364_v59 = vsel %vm360_vm1, %v307_v49, %v347_v58  ;;  %v344_v60 = vpop.xlane.xlu0 %343  ;;  %4873 = vmatpush3.bf16.msra.mxu0 %v4870_v57 }
  0xb0   : > { %v363_v61 = vsel %vm360_vm1, %v304_v56, %v344_v60 }
  0xb1   : > { %v4874_v62 = vpack.c.bf16 %v364_v59, %v363_v61  ;;  %v8655_v59 = vmov 0  }
  0xb2   : > { %v313_v63 = vpop.xlane.xlu1 %312  ;;  %4897 = vset.pattern.permute.xlu1 %v8655_v59  ;;  %4898 = vset.pattern.permute.xlu0 %v8655_v59 }
  0xb3   : > { %4875 = vmatprep.subr.bf16.mxu0 %v4874_v62  ;;  %v310_v3 = vpop.xlane.xlu0 %309  ;;  %915 = vmatprep.mubr.bf16.mxu1 %v8655_v59 }
  0xb4   : > { %4877 = vmatpush3.bf16.msra.mxu0 %v4874_v62 }
  0xb6   : > { %v353_v5 = vpop.xlane.xlu1 %352 }
  0xb7   : > { %v366_v8 = vsel %vm360_vm1, %v313_v63, %v353_v5  ;;  %v350_v9 = vpop.xlane.xlu0 %349 }
  0xb8   : > { %v365_v10 = vsel %vm360_vm1, %v310_v3, %v350_v9 }
  0xb9   : > { %v4878_v11 = vpack.c.bf16 %v366_v8, %v365_v10 }
  0xba   : > { %v319_v12 = vpop.xlane.xlu1 %318 }
  0xbb   : > { %4879 = vmatprep.subr.bf16.mxu0 %v4878_v11  ;;  %v316_v13 = vpop.xlane.xlu0 %315 }
  0xbc   : > { %4881 = vmatpush3.bf16.msra.mxu0 %v4878_v11 }
  0xbe   : > { %v359_v16 = vpop.xlane.xlu1 %358 }
  0xbf   : > { %v368_v17 = vsel %vm360_vm1, %v319_v12, %v359_v16  ;;  %v356_v18 = vpop.xlane.xlu0 %355 }
  0xc0   : > { %v367_v19 = vsel %vm360_vm1, %v316_v13, %v356_v18 }
  0xc1   : > { %v4882_v20 = vpack.c.bf16 %v368_v17, %v367_v19 }
  0xc3   : > { %4883 = vmatprep.subr.bf16.mxu0 %v4882_v20 }
  0xc4   : > { %4885 = vmatpush3.bf16.msra.mxu0 %v4882_v20 }
  0xc7   : > { %4859 = vmatmul.mubr.msk.f32.vlgmr.msra.gmra.mrb[0].mxu0 %vm377_vm0, %v370_v21 }
  0xc8   : > { %4861 = vmatprep.mubr.msk.f32.mxu0 %vm377_vm0, %v371_v22 }
  0xcb   : > { %4862 = vmatmul.mubr.msk.f32.gmra.mrb[2].mxu0 %vm377_vm0, %v372_v23 }
  0xcc   : > { %4864 = vmatprep.mubr.msk.f32.mxu0 %vm377_vm0, %v373_v28 }
  0xcf   : > { %4865 = vmatmul.mubr.msk.f32.gmra.mrb[4].mxu0 %vm377_vm0, %v374_v29 }
  0xd0   : > { %4867 = vmatprep.mubr.msk.f32.mxu0 %vm377_vm0, %v375_v30 }
  0xd3   : > { %4868 = vmatmul.mubr.msk.f32.gmra.mrb[6].mxu0 %vm377_vm0, %v376_v31 }
  0xd4   : > { %1203 = vmatprep.mubr.bf16.mxu0 %v8655_v59 }
 0x19a   : > { %v5908_v32 = vpop.f32.mrb[0].mxu0 }
 0x19b   : > { %v508_v33 = vmul.f32 %v5908_v32, %v5908_v32  ;;  %v5912_v34 = vpop.f32.mrb[1].mxu0 }
 0x19c   : > { %v507_v35 = vmul.f32 %v5912_v34, %v5912_v34 }
 0x19d   : > { %525 = vrot.lane.b32.xlu1 %v508_v33, %s5711_s23 }
 0x19e   : > { %523 = vrot.lane.b32.xlu0 %v507_v35, %s5711_s23  ;;  %v5916_v40 = vpop.f32.mrb[2].mxu0  ;;  %v556_v35 = vld [vmem:[%s8649_s2 + $0x8] sm:$0xff] }
 0x19f   : > { %v510_v41 = vmul.f32 %v5916_v40, %v5916_v40  ;;  %v5920_v42 = vpop.f32.mrb[3].mxu0 }
 0x1a0   : > { %v509_v44 = vmul.f32 %v5920_v42, %v5920_v42 }
 0x1a1   : > { %529 = vrot.lane.b32.xlu1 %v510_v41, %s5711_s23  ;;  %v555_v41 = vld [vmem:[%s8649_s2] sm:$0xff] }
 0x1a2   : > { %v5922_v43 = vpop.f32.mrb[4].mxu0 }
 0x1a3   : > { %v5926_v45 = vpop.f32.mrb[5].mxu0  ;;  %v512_v47 = vmul.f32 %v5922_v43, %v5922_v43 }
 0x1a4   : > { %v511_v46 = vmul.f32 %v5926_v45, %v5926_v45 }
 0x1a5   : > { %527 = vrot.lane.b32.xlu1 %v509_v44, %s5711_s23 }
 0x1a6   : > { %531 = vrot.lane.b32.xlu0 %v511_v46, %s5711_s23  ;;  %v5932_v48 = vpop.f32.mrb[6].mxu0 }
 0x1a7   : > { %v5934_v49 = vpop.f32.mrb[7].mxu0  ;;  %v514_v51 = vmul.f32 %v5932_v48, %v5932_v48 }
 0x1a8   : > { %v513_v50 = vmul.f32 %v5934_v49, %v5934_v49 }
 0x1a9   : > { %533 = vrot.lane.b32.xlu1 %v512_v47, %s5711_s23 }
 0x1aa   : > { %535 = vrot.lane.b32.xlu0 %v513_v50, %s5711_s23 }
 0x1ad   : > { %537 = vrot.lane.b32.xlu1 %v514_v51, %s5711_s23  ;;  %v620_v51 = vld [vmem:[%s8650_s3 + $0x8] sm:$0xff] }
 0x20f   : > { %v526_v52 = vpop.permute.xlu1 %525 }
 0x210   : > { %v548_v53 = vsub.f32 %v5908_v32, %v526_v52  ;;  %v524_v54 = vpop.permute.xlu0 %523 }
 0x211   : > { %v547_v55 = vsub.f32 %v5912_v34, %v524_v54  ;;  %v619_v54 = vld [vmem:[%s8650_s3] sm:$0xff] }
 0x212   : > { %v564_v56 = vadd.f32 1e-05, %v548_v53  ;;  %v558_v53 = vld [vmem:[%s8649_s2 + $0x18] sm:$0xff] }
 0x213   : > { %v563_v57 = vadd.f32 1e-05, %v547_v55  ;;  %v530_v58 = vpop.permute.xlu1 %529 }
 0x214   : > { %4915 = vrsqrt.f32 %v564_v56  ;;  %v550_v60 = vsub.f32 %v5916_v40, %v530_v58 }
 0x215   : > { %4917 = vrsqrt.f32 %v563_v57 }
 0x216   : > { %v566_v61 = vadd.f32 1e-05, %v550_v60 }
 0x217   : > { %v528_v62 = vpop.permute.xlu1 %527 }
 0x218   : > { %4919 = vrsqrt.f32 %v566_v61  ;;  %v549_v63 = vsub.f32 %v5920_v42, %v528_v62  ;;  %v532_v3 = vpop.permute.xlu0 %531 }
 0x219   : > { %v551_v5 = vsub.f32 %v5926_v45, %v532_v3  ;;  %v621_v3 = vld [vmem:[%s8650_s3 + $0x10] sm:$0xff] }
 0x21a   : > { %v565_v8 = vadd.f32 1e-05, %v549_v63 }
 0x21b   : > { %v567_v9 = vadd.f32 1e-05, %v551_v5  ;;  %v534_v10 = vpop.permute.xlu1 %533  ;;  %v560_v5 = vld [vmem:[%s8649_s2 + $0x28] sm:$0xff] }
 0x21c   : > { %4921 = vrsqrt.f32 %v565_v8  ;;  %v552_v11 = vsub.f32 %v5922_v43, %v534_v10  ;;  %v536_v12 = vpop.permute.xlu0 %535  ;;  %v559_v8 = vld [vmem:[%s8649_s2 + $0x20] sm:$0xff] }
 0x21d   : > { %v553_v13 = vsub.f32 %v5934_v49, %v536_v12  ;;  %4923 = vrsqrt.f32 %v567_v9  ;;  %v622_v9 = vld [vmem:[%s8650_s3 + $0x18] sm:$0xff] }
 0x21e   : > { %v4916_v16 = vpop.eup %4915  ;;  %v568_v17 = vadd.f32 1e-05, %v552_v11 }
 0x21f   : > { %v4918_v18 = vpop.eup %4917  ;;  %v569_v19 = vadd.f32 1e-05, %v553_v13  ;;  %589 = vrot.lane.b32.xlu1 %v4916_v16, %s5713_s27  ;;  %v538_v20 = vpop.permute.xlu1 %537 }
 0x220   : > { %4925 = vrsqrt.f32 %v568_v17  ;;  %v554_v21 = vsub.f32 %v5932_v48, %v538_v20  ;;  %587 = vrot.lane.b32.xlu0 %v4918_v18, %s5713_s27  ;;  %v562_v18 = vld [vmem:[%s8649_s2 + $0x38] sm:$0xff]  ;;  %v561_v20 = vld [vmem:[%s8649_s2 + $0x30] sm:$0xff] }
 0x221   : > { %4927 = vrsqrt.f32 %v569_v19 }
 0x222   : > { %v4920_v22 = vpop.eup %4919  ;;  %v570_v23 = vadd.f32 1e-05, %v554_v21 }
 0x223   : > { %593 = vrot.lane.b32.xlu1 %v4920_v22, %s5713_s27  ;;  %v624_v22 = vld [vmem:[%s8650_s3 + $0x28] sm:$0xff] }
 0x224   : > { %4929 = vrsqrt.f32 %v570_v23 }
 0x226   : > { %v4922_v28 = vpop.eup %4921 }
 0x227   : > { %591 = vrot.lane.b32.xlu0 %v4922_v28, %s5713_s27  ;;  %v4924_v29 = vpop.eup %4923 }
 0x22a   : > { %v4926_v30 = vpop.eup %4925 }
 0x22b   : > { %597 = vrot.lane.b32.xlu1 %v4926_v30, %s5713_s27  ;;  %595 = vrot.lane.b32.xlu0 %v4924_v29, %s5713_s27  ;;  %v4928_v31 = vpop.eup %4927 }
 0x22e   : > { %v4930_v33 = vpop.eup %4929 }
 0x22f   : > { %601 = vrot.lane.b32.xlu1 %v4930_v33, %s5713_s27  ;;  %599 = vrot.lane.b32.xlu0 %v4928_v31, %s5713_s27  ;;  %v626_v33 = vld [vmem:[%s8650_s3 + $0x38] sm:$0xff] }
 0x291   : > { %v590_v44 = vpop.permute.xlu1 %589 }
 0x292   : > { %v612_v46 = vmul.f32 %v590_v44, %v556_v35  ;;  %v588_v47 = vpop.permute.xlu0 %587  ;;  %v625_v35 = vld [vmem:[%s8650_s3 + $0x30] sm:$0xff] }
 0x293   : > { %v611_v50 = vmul.f32 %v588_v47, %v555_v41 }
 0x294   : > { %v628_v52 = vmul.f32 %v5908_v32, %v612_v46  ;;  %650 = vperm.xlu1 %4897, %v612_v46   ;;  %v557_v32 = vld [vmem:[%s8649_s2 + $0x10] sm:$0xff] }
 0x295   : > { %v627_v55 = vmul.f32 %v611_v50, %v5912_v34  ;;  %v594_v56 = vpop.permute.xlu1 %593  ;;  %645 = vperm.xlu0 %4898, %v611_v50  }
 0x296   : > { %v636_v57 = vsub.f32 %v620_v51, %v628_v52  ;;  %v614_v58 = vmul.f32 %v594_v56, %v558_v53 }
 0x297   : > { %v635_v60 = vsub.f32 %v619_v54, %v627_v55 }
 0x298   : > { %v630_v63 = vmul.f32 %v5916_v40, %v614_v58 }
 0x299   : > { %706 = vperm.xlu0 %4898, %v636_v57   ;;  %701 = vperm.xlu1 %4897, %v635_v60   ;;  %v592_v61 = vpop.permute.xlu0 %591 }
 0x29a   : > { %v613_v62 = vmul.f32 %v592_v61, %v557_v32 }
 0x29c   : > { %v629_v34 = vmul.f32 %v613_v62, %v5920_v42  ;;  %v638_v42 = vsub.f32 %v622_v9, %v630_v63 }
 0x29d   : > { %v598_v10 = vpop.permute.xlu1 %597  ;;  %660 = vperm.xlu0 %4898, %v614_v58   ;;  %655 = vperm.xlu1 %4897, %v613_v62   ;;  %v596_v40 = vpop.permute.xlu0 %595 }
 0x29e   : > { %v637_v11 = vsub.f32 %v621_v3, %v629_v34  ;;  %v616_v12 = vmul.f32 %v598_v10, %v560_v5  ;;  %v615_v13 = vmul.f32 %v596_v40, %v559_v8 }
 0x2a0   : > { %v632_v16 = vmul.f32 %v5922_v43, %v616_v12  ;;  %v631_v17 = vmul.f32 %v615_v13, %v5926_v45  ;;  %v623_v43 = vld [vmem:[%s8650_s3 + $0x20] sm:$0xff] }
 0x2a1   : > { %716 = vperm.xlu0 %4898, %v638_v42   ;;  %711 = vperm.xlu1 %4897, %v637_v11   ;;  %v602_v19 = vpop.permute.xlu1 %601  ;;  %v600_v21 = vpop.permute.xlu0 %599 }
 0x2a2   : > { %v618_v45 = vmul.f32 %v602_v19, %v562_v18  ;;  %v617_v23 = vmul.f32 %v600_v21, %v561_v20  ;;  %v640_v28 = vsub.f32 %v624_v22, %v632_v16  ;;  %v639_v29 = vsub.f32 %v623_v43, %v631_v17 }
 0x2a4   : > { %v634_v30 = vmul.f32 %v5932_v48, %v618_v45  ;;  %v633_v31 = vmul.f32 %v617_v23, %v5934_v49 }
 0x2a5   : > { %670 = vperm.xlu0 %4898, %v616_v12   ;;  %665 = vperm.xlu1 %4897, %v615_v13  }
 0x2a6   : > { %v642_v41 = vsub.f32 %v626_v33, %v634_v30  ;;  %v641_v44 = vsub.f32 %v625_v35, %v633_v31 }
 0x2a9   : > { %726 = vperm.xlu0 %4898, %v640_v28   ;;  %721 = vperm.xlu1 %4897, %v639_v29  }
 0x2ad   : > { %680 = vperm.xlu0 %4898, %v618_v45   ;;  %675 = vperm.xlu1 %4897, %v617_v23  }
 0x2b1   : > { %736 = vperm.xlu0 %4898, %v642_v41   ;;  %731 = vperm.xlu1 %4897, %v641_v44  }
 0x313   : > { %v651_v46 = vpop.permute.xlu1 %650 }
 0x314   : > { %v646_v47 = vpop.permute.xlu0 %645  ;;  %v685_v48 = vmul.f32 %v651_v46, %v5789_v6  ;;  %v686_v49 = vmul.f32 %v651_v46, %v5792_v7 }
 0x315   : > { %v683_v50 = vmul.f32 %v646_v47, %v5779_v2  ;;  %v684_v51 = vmul.f32 %v646_v47, %v5784_v4 }
 0x318   : > { %v702_v52 = vpop.permute.xlu1 %701  ;;  %v707_v53 = vpop.permute.xlu0 %706 }
 0x319   : > { %v739_v54 = vadd.f32 %v702_v52, %v683_v50  ;;  %v740_v55 = vadd.f32 %v702_v52, %v684_v51  ;;  %v741_v56 = vadd.f32 %v707_v53, %v685_v48  ;;  %v742_v57 = vadd.f32 %v707_v53, %v686_v49  ;;  %v4899_v51 = vld [vmem:[%s8651_s4] sm:$0xff]   ;;  %v4900_v52 = vld [vmem:[%s8651_s4 + $0x8] sm:$0xff]   ;;  %v4901_v53 = vld [vmem:[%s8651_s4 + $0x10] sm:$0xff]  }
 0x31b   : > { %v780_v58 = vpack.c.bf16 %v742_v57, %v740_v55  ;;  %v779_v60 = vpack.c.bf16 %v741_v56, %v739_v54  ;;  %v4902_v54 = vld [vmem:[%s8651_s4 + $0x18] sm:$0xff]   ;;  %v4903_v55 = vld [vmem:[%s8651_s4 + $0x20] sm:$0xff]  }
 0x31c   : > { %v656_v32 = vpop.permute.xlu1 %655  ;;  %v661_v61 = vpop.permute.xlu0 %660 }
 0x31d   : > { %883 = vmatprep.subr.bf16.mxu1 %v780_v58  ;;  %v687_v6 = vmul.f32 %v656_v32, %v5805_v14  ;;  %v688_v7 = vmul.f32 %v656_v32, %v5808_v15  ;;  %v689_v2 = vmul.f32 %v661_v61, %v5773_v0  ;;  %v690_v4 = vmul.f32 %v661_v61, %v5776_v1 }
 0x31e   : > { %884 = vmatpush1.bf16.msra.mxu1 %v779_v60 }
 0x320   : > { %v712_v62 = vpop.permute.xlu1 %711  ;;  %v717_v63 = vpop.permute.xlu0 %716 }
 0x321   : > { %v743_v3 = vadd.f32 %v712_v62, %v687_v6  ;;  %v744_v34 = vadd.f32 %v712_v62, %v688_v7  ;;  %v745_v5 = vadd.f32 %v717_v63, %v689_v2  ;;  %v746_v8 = vadd.f32 %v717_v63, %v690_v4 }
 0x323   : > { %v781_v9 = vpack.c.bf16 %v745_v5, %v743_v3  ;;  %v782_v10 = vpack.c.bf16 %v746_v8, %v744_v34 }
 0x324   : > { %v666_v40 = vpop.permute.xlu1 %665  ;;  %v671_v11 = vpop.permute.xlu0 %670 }
 0x325   : > { %885 = vmatprep.subr.bf16.mxu1 %v782_v10  ;;  %v691_v12 = vmul.f32 %v666_v40, %v5827_v26  ;;  %v692_v13 = vmul.f32 %v666_v40, %v5830_v27  ;;  %v693_v42 = vmul.f32 %v671_v11, %v5821_v24  ;;  %v694_v16 = vmul.f32 %v671_v11, %v5824_v25 }
 0x326   : > { %886 = vmatpush1.bf16.msra.mxu1 %v781_v9 }
 0x328   : > { %v722_v17 = vpop.permute.xlu1 %721  ;;  %v727_v18 = vpop.permute.xlu0 %726 }
 0x329   : > { %v747_v19 = vadd.f32 %v722_v17, %v691_v12  ;;  %v748_v20 = vadd.f32 %v722_v17, %v692_v13  ;;  %v749_v21 = vadd.f32 %v727_v18, %v693_v42  ;;  %v750_v22 = vadd.f32 %v727_v18, %v694_v16 }
 0x32b   : > { %v783_v43 = vpack.c.bf16 %v749_v21, %v747_v19  ;;  %v784_v45 = vpack.c.bf16 %v750_v22, %v748_v20 }
 0x32c   : > { %v676_v23 = vpop.permute.xlu1 %675  ;;  %v681_v28 = vpop.permute.xlu0 %680 }
 0x32d   : > { %887 = vmatprep.subr.bf16.mxu1 %v784_v45  ;;  %v695_v29 = vmul.f32 %v676_v23, %v5851_v38  ;;  %v696_v30 = vmul.f32 %v676_v23, %v5854_v39  ;;  %v697_v31 = vmul.f32 %v681_v28, %v5845_v36  ;;  %v698_v33 = vmul.f32 %v681_v28, %v5848_v37 }
 0x32e   : > { %888 = vmatpush1.bf16.msra.mxu1 %v783_v43 }
 0x330   : > { %v732_v35 = vpop.permute.xlu1 %731  ;;  %v737_v41 = vpop.permute.xlu0 %736 }
 0x331   : > { %v751_v44 = vadd.f32 %v732_v35, %v695_v29  ;;  %v752_v46 = vadd.f32 %v732_v35, %v696_v30  ;;  %v753_v47 = vadd.f32 %v737_v41, %v697_v31  ;;  %v754_v48 = vadd.f32 %v737_v41, %v698_v33 }
 0x333   : > { %v786_v49 = vpack.c.bf16 %v754_v48, %v752_v46  ;;  %v785_v50 = vpack.c.bf16 %v753_v47, %v751_v44 }
 0x335   : > { %889 = vmatprep.subr.bf16.mxu1 %v786_v49 }
 0x336   : > { %890 = vmatpush1.bf16.msra.mxu1 %v785_v50 }
 0x339   : > { %4738 = vmatmul.mubr.msk.bf16.vlgmr.msra.gmra.mrb[0].mxu1 %vm377_vm0, %v4899_v51 }
 0x33a   : > { %925 = vmatprep.mubr.bf16.mxu1 %v8655_v59 }
 0x341   : > { %4739 = vmatmul.mubr.msk.bf16.gmra.mrb[4].mxu1 %vm377_vm0, %v4900_v52 }
 0x342   : > { %935 = vmatprep.mubr.bf16.mxu1 %v8655_v59 }
 0x349   : > { %4740 = vmatmul.mubr.msk.bf16.gmra.mrb[8].mxu1 %vm377_vm0, %v4901_v53 }
 0x34a   : > { %945 = vmatprep.mubr.bf16.mxu1 %v8655_v59 }
 0x351   : > { %4741 = vmatmul.mubr.msk.bf16.gmra.mrb[12].mxu1 %vm377_vm0, %v4902_v54 }
 0x352   : > { %955 = vmatprep.mubr.bf16.mxu1 %v8655_v59 }
 0x359   : > { %4742 = vmatmul.mubr.msk.bf16.gmra.mrb[16].mxu1 %vm377_vm0, %v4903_v55 }
 0x35a   : > { %965 = vmatprep.mubr.bf16.mxu1 %v8655_v59 }
 0x40c   : > { %v917_v56 = vpop.f32.mrb[0].mxu1 }
 0x40d   : > { %v919_v57 = vpop.f32.mrb[1].mxu1 }
 0x40e   : > { %v921_v58 = vpop.f32.mrb[2].mxu1 }
 0x40f   : > { %v1036_v60 = vpack.c.bf16 %v921_v58, %v917_v56  ;;  %v923_v32 = vpop.f32.mrb[3].mxu1 }
 0x410   : > { %v1037_v61 = vpack.c.bf16 %v923_v32, %v919_v57 }
 0x411   : > { %1090 = vxpose.xlu1.c.b16.start.end [1/1] (short) %v1036_v60, 128 }
 0x412   : > { %1106 = vxpose.xlu0.c.b16.start.end [1/1] (short) %v1037_v61, 128 }
 0x414   : > { %v6049_v6 = vpop.f32.mrb[4].mxu1 }
 0x415   : > { %8832 = vst [vmem:[#allocation16_spill] sm:$0xff] %v6049_v6  ;;  %v6051_v7 = vpop.f32.mrb[5].mxu1 }
 0x416   : > { %8833 = vst [vmem:[#allocation17_spill] sm:$0xff] %v6051_v7  ;;  %v6053_v2 = vpop.f32.mrb[6].mxu1 }
 0x417   : > { %8834 = vst [vmem:[#allocation18_spill] sm:$0xff] %v6053_v2  ;;  %v6057_v62 = vpop.f32.mrb[7].mxu1  ;;  %v8856_v2 = vmov 0  }
 0x418   : > { %8835 = vst [vmem:[#allocation19_spill] sm:$0xff] %v6057_v62 }
 0x41c   : > { %v6061_v3 = vpop.f32.mrb[8].mxu1 }
 0x41d   : > { %8836 = vst [vmem:[#allocation20_spill] sm:$0xff] %v6061_v3  ;;  %v6063_v34 = vpop.f32.mrb[9].mxu1 }
 0x41e   : > { %8837 = vst [vmem:[#allocation21_spill] sm:$0xff] %v6063_v34  ;;  %v6065_v5 = vpop.f32.mrb[10].mxu1 }
 0x41f   : > { %8838 = vst [vmem:[#allocation22_spill] sm:$0xff] %v6065_v5  ;;  %v6069_v9 = vpop.f32.mrb[11].mxu1 }
 0x420   : > { %8839 = vst [vmem:[#allocation23_spill] sm:$0xff] %v6069_v9 }
 0x424   : > { %v6073_v40 = vpop.f32.mrb[12].mxu1 }
 0x425   : > { %8840 = vst [vmem:[#allocation24_spill] sm:$0xff] %v6073_v40  ;;  %v6075_v11 = vpop.f32.mrb[13].mxu1 }
 0x426   : > { %8841 = vst [vmem:[#allocation25_spill] sm:$0xff] %v6075_v11  ;;  %v6077_v12 = vpop.f32.mrb[14].mxu1 }
 0x427   : > { %8842 = vst [vmem:[#allocation26_spill] sm:$0xff] %v6077_v12  ;;  %v6081_v42 = vpop.f32.mrb[15].mxu1  ;;  %v4906_v12 = vld [vmem:[%s8651_s4 + $0x38] sm:$0xff]  }
 0x428   : > { %8843 = vst [vmem:[#allocation27_spill] sm:$0xff] %v6081_v42 }
 0x42c   : > { %v957_v17 = vpop.f32.mrb[16].mxu1 }
 0x42d   : > { %v959_v18 = vpop.f32.mrb[17].mxu1 }
 0x42e   : > { %v961_v19 = vpop.f32.mrb[18].mxu1 }
 0x42f   : > { %v1044_v20 = vpack.c.bf16 %v961_v19, %v957_v17  ;;  %v963_v21 = vpop.f32.mrb[19].mxu1 }
 0x430   : > { %v1045_v22 = vpack.c.bf16 %v963_v21, %v959_v18 }
 0x432   : > { %1171 = vmatprep.subr.bf16.mxu0 %v1045_v22 }
 0x433   : > { %1172 = vmatpush1.bf16.msra.mxu0 %v1044_v20 }
 0x477   : > { %v1098_v43 = vpop.trf.xlu1 }
 0x478   : > { %4750 = vmatmul.mubr.msk.bf16.vlgmr.msra.gmra.mrb[8].mxu0 %vm1122_vm2, %v1098_v43  ;;  %v1114_v35 = vpop.trf.xlu0 }
 0x479   : > { %1213 = vmatprep.mubr.bf16.mxu0 %v8655_v59 }
 0x47b   : > { %v1099_v45 = vpop.trf.xlu1 }
 0x47c   : > { %v1115_v41 = vpop.trf.xlu0 }
 0x47f   : > { %v1100_v23 = vpop.trf.xlu1 }
 0x480   : > { %4751 = vmatmul.mubr.msk.bf16.gmra.mrb[12].mxu0 %vm1122_vm2, %v1099_v45  ;;  %v1116_v44 = vpop.trf.xlu0 }
 0x481   : > { %1223 = vmatprep.mubr.bf16.mxu0 %v8655_v59 }
 0x483   : > { %v1101_v28 = vpop.trf.xlu1 }
 0x484   : > { %v1117_v46 = vpop.trf.xlu0 }
 0x487   : > { %v1102_v29 = vpop.trf.xlu1 }
 0x488   : > { %4752 = vmatmul.mubr.msk.bf16.gmra.mrb[16].mxu0 %vm1122_vm2, %v1100_v23  ;;  %v1118_v47 = vpop.trf.xlu0 }
 0x489   : > { %1233 = vmatprep.mubr.bf16.mxu0 %v8655_v59 }
 0x48b   : > { %v1103_v30 = vpop.trf.xlu1 }
 0x48c   : > { %v1119_v48 = vpop.trf.xlu0 }
 0x48f   : > { %v1104_v31 = vpop.trf.xlu1 }
 0x490   : > { %4753 = vmatmul.mubr.msk.bf16.gmra.mrb[20].mxu0 %vm1122_vm2, %v1101_v28  ;;  %v1120_v49 = vpop.trf.xlu0 }
 0x491   : > { %1243 = vmatprep.mubr.bf16.mxu0 %v8655_v59 }
 0x493   : > { %v1105_v33 = vpop.trf.xlu1 }
 0x494   : > { %v1121_v50 = vpop.trf.xlu0 }
 0x498   : > { %4754 = vmatmul.mubr.msk.bf16.gmra.mrb[24].mxu0 %vm1122_vm2, %v1102_v29 }
 0x499   : > { %1253 = vmatprep.mubr.bf16.mxu0 %v8655_v59 }
 0x4a0   : > { %4755 = vmatmul.mubr.msk.bf16.gmra.mrb[28].mxu0 %vm1122_vm2, %v1103_v30 }
 0x4a1   : > { %1263 = vmatprep.mubr.bf16.mxu0 %v8655_v59 }
 0x4a8   : > { %4756 = vmatmul.mubr.msk.bf16.gmra.mrb[32].mxu0 %vm1122_vm2, %v1104_v31 }
 0x4a9   : > { %1273 = vmatprep.mubr.bf16.mxu0 %v8655_v59 }
 0x4b0   : > { %4757 = vmatmul.mubr.msk.bf16.gmra.mrb[36].mxu0 %vm1122_vm2, %v1105_v33 }
 0x4b1   : > { %1283 = vmatprep.mubr.bf16.mxu0 %v8655_v59 }
 0x4b8   : > { %4758 = vmatmul.mubr.msk.bf16.gmra.mrb[40].mxu0 %vm1122_vm2, %v1114_v35 }
 0x4b9   : > { %1293 = vmatprep.mubr.bf16.mxu0 %v8655_v59 }
 0x4c0   : > { %4759 = vmatmul.mubr.msk.bf16.gmra.mrb[44].mxu0 %vm1122_vm2, %v1115_v41 }
 0x4c1   : > { %1303 = vmatprep.mubr.bf16.mxu0 %v8655_v59 }
 0x4c8   : > { %4760 = vmatmul.mubr.msk.bf16.gmra.mrb[48].mxu0 %vm1122_vm2, %v1116_v44 }
 0x4c9   : > { %1313 = vmatprep.mubr.bf16.mxu0 %v8655_v59 }
 0x4d0   : > { %4761 = vmatmul.mubr.msk.bf16.gmra.mrb[52].mxu0 %vm1122_vm2, %v1117_v46 }
 0x4d1   : > { %1323 = vmatprep.mubr.bf16.mxu0 %v8655_v59 }
 0x4d8   : > { %4762 = vmatmul.mubr.msk.bf16.gmra.mrb[56].mxu0 %vm1122_vm2, %v1118_v47 }
 0x4d9   : > { %1333 = vmatprep.mubr.bf16.mxu0 %v8655_v59 }
 0x4e0   : > { %4763 = vmatmul.mubr.msk.bf16.gmra.mrb[60].mxu0 %vm1122_vm2, %v1119_v48 }
 0x4e1   : > { %1343 = vmatprep.mubr.bf16.mxu0 %v8655_v59 }
 0x4e8   : > { %4764 = vmatmul.mubr.msk.bf16.gmra.mrb[64].mxu0 %vm1122_vm2, %v1120_v49 }
 0x4e9   : > { %1353 = vmatprep.mubr.bf16.mxu0 %v8655_v59 }
 0x4f0   : > { %4765 = vmatmul.mubr.msk.bf16.gmra.mrb[68].mxu0 %vm1122_vm2, %v1121_v50 }
 0x54b   : > { %v6116_v51 = vpop.f32.mrb[8].mxu0 }
 0x54c   : > { %v6118_v52 = vpop.f32.mrb[9].mxu0 }
 0x54d   : > { %v6120_v53 = vpop.f32.mrb[10].mxu0  ;;  %v1364_v54 = vmax.f32 %v6116_v51, %v6118_v52 }
 0x54e   : > { %v6124_v55 = vpop.f32.mrb[11].mxu0 }
 0x54f   : > { %1365 = vmax.xlane.f32.xlu0 %v1364_v54  ;;  %v1367_v56 = vmax.f32 %v6120_v53, %v6124_v55 }
 0x551   : > { %1368 = vmax.xlane.f32.xlu1 %v1367_v56 }
 0x553   : > { %v6128_v57 = vpop.f32.mrb[12].mxu0 }
 0x554   : > { %v6130_v58 = vpop.f32.mrb[13].mxu0 }
 0x555   : > { %v6132_v60 = vpop.f32.mrb[14].mxu0  ;;  %v1370_v32 = vmax.f32 %v6128_v57, %v6130_v58 }
 0x556   : > { %v6136_v61 = vpop.f32.mrb[15].mxu0 }
 0x557   : > { %1371 = vmax.xlane.f32.xlu0 %v1370_v32  ;;  %v1373_v17 = vmax.f32 %v6132_v60, %v6136_v61 }
 0x55b   : > { %1374 = vmax.xlane.f32.xlu0 %v1373_v17  ;;  %v6140_v18 = vpop.f32.mrb[16].mxu0 }
 0x55c   : > { %v6142_v19 = vpop.f32.mrb[17].mxu0 }
 0x55d   : > { %v6144_v20 = vpop.f32.mrb[18].mxu0  ;;  %v1376_v21 = vmax.f32 %v6140_v18, %v6142_v19 }
 0x55e   : > { %v6148_v22 = vpop.f32.mrb[19].mxu0 }
 0x55f   : > { %1377 = vmax.xlane.f32.xlu1 %v1376_v21  ;;  %v1379_v43 = vmax.f32 %v6144_v20, %v6148_v22 }
 0x561   : > { %1380 = vmax.xlane.f32.xlu0 %v1379_v43 }
 0x563   : > { %v6152_v45 = vpop.f32.mrb[20].mxu0 }
 0x564   : > { %v6154_v23 = vpop.f32.mrb[21].mxu0 }
 0x565   : > { %v6156_v28 = vpop.f32.mrb[22].mxu0  ;;  %v1382_v29 = vmax.f32 %v6152_v45, %v6154_v23 }
 0x566   : > { %v6160_v30 = vpop.f32.mrb[23].mxu0 }
 0x567   : > { %1383 = vmax.xlane.f32.xlu1 %v1382_v29  ;;  %v1385_v31 = vmax.f32 %v6156_v28, %v6160_v30 }
 0x569   : > { %1386 = vmax.xlane.f32.xlu0 %v1385_v31 }
 0x56b   : > { %v6164_v33 = vpop.f32.mrb[24].mxu0 }
 0x56c   : > { %v6166_v35 = vpop.f32.mrb[25].mxu0 }
 0x56d   : > { %v6168_v41 = vpop.f32.mrb[26].mxu0  ;;  %v1388_v44 = vmax.f32 %v6164_v33, %v6166_v35 }
 0x56e   : > { %v6172_v46 = vpop.f32.mrb[27].mxu0 }
 0x56f   : > { %1389 = vmax.xlane.f32.xlu1 %v1388_v44  ;;  %v1391_v47 = vmax.f32 %v6168_v41, %v6172_v46 }
 0x571   : > { %1392 = vmax.xlane.f32.xlu0 %v1391_v47 }
 0x573   : > { %v6176_v48 = vpop.f32.mrb[28].mxu0 }
 0x574   : > { %v6178_v49 = vpop.f32.mrb[29].mxu0 }
 0x575   : > { %v6180_v50 = vpop.f32.mrb[30].mxu0  ;;  %v1394_v54 = vmax.f32 %v6176_v48, %v6178_v49 }
 0x576   : > { %v6184_v56 = vpop.f32.mrb[31].mxu0 }
 0x577   : > { %1395 = vmax.xlane.f32.xlu1 %v1394_v54  ;;  %v1397_v32 = vmax.f32 %v6180_v50, %v6184_v56 }
 0x579   : > { %1398 = vmax.xlane.f32.xlu0 %v1397_v32 }
 0x57b   : > { %v6188_v17 = vpop.f32.mrb[32].mxu0 }
 0x57c   : > { %v6190_v21 = vpop.f32.mrb[33].mxu0 }
 0x57d   : > { %v6192_v43 = vpop.f32.mrb[34].mxu0  ;;  %v1400_v29 = vmax.f32 %v6188_v17, %v6190_v21 }
 0x57e   : > { %v6196_v31 = vpop.f32.mrb[35].mxu0 }
 0x57f   : > { %1401 = vmax.xlane.f32.xlu1 %v1400_v29  ;;  %v1403_v44 = vmax.f32 %v6192_v43, %v6196_v31 }
 0x581   : > { %1404 = vmax.xlane.f32.xlu0 %v1403_v44 }
 0x583   : > { %v6200_v47 = vpop.f32.mrb[36].mxu0 }
 0x584   : > { %v6202_v54 = vpop.f32.mrb[37].mxu0 }
 0x585   : > { %v6204_v32 = vpop.f32.mrb[38].mxu0  ;;  %v1406_v16 = vmax.f32 %v6200_v47, %v6202_v54 }
 0x586   : > { %v6208_v13 = vpop.f32.mrb[39].mxu0 }
 0x587   : > { %1407 = vmax.xlane.f32.xlu1 %v1406_v16  ;;  %v1409_v10 = vmax.f32 %v6204_v32, %v6208_v13 }
 0x589   : > { %1410 = vmax.xlane.f32.xlu0 %v1409_v10 }
 0x58b   : > { %v6212_v29 = vpop.f32.mrb[40].mxu0 }
 0x58c   : > { %v6214_v8 = vpop.f32.mrb[41].mxu0 }
 0x58d   : > { %v6216_v44 = vpop.f32.mrb[42].mxu0  ;;  %v1412_v63 = vmax.f32 %v6212_v29, %v6214_v8 }
 0x58e   : > { %v6220_v4 = vpop.f32.mrb[43].mxu0 }
 0x58f   : > { %1413 = vmax.xlane.f32.xlu1 %v1412_v63  ;;  %v1415_v59 = vmax.f32 %v6216_v44, %v6220_v4 }
 0x591   : > { %1416 = vmax.xlane.f32.xlu0 %v1415_v59 }
 0x593   : > { %v6224_v16 = vpop.f32.mrb[44].mxu0 }
 0x594   : > { %8844 = vst [vmem:[#allocation28_spill] sm:$0xff] %v6224_v16  ;;  %v6226_v37 = vpop.f32.mrb[45].mxu0 }
 0x595   : > { %8845 = vst [vmem:[#allocation29_spill] sm:$0xff] %v6226_v37  ;;  %v6228_v10 = vpop.f32.mrb[46].mxu0  ;;  %v1418_v36 = vmax.f32 %v6224_v16, %v6226_v37  ;;  %v4907_v37 = vld [vmem:[%s8651_s4 + $0x40] sm:$0xff]  }
 0x596   : > { %8846 = vst [vmem:[#allocation30_spill] sm:$0xff] %v6228_v10  ;;  %v6232_v39 = vpop.f32.mrb[47].mxu0 }
 0x597   : > { %8847 = vst [vmem:[#allocation31_spill] sm:$0xff] %v6232_v39  ;;  %1419 = vmax.xlane.f32.xlu1 %v1418_v36  ;;  %v1421_v38 = vmax.f32 %v6228_v10, %v6232_v39 }
 0x599   : > { %1422 = vmax.xlane.f32.xlu0 %v1421_v38 }
 0x59b   : > { %v6236_v63 = vpop.f32.mrb[48].mxu0 }
 0x59c   : > { %8848 = vst [vmem:[#allocation32_spill] sm:$0xff] %v6236_v63  ;;  %v6238_v25 = vpop.f32.mrb[49].mxu0 }
 0x59d   : > { %8849 = vst [vmem:[#allocation33_spill] sm:$0xff] %v6238_v25  ;;  %v6240_v59 = vpop.f32.mrb[50].mxu0  ;;  %v1424_v24 = vmax.f32 %v6236_v63, %v6238_v25 }
 0x59e   : > { %8850 = vst [vmem:[#allocation34_spill] sm:$0xff] %v6240_v59  ;;  %v6244_v27 = vpop.f32.mrb[51].mxu0 }
 0x59f   : > { %8851 = vst [vmem:[#allocation35_spill] sm:$0xff] %v6244_v27  ;;  %1425 = vmax.xlane.f32.xlu1 %v1424_v24  ;;  %v1427_v26 = vmax.f32 %v6240_v59, %v6244_v27  ;;  %v4905_v27 = vld [vmem:[%s8651_s4 + $0x30] sm:$0xff]  }
 0x5a1   : > { %1428 = vmax.xlane.f32.xlu0 %v1427_v26 }
 0x5a3   : > { %v6248_v36 = vpop.f32.mrb[52].mxu0 }
 0x5a4   : > { %8852 = vst [vmem:[#allocation36_spill] sm:$0xff] %v6248_v36  ;;  %v6250_v1 = vpop.f32.mrb[53].mxu0 }
 0x5a5   : > { %8853 = vst [vmem:[#allocation37_spill] sm:$0xff] %v6250_v1  ;;  %v6252_v38 = vpop.f32.mrb[54].mxu0  ;;  %v1430_v0 = vmax.f32 %v6248_v36, %v6250_v1  ;;  %v4904_v36 = vld [vmem:[%s8651_s4 + $0x28] sm:$0xff]  }
 0x5a6   : > { %8854 = vst [vmem:[#allocation38_spill] sm:$0xff] %v6252_v38  ;;  %v6256_v15 = vpop.f32.mrb[55].mxu0  ;;  %4743 = vmatmul.mubr.msk.bf16.gmra.mrb[20].mxu1 %vm377_vm0, %v4904_v36 }
 0x5a7   : > { %8855 = vst [vmem:[#allocation39_spill] sm:$0xff] %v6256_v15  ;;  %1431 = vmax.xlane.f32.xlu1 %v1430_v0  ;;  %v1433_v14 = vmax.f32 %v6252_v38, %v6256_v15  ;;  %975 = vmatprep.mubr.bf16.mxu1 %v8856_v2 }
 0x5a9   : > { %1434 = vmax.xlane.f32.xlu0 %v1433_v14 }
 0x5ab   : > { %v6260_v24 = vpop.f32.mrb[56].mxu0 }
 0x5ac   : > { %v6262_v11 = vpop.f32.mrb[57].mxu0 }
 0x5ad   : > { %v6264_v26 = vpop.f32.mrb[58].mxu0 }
 0x5ae   : > { %v6268_v40 = vpop.f32.mrb[59].mxu0  ;;  %4744 = vmatmul.mubr.msk.bf16.gmra.mrb[24].mxu1 %vm377_vm0, %v4905_v27 }
 0x5af   : > { %985 = vmatprep.mubr.bf16.mxu1 %v8856_v2 }
 0x5b3   : > { %v6272_v34 = vpop.f32.mrb[60].mxu0 }
 0x5b4   : > { %v6274_v0 = vpop.f32.mrb[61].mxu0 }
 0x5b5   : > { %v6276_v9 = vpop.f32.mrb[62].mxu0 }
 0x5b6   : > { %v6280_v3 = vpop.f32.mrb[63].mxu0  ;;  %4745 = vmatmul.mubr.msk.bf16.gmra.mrb[28].mxu1 %vm377_vm0, %v4906_v12 }
 0x5b7   : > { %995 = vmatprep.mubr.bf16.mxu1 %v8856_v2 }
 0x5bb   : > { %v6284_v42 = vpop.f32.mrb[64].mxu0 }
 0x5bc   : > { %v6286_v7 = vpop.f32.mrb[65].mxu0 }
 0x5bd   : > { %v6290_v62 = vpop.f32.mrb[66].mxu0 }
 0x5be   : > { %v6292_v6 = vpop.f32.mrb[67].mxu0  ;;  %4746 = vmatmul.mubr.msk.bf16.gmra.mrb[32].mxu1 %vm377_vm0, %v4907_v37 }
 0x5bf   : > { %1005 = vmatprep.mubr.bf16.mxu1 %v8856_v2 }
 0x5c3   : > { %v6296_v14 = vpop.f32.mrb[68].mxu0 }
 0x5c4   : > { %v6298_v15 = vpop.f32.mrb[69].mxu0 }
 0x5c5   : > { %v6302_v38 = vpop.f32.mrb[70].mxu0 }
 0x5c6   : > { %v6304_v1 = vpop.f32.mrb[71].mxu0 }
 0x5dc   : > { %v1366_v5 = vpop.xlane.xlu0 %1365 }
 0x5dd   : > { %v1460_v36 = vsub.f32 %v6116_v51, %v1366_v5  ;;  %v1461_v59 = vsub.f32 %v6118_v52, %v1366_v5 }
 0x5de   : > { %v1369_v25 = vpop.xlane.xlu1 %1368 }
 0x5df   : > { %v1524_v63 = vmul.f32 1.442695, %v1460_v36  ;;  %v1526_v39 = vmul.f32 1.442695, %v1461_v59  ;;  %v1462_v27 = vsub.f32 %v6120_v53, %v1369_v25  ;;  %v1463_v10 = vsub.f32 %v6124_v55, %v1369_v25 }
 0x5e1   : > { %4931 = vpow2.f32 %v1524_v63  ;;  %v1528_v12 = vmul.f32 1.442695, %v1462_v27  ;;  %v1530_v16 = vmul.f32 1.442695, %v1463_v10 }
 0x5e2   : > { %4933 = vpow2.f32 %v1526_v39 }
 0x5e3   : > { %4935 = vpow2.f32 %v1528_v12 }
 0x5e4   : > { %4937 = vpow2.f32 %v1530_v16  ;;  %v1372_v5 = vpop.xlane.xlu0 %1371 }
 0x5e5   : > { %v1464_v51 = vsub.f32 %v6128_v57, %v1372_v5  ;;  %v1465_v52 = vsub.f32 %v6130_v58, %v1372_v5 }
 0x5e7   : > { %v1532_v25 = vmul.f32 1.442695, %v1464_v51  ;;  %v1534_v53 = vmul.f32 1.442695, %v1465_v52 }
 0x5e8   : > { %v1375_v55 = vpop.xlane.xlu0 %1374 }
 0x5e9   : > { %4939 = vpow2.f32 %v1532_v25  ;;  %v1466_v63 = vsub.f32 %v6132_v60, %v1375_v55  ;;  %v1467_v10 = vsub.f32 %v6136_v61, %v1375_v55 }
 0x5ea   : > { %4941 = vpow2.f32 %v1534_v53 }
 0x5eb   : > { %v6336_v39 = vpop.eup %4931  ;;  %v1536_v37 = vmul.f32 1.442695, %v1466_v63  ;;  %v1538_v16 = vmul.f32 1.442695, %v1467_v10  ;;  %v8857_v63 = vmax.f32 %v6260_v24, %v6262_v11 }
 0x5ec   : > { %v6338_v59 = vpop.eup %4933  ;;  %v1378_v36 = vpop.xlane.xlu1 %1377 }
 0x5ed   : > { %v6340_v27 = vpop.eup %4935  ;;  %4943 = vpow2.f32 %v1536_v37  ;;  %v1468_v57 = vsub.f32 %v6140_v18, %v1378_v36  ;;  %v1469_v58 = vsub.f32 %v6142_v19, %v1378_v36  ;;  %v1652_v60 = vadd.f32 %v6338_v59, %v6336_v39 }
 0x5ee   : > { %v6346_v12 = vpop.eup %4937  ;;  %4945 = vpow2.f32 %v1538_v16  ;;  %v1381_v61 = vpop.xlane.xlu0 %1380  ;;  %v8858_v36 = vmax.f32 %v6264_v26, %v6268_v40 }
 0x5ef   : > { %v1540_v5 = vmul.f32 1.442695, %v1468_v57  ;;  %v1542_v51 = vmul.f32 1.442695, %v1469_v58  ;;  %v1470_v52 = vsub.f32 %v6144_v20, %v1381_v61  ;;  %v1471_v25 = vsub.f32 %v6148_v22, %v1381_v61  ;;  %1653 = vadd.xlane.f32.xlu1 %v1652_v60 }
 0x5f0   : > { %v1655_v53 = vadd.f32 %v6346_v12, %v6340_v27 }
 0x5f1   : > { %4947 = vpow2.f32 %v1540_v5  ;;  %v1544_v18 = vmul.f32 1.442695, %v1470_v52  ;;  %v1546_v19 = vmul.f32 1.442695, %v1471_v25 }
 0x5f2   : > { %4949 = vpow2.f32 %v1542_v51  ;;  %1656 = vadd.xlane.f32.xlu0 %v1655_v53 }
 0x5f3   : > { %v6352_v55 = vpop.eup %4939  ;;  %4951 = vpow2.f32 %v1544_v18  ;;  %1437 = vmax.xlane.f32.xlu1 %v8857_v63  ;;  %v8859_v18 = vmax.f32 %v6272_v34, %v6274_v0 }
 0x5f4   : > { %v6357_v10 = vpop.eup %4941  ;;  %4953 = vpow2.f32 %v1546_v19  ;;  %v1384_v20 = vpop.xlane.xlu1 %1383 }
 0x5f5   : > { %v1472_v22 = vsub.f32 %v6152_v45, %v1384_v20  ;;  %v1473_v37 = vsub.f32 %v6154_v23, %v1384_v20  ;;  %v1658_v16 = vadd.f32 %v6357_v10, %v6352_v55 }
 0x5f6   : > { %1440 = vmax.xlane.f32.xlu0 %v8858_v36  ;;  %v1387_v57 = vpop.xlane.xlu0 %1386 }
 0x5f7   : > { %v6366_v58 = vpop.eup %4943  ;;  %v1548_v60 = vmul.f32 1.442695, %v1472_v22  ;;  %v1550_v61 = vmul.f32 1.442695, %v1473_v37  ;;  %v1474_v5 = vsub.f32 %v6156_v28, %v1387_v57  ;;  %v1475_v51 = vsub.f32 %v6160_v30, %v1387_v57  ;;  %1659 = vadd.xlane.f32.xlu1 %v1658_v16 }
 0x5f8   : > { %v6370_v45 = vpop.eup %4945 }
 0x5f9   : > { %4955 = vpow2.f32 %v1548_v60  ;;  %v1552_v23 = vmul.f32 1.442695, %v1474_v5  ;;  %v1554_v52 = vmul.f32 1.442695, %v1475_v51  ;;  %v1661_v25 = vadd.f32 %v6370_v45, %v6366_v58 }
 0x5fa   : > { %4957 = vpow2.f32 %v1550_v61  ;;  %v8860_v5 = vmax.f32 %v6276_v9, %v6280_v3 }
 0x5fb   : > { %v6374_v53 = vpop.eup %4947  ;;  %4959 = vpow2.f32 %v1552_v23  ;;  %1662 = vadd.xlane.f32.xlu0 %v1661_v25  ;;  %1443 = vmax.xlane.f32.xlu1 %v8859_v18 }
 0x5fc   : > { %v6379_v28 = vpop.eup %4949  ;;  %4961 = vpow2.f32 %v1554_v52  ;;  %v1390_v30 = vpop.xlane.xlu1 %1389 }
 0x5fd   : > { %v6381_v19 = vpop.eup %4951  ;;  %v1476_v63 = vsub.f32 %v6164_v33, %v1390_v30  ;;  %v1477_v20 = vsub.f32 %v6166_v35, %v1390_v30  ;;  %v1664_v22 = vadd.f32 %v6379_v28, %v6374_v53 }
 0x5fe   : > { %v6387_v37 = vpop.eup %4953  ;;  %v1393_v16 = vpop.xlane.xlu0 %1392 }
 0x5ff   : > { %v1556_v36 = vmul.f32 1.442695, %v1476_v63  ;;  %v1558_v57 = vmul.f32 1.442695, %v1477_v20  ;;  %v1478_v60 = vsub.f32 %v6168_v41, %v1393_v16  ;;  %v1479_v61 = vsub.f32 %v6172_v46, %v1393_v16  ;;  %1665 = vadd.xlane.f32.xlu1 %v1664_v22  ;;  %1446 = vmax.xlane.f32.xlu0 %v8860_v5 }
 0x600   : > { %v1667_v51 = vadd.f32 %v6387_v37, %v6381_v19  ;;  %v8861_v41 = vmax.f32 %v6284_v42, %v6286_v7 }
 0x601   : > { %4963 = vpow2.f32 %v1556_v36  ;;  %v1560_v33 = vmul.f32 1.442695, %v1478_v60  ;;  %v1562_v35 = vmul.f32 1.442695, %v1479_v61  ;;  %v8862_v61 = vmax.f32 %v6290_v62, %v6292_v6 }
 0x602   : > { %4965 = vpow2.f32 %v1558_v57 }
 0x603   : > { %v6396_v23 = vpop.eup %4955  ;;  %4967 = vpow2.f32 %v1560_v33  ;;  %1668 = vadd.xlane.f32.xlu0 %v1667_v51  ;;  %1449 = vmax.xlane.f32.xlu1 %v8861_v41 }
 0x604   : > { %v6401_v46 = vpop.eup %4957  ;;  %4969 = vpow2.f32 %v1562_v35  ;;  %v1396_v52 = vpop.xlane.xlu1 %1395 }
 0x605   : > { %v6403_v25 = vpop.eup %4959  ;;  %v1480_v18 = vsub.f32 %v6176_v48, %v1396_v52  ;;  %v1481_v30 = vsub.f32 %v6178_v49, %v1396_v52  ;;  %v1670_v63 = vadd.f32 %v6401_v46, %v6396_v23 }
 0x606   : > { %v6409_v20 = vpop.eup %4961  ;;  %v1399_v22 = vpop.xlane.xlu0 %1398 }
 0x607   : > { %v1564_v16 = vmul.f32 1.442695, %v1480_v18  ;;  %v1566_v36 = vmul.f32 1.442695, %v1481_v30  ;;  %v1482_v57 = vsub.f32 %v6180_v50, %v1399_v22  ;;  %v1483_v60 = vsub.f32 %v6184_v56, %v1399_v22  ;;  %1671 = vadd.xlane.f32.xlu1 %v1670_v63  ;;  %1452 = vmax.xlane.f32.xlu0 %v8862_v61 }
 0x608   : > { %v1673_v5 = vadd.f32 %v6409_v20, %v6403_v25  ;;  %v8863_v50 = vmax.f32 %v6296_v14, %v6298_v15 }
 0x609   : > { %4971 = vpow2.f32 %v1564_v16  ;;  %v1568_v48 = vmul.f32 1.442695, %v1482_v57  ;;  %v1570_v49 = vmul.f32 1.442695, %v1483_v60  ;;  %v8864_v60 = vmax.f32 %v6302_v38, %v6304_v1 }
 0x60a   : > { %4973 = vpow2.f32 %v1566_v36 }
 0x60b   : > { %v6418_v33 = vpop.eup %4963  ;;  %4975 = vpow2.f32 %v1568_v48  ;;  %1674 = vadd.xlane.f32.xlu0 %v1673_v5  ;;  %1455 = vmax.xlane.f32.xlu1 %v8863_v50 }
 0x60c   : > { %v6423_v56 = vpop.eup %4965  ;;  %4977 = vpow2.f32 %v1570_v49  ;;  %v1402_v35 = vpop.xlane.xlu1 %1401 }
 0x60d   : > { %v6425_v51 = vpop.eup %4967  ;;  %v1484_v41 = vsub.f32 %v6188_v17, %v1402_v35  ;;  %v1485_v52 = vsub.f32 %v6190_v21, %v1402_v35  ;;  %v1676_v18 = vadd.f32 %v6423_v56, %v6418_v33 }
 0x60e   : > { %v6431_v30 = vpop.eup %4969  ;;  %v1405_v63 = vpop.xlane.xlu0 %1404 }
 0x60f   : > { %v1572_v22 = vmul.f32 1.442695, %v1484_v41  ;;  %v1574_v16 = vmul.f32 1.442695, %v1485_v52  ;;  %v1486_v36 = vsub.f32 %v6192_v43, %v1405_v63  ;;  %v1487_v57 = vsub.f32 %v6196_v31, %v1405_v63  ;;  %1677 = vadd.xlane.f32.xlu1 %v1676_v18  ;;  %1458 = vmax.xlane.f32.xlu0 %v8864_v60 }
 0x610   : > { %v1679_v61 = vadd.f32 %v6431_v30, %v6425_v51 }
 0x611   : > { %4979 = vpow2.f32 %v1572_v22  ;;  %v1576_v17 = vmul.f32 1.442695, %v1486_v36  ;;  %v1578_v21 = vmul.f32 1.442695, %v1487_v57 }
 0x612   : > { %4981 = vpow2.f32 %v1574_v16 }
 0x613   : > { %v6440_v48 = vpop.eup %4971  ;;  %4983 = vpow2.f32 %v1576_v17  ;;  %1680 = vadd.xlane.f32.xlu0 %v1679_v61 }
 0x614   : > { %v6442_v49 = vpop.eup %4973  ;;  %4985 = vpow2.f32 %v1578_v21  ;;  %v1408_v43 = vpop.xlane.xlu1 %1407 }
 0x615   : > { %v6444_v31 = vpop.eup %4975  ;;  %v1488_v5 = vsub.f32 %v6200_v47, %v1408_v43  ;;  %v1489_v50 = vsub.f32 %v6202_v54, %v1408_v43  ;;  %v1682_v35 = vadd.f32 %v6442_v49, %v6440_v48 }
 0x616   : > { %v6450_v41 = vpop.eup %4977  ;;  %v1411_v52 = vpop.xlane.xlu0 %1410 }
 0x617   : > { %v1580_v18 = vmul.f32 1.442695, %v1488_v5  ;;  %v1582_v63 = vmul.f32 1.442695, %v1489_v50  ;;  %v1490_v22 = vsub.f32 %v6204_v32, %v1411_v52  ;;  %v1491_v16 = vsub.f32 %v6208_v13, %v1411_v52  ;;  %1683 = vadd.xlane.f32.xlu1 %v1682_v35 }
 0x618   : > { %v1685_v36 = vadd.f32 %v6450_v41, %v6444_v31 }
 0x619   : > { %4987 = vpow2.f32 %v1580_v18  ;;  %v1584_v47 = vmul.f32 1.442695, %v1490_v22  ;;  %v1586_v57 = vmul.f32 1.442695, %v1491_v16 }
 0x61a   : > { %4989 = vpow2.f32 %v1582_v63  ;;  %1686 = vadd.xlane.f32.xlu0 %v1685_v36 }
 0x61b   : > { %v6456_v54 = vpop.eup %4979  ;;  %4991 = vpow2.f32 %v1584_v47 }
 0x61c   : > { %v6458_v60 = vpop.eup %4981  ;;  %4993 = vpow2.f32 %v1586_v57  ;;  %v1414_v17 = vpop.xlane.xlu1 %1413  ;;  %v8869_v57 = vld [vmem:[#allocation29_spill] sm:$0xff] }
 0x61d   : > { %v6460_v21 = vpop.eup %4983  ;;  %v1492_v13 = vsub.f32 %v6212_v29, %v1414_v17  ;;  %v1493_v32 = vsub.f32 %v6214_v8, %v1414_v17  ;;  %v1688_v61 = vadd.f32 %v6458_v60, %v6456_v54 }
 0x61e   : > { %v6466_v43 = vpop.eup %4985  ;;  %v1417_v5 = vpop.xlane.xlu0 %1416 }
 0x61f   : > { %v1588_v50 = vmul.f32 1.442695, %v1492_v13  ;;  %v1590_v35 = vmul.f32 1.442695, %v1493_v32  ;;  %v1494_v52 = vsub.f32 %v6216_v44, %v1417_v5  ;;  %v1495_v18 = vsub.f32 %v6220_v4, %v1417_v5  ;;  %1689 = vadd.xlane.f32.xlu1 %v1688_v61  ;;  %v8868_v44 = vld [vmem:[#allocation28_spill] sm:$0xff] }
 0x620   : > { %v1691_v63 = vadd.f32 %v6466_v43, %v6460_v21 }
 0x621   : > { %4995 = vpow2.f32 %v1588_v50  ;;  %v1592_v29 = vmul.f32 1.442695, %v1494_v52  ;;  %v1594_v22 = vmul.f32 1.442695, %v1495_v18  ;;  %v8872_v18 = vld [vmem:[#allocation31_spill] sm:$0xff] }
 0x622   : > { %4997 = vpow2.f32 %v1590_v35  ;;  %1692 = vadd.xlane.f32.xlu0 %v1691_v63  ;;  %v8871_v35 = vld [vmem:[#allocation30_spill] sm:$0xff] }
 0x623   : > { %v6472_v8 = vpop.eup %4987  ;;  %4999 = vpow2.f32 %v1592_v29 }
 0x624   : > { %8865 = vst [vmem:[#allocation40_spill] sm:$0xff] %v6472_v8  ;;  %v6474_v16 = vpop.eup %4989  ;;  %5001 = vpow2.f32 %v1594_v22  ;;  %v1420_v36 = vpop.xlane.xlu1 %1419 }
 0x625   : > { %8866 = vst [vmem:[#allocation41_spill] sm:$0xff] %v6474_v16  ;;  %v6476_v47 = vpop.eup %4991  ;;  %v1496_v4 = vsub.f32 %v8868_v44, %v1420_v36  ;;  %v1497_v17 = vsub.f32 %v8869_v57, %v1420_v36  ;;  %v1694_v13 = vadd.f32 %v6474_v16, %v6472_v8  ;;  %v8879_v8 = vld [vmem:[#allocation34_spill] sm:$0xff] }
 0x626   : > { %8867 = vst [vmem:[#allocation42_spill] sm:$0xff] %v6476_v47  ;;  %v6482_v32 = vpop.eup %4993  ;;  %v1423_v61 = vpop.xlane.xlu0 %1422 }
 0x627   : > { %8870 = vst [vmem:[#allocation28_spill] sm:$0xff] %v6482_v32  ;;  %v1596_v5 = vmul.f32 1.442695, %v1496_v4  ;;  %v1598_v50 = vmul.f32 1.442695, %v1497_v17  ;;  %v1498_v52 = vsub.f32 %v8871_v35, %v1423_v61  ;;  %v1499_v63 = vsub.f32 %v8872_v18, %v1423_v61  ;;  %1695 = vadd.xlane.f32.xlu1 %v1694_v13  ;;  %v8876_v35 = vld [vmem:[#allocation32_spill] sm:$0xff] }
 0x628   : > { %v1697_v29 = vadd.f32 %v6482_v32, %v6476_v47  ;;  %v8877_v13 = vld [vmem:[#allocation33_spill] sm:$0xff]  ;;  %v8880_v47 = vld [vmem:[#allocation35_spill] sm:$0xff] }
 0x629   : > { %5003 = vpow2.f32 %v1596_v5  ;;  %v1600_v22 = vmul.f32 1.442695, %v1498_v52  ;;  %v1602_v44 = vmul.f32 1.442695, %v1499_v63 }
 0x62a   : > { %5005 = vpow2.f32 %v1598_v50  ;;  %1698 = vadd.xlane.f32.xlu0 %v1697_v29 }
 0x62b   : > { %v6488_v36 = vpop.eup %4995  ;;  %5007 = vpow2.f32 %v1600_v22 }
 0x62c   : > { %8873 = vst [vmem:[#allocation29_spill] sm:$0xff] %v6488_v36  ;;  %v6490_v57 = vpop.eup %4997  ;;  %5009 = vpow2.f32 %v1602_v44  ;;  %v1426_v4 = vpop.xlane.xlu1 %1425 }
 0x62d   : > { %8874 = vst [vmem:[#allocation30_spill] sm:$0xff] %v6490_v57  ;;  %v6492_v17 = vpop.eup %4999  ;;  %v1500_v61 = vsub.f32 %v8876_v35, %v1426_v4  ;;  %v1501_v18 = vsub.f32 %v8877_v13, %v1426_v4  ;;  %v1700_v5 = vadd.f32 %v6490_v57, %v6488_v36  ;;  %v8883_v36 = vld [vmem:[#allocation38_spill] sm:$0xff] }
 0x62e   : > { %8875 = vst [vmem:[#allocation31_spill] sm:$0xff] %v6492_v17  ;;  %v6498_v52 = vpop.eup %5001  ;;  %v1429_v50 = vpop.xlane.xlu0 %1428 }
 0x62f   : > { %8878 = vst [vmem:[#allocation32_spill] sm:$0xff] %v6498_v52  ;;  %v1604_v63 = vmul.f32 1.442695, %v1500_v61  ;;  %v1606_v29 = vmul.f32 1.442695, %v1501_v18  ;;  %v1502_v22 = vsub.f32 %v8879_v8, %v1429_v50  ;;  %v1503_v32 = vsub.f32 %v8880_v47, %v1429_v50  ;;  %1701 = vadd.xlane.f32.xlu1 %v1700_v5  ;;  %v8881_v8 = vld [vmem:[#allocation36_spill] sm:$0xff] }
 0x630   : > { %v1703_v44 = vadd.f32 %v6498_v52, %v6492_v17  ;;  %v8882_v5 = vld [vmem:[#allocation37_spill] sm:$0xff]  ;;  %v8884_v17 = vld [vmem:[#allocation39_spill] sm:$0xff] }
 0x631   : > { %5011 = vpow2.f32 %v1604_v63  ;;  %v1608_v35 = vmul.f32 1.442695, %v1502_v22  ;;  %v1610_v16 = vmul.f32 1.442695, %v1503_v32 }
 0x632   : > { %5013 = vpow2.f32 %v1606_v29  ;;  %1704 = vadd.xlane.f32.xlu0 %v1703_v44 }
 0x633   : > { %v6504_v4 = vpop.eup %5003  ;;  %5015 = vpow2.f32 %v1608_v35 }
 0x634   : > { %v6506_v13 = vpop.eup %5005  ;;  %5017 = vpow2.f32 %v1610_v16  ;;  %v1432_v61 = vpop.xlane.xlu1 %1431 }
 0x635   : > { %v6508_v18 = vpop.eup %5007  ;;  %v1504_v47 = vsub.f32 %v8881_v8, %v1432_v61  ;;  %v1505_v50 = vsub.f32 %v8882_v5, %v1432_v61  ;;  %v1706_v63 = vadd.f32 %v6506_v13, %v6504_v4 }
 0x636   : > { %v6514_v22 = vpop.eup %5009  ;;  %v1435_v32 = vpop.xlane.xlu0 %1434 }
 0x637   : > { %v1612_v29 = vmul.f32 1.442695, %v1504_v47  ;;  %v1614_v44 = vmul.f32 1.442695, %v1505_v50  ;;  %v1506_v35 = vsub.f32 %v8883_v36, %v1435_v32  ;;  %v1507_v52 = vsub.f32 %v8884_v17, %v1435_v32  ;;  %1707 = vadd.xlane.f32.xlu1 %v1706_v63 }
 0x638   : > { %v1709_v16 = vadd.f32 %v6514_v22, %v6508_v18 }
 0x639   : > { %5019 = vpow2.f32 %v1612_v29  ;;  %v1616_v8 = vmul.f32 1.442695, %v1506_v35  ;;  %v1618_v57 = vmul.f32 1.442695, %v1507_v52 }
 0x63a   : > { %5021 = vpow2.f32 %v1614_v44  ;;  %1710 = vadd.xlane.f32.xlu0 %v1709_v16 }
 0x63b   : > { %v6520_v61 = vpop.eup %5011  ;;  %5023 = vpow2.f32 %v1616_v8 }
 0x63c   : > { %8885 = vst [vmem:[#allocation33_spill] sm:$0xff] %v6520_v61  ;;  %v6522_v5 = vpop.eup %5013  ;;  %5025 = vpow2.f32 %v1618_v57 }
 0x63d   : > { %v6524_v47 = vpop.eup %5015  ;;  %v1712_v36 = vadd.f32 %v6522_v5, %v6520_v61 }
 0x63e   : > { %8886 = vst [vmem:[#allocation34_spill] sm:$0xff] %v6524_v47  ;;  %v6528_v17 = vpop.eup %5017 }
 0x63f   : > { %8887 = vst [vmem:[#allocation35_spill] sm:$0xff] %v6528_v17  ;;  %1713 = vadd.xlane.f32.xlu1 %v1712_v36  ;;  %v1715_v50 = vadd.f32 %v6528_v17, %v6524_v47 }
 0x641   : > { %1716 = vadd.xlane.f32.xlu0 %v1715_v50 }
 0x643   : > { %v6532_v52 = vpop.eup %5019 }
 0x644   : > { %8888 = vst [vmem:[#allocation36_spill] sm:$0xff] %v6532_v52  ;;  %v6534_v63 = vpop.eup %5021 }
 0x645   : > { %8889 = vst [vmem:[#allocation37_spill] sm:$0xff] %v6534_v63  ;;  %v6536_v32 = vpop.eup %5023  ;;  %v1718_v57 = vadd.f32 %v6534_v63, %v6532_v52 }
 0x646   : > { %8890 = vst [vmem:[#allocation38_spill] sm:$0xff] %v6536_v32  ;;  %v6540_v29 = vpop.eup %5025 }
 0x647   : > { %8891 = vst [vmem:[#allocation39_spill] sm:$0xff] %v6540_v29  ;;  %1719 = vadd.xlane.f32.xlu1 %v1718_v57  ;;  %v1721_v44 = vadd.f32 %v6540_v29, %v6536_v32 }
 0x649   : > { %1722 = vadd.xlane.f32.xlu0 %v1721_v44 }
 0x67c   : > { %v1654_v35 = vpop.xlane.xlu1 %1653 }
 0x67d   : > { %5027 = vrcp.f32 %v1654_v35 }
 0x67f   : > { %v1657_v16 = vpop.xlane.xlu0 %1656 }
 0x680   : > { %5029 = vrcp.f32 %v1657_v16  ;;  %v1438_v8 = vpop.xlane.xlu1 %1437 }
 0x681   : > { %v1508_v36 = vsub.f32 %v6260_v24, %v1438_v8  ;;  %v1509_v50 = vsub.f32 %v6262_v11, %v1438_v8 }
 0x683   : > { %v1620_v61 = vmul.f32 1.442695, %v1508_v36  ;;  %v1622_v47 = vmul.f32 1.442695, %v1509_v50  ;;  %v1441_v17 = vpop.xlane.xlu0 %1440 }
 0x684   : > { %v1510_v52 = vsub.f32 %v6264_v26, %v1441_v17  ;;  %v1511_v57 = vsub.f32 %v6268_v40, %v1441_v17  ;;  %v1660_v63 = vpop.xlane.xlu1 %1659 }
 0x685   : > { %5031 = vpow2.f32 %v1620_v61 }
 0x686   : > { %5033 = vpow2.f32 %v1622_v47  ;;  %v1624_v44 = vmul.f32 1.442695, %v1510_v52  ;;  %v1626_v32 = vmul.f32 1.442695, %v1511_v57 }
 0x687   : > { %v5028_v35 = vpop.eup %5027  ;;  %5035 = vrcp.f32 %v1660_v63 }
 0x688   : > { %5037 = vpow2.f32 %v1624_v44  ;;  %v1663_v16 = vpop.xlane.xlu0 %1662  ;;  %v1444_v29 = vpop.xlane.xlu1 %1443  ;;  %v1781_v26 = vmul.f32 %v5028_v35, %v6338_v59  ;;  %v1780_v36 = vmul.f32 %v5028_v35, %v6336_v39 }
 0x689   : > { %5039 = vpow2.f32 %v1626_v32  ;;  %v1512_v11 = vsub.f32 %v6272_v34, %v1444_v29  ;;  %v1513_v24 = vsub.f32 %v6274_v0, %v1444_v29 }
 0x68a   : > { %v5030_v8 = vpop.eup %5029  ;;  %5041 = vrcp.f32 %v1663_v16 }
 0x68b   : > { %v1628_v40 = vmul.f32 1.442695, %v1512_v11  ;;  %v1630_v17 = vmul.f32 1.442695, %v1513_v24  ;;  %v1783_v61 = vmul.f32 %v5030_v8, %v6346_v12  ;;  %v1782_v47 = vmul.f32 %v5030_v8, %v6340_v27 }
 0x68c   : > { %v1666_v52 = vpop.xlane.xlu1 %1665  ;;  %v1447_v63 = vpop.xlane.xlu0 %1446 }
 0x68d   : > { %5043 = vpow2.f32 %v1628_v40  ;;  %v1514_v32 = vsub.f32 %v6276_v9, %v1447_v63  ;;  %v1515_v34 = vsub.f32 %v6280_v3, %v1447_v63  ;;  %v1845_v0 = vpack.c.bf16 %v1783_v61, %v1781_v26 }
 0x68e   : > { %5045 = vpow2.f32 %v1630_v17  ;;  %v1844_v29 = vpack.c.bf16 %v1782_v47, %v1780_v36 }
 0x68f   : > { %v6556_v50 = vpop.eup %5031  ;;  %5047 = vrcp.f32 %v1666_v52  ;;  %v1632_v59 = vmul.f32 1.442695, %v1514_v32  ;;  %v1634_v57 = vmul.f32 1.442695, %v1515_v34  ;;  %1876 = vmatprep.subr.bf16.mxu1 %v1845_v0 }
 0x690   : > { %v6558_v12 = vpop.eup %5033  ;;  %1877 = vmatpush1.bf16.xpose.msra.mxu1 %v1844_v29  ;;  %v1669_v27 = vpop.xlane.xlu0 %1668 }
 0x691   : > { %v1450_v44 = vpop.xlane.xlu1 %1449  ;;  %v5036_v39 = vpop.eup %5035  ;;  %5049 = vpow2.f32 %v1632_v59  ;;  %v1724_v35 = vadd.f32 %v6558_v12, %v6556_v50 }
 0x692   : > { %v1516_v9 = vsub.f32 %v6284_v42, %v1450_v44  ;;  %v1517_v3 = vsub.f32 %v6286_v7, %v1450_v44  ;;  %v6564_v16 = vpop.eup %5037  ;;  %5051 = vpow2.f32 %v1634_v57  ;;  %v1785_v7 = vmul.f32 %v5036_v39, %v6357_v10 }
 0x693   : > { %v6566_v11 = vpop.eup %5039  ;;  %5053 = vrcp.f32 %v1669_v27  ;;  %1725 = vadd.xlane.f32.xlu1 %v1724_v35  ;;  %v1784_v63 = vmul.f32 %v5036_v39, %v6352_v55 }
 0x694   : > { %v1636_v24 = vmul.f32 1.442695, %v1516_v9  ;;  %v1638_v8 = vmul.f32 1.442695, %v1517_v3  ;;  %v5042_v26 = vpop.eup %5041  ;;  %v1453_v17 = vpop.xlane.xlu0 %1452  ;;  %v1727_v42 = vadd.f32 %v6566_v11, %v6564_v16 }
 0x695   : > { %v1672_v40 = vpop.xlane.xlu1 %1671  ;;  %v1518_v61 = vsub.f32 %v6290_v62, %v1453_v17  ;;  %v1519_v47 = vsub.f32 %v6292_v6, %v1453_v17  ;;  %v1787_v52 = vmul.f32 %v5042_v26, %v6370_v45  ;;  %v1786_v36 = vmul.f32 %v5042_v26, %v6366_v58 }
 0x696   : > { %5055 = vpow2.f32 %v1636_v24  ;;  %1728 = vadd.xlane.f32.xlu0 %v1727_v42 }
 0x697   : > { %5057 = vpow2.f32 %v1638_v8  ;;  %v6576_v32 = vpop.eup %5043  ;;  %v1640_v34 = vmul.f32 1.442695, %v1518_v61  ;;  %v1642_v0 = vmul.f32 1.442695, %v1519_v47  ;;  %v1847_v29 = vpack.c.bf16 %v1787_v52, %v1785_v7 }
 0x698   : > { %v6578_v59 = vpop.eup %5045  ;;  %5059 = vrcp.f32 %v1672_v40  ;;  %v1675_v10 = vpop.xlane.xlu0 %1674  ;;  %v1846_v57 = vpack.c.bf16 %v1786_v36, %v1784_v63 }
 0x699   : > { %v1456_v62 = vpop.xlane.xlu1 %1455  ;;  %v5048_v6 = vpop.eup %5047  ;;  %5061 = vpow2.f32 %v1640_v34  ;;  %1878 = vmatprep.subr.bf16.mxu1 %v1847_v29  ;;  %v1730_v58 = vadd.f32 %v6578_v59, %v6576_v32 }
 0x69a   : > { %v1520_v45 = vsub.f32 %v6296_v14, %v1456_v62  ;;  %v1521_v55 = vsub.f32 %v6298_v15, %v1456_v62  ;;  %5063 = vpow2.f32 %v1642_v0  ;;  %1879 = vmatpush1.bf16.xpose.msra.mxu1 %v1846_v57  ;;  %v1789_v35 = vmul.f32 %v5048_v6, %v6379_v28 }
 0x69b   : > { %v6584_v27 = vpop.eup %5049  ;;  %5065 = vrcp.f32 %v1675_v10  ;;  %1731 = vadd.xlane.f32.xlu1 %v1730_v58  ;;  %v1788_v17 = vmul.f32 %v5048_v6, %v6374_v53 }
 0x69c   : > { %v1644_v44 = vmul.f32 1.442695, %v1520_v45  ;;  %v1646_v39 = vmul.f32 1.442695, %v1521_v55  ;;  %v6586_v9 = vpop.eup %5051  ;;  %v1459_v3 = vpop.xlane.xlu0 %1458 }
 0x69d   : > { %v5054_v24 = vpop.eup %5053  ;;  %v1678_v14 = vpop.xlane.xlu1 %1677  ;;  %v1522_v15 = vsub.f32 %v6302_v38, %v1459_v3  ;;  %v1523_v8 = vsub.f32 %v6304_v1, %v1459_v3  ;;  %v1733_v26 = vadd.f32 %v6586_v9, %v6584_v27 }
 0x69e   : > { %5067 = vpow2.f32 %v1644_v44  ;;  %v1791_v40 = vmul.f32 %v5054_v24, %v6387_v37  ;;  %v1790_v42 = vmul.f32 %v5054_v24, %v6381_v19 }
 0x69f   : > { %5069 = vpow2.f32 %v1646_v39  ;;  %v1648_v28 = vmul.f32 1.442695, %v1522_v15  ;;  %v1650_v61 = vmul.f32 1.442695, %v1523_v8  ;;  %1734 = vadd.xlane.f32.xlu0 %v1733_v26 }
 0x6a0   : > { %v6596_v7 = vpop.eup %5055  ;;  %5071 = vrcp.f32 %v1678_v14  ;;  %v1849_v38 = vpack.c.bf16 %v1791_v40, %v1789_v35  ;;  %v1681_v1 = vpop.xlane.xlu0 %1680  ;;  %v1848_v52 = vpack.c.bf16 %v1790_v42, %v1788_v17 }
 0x6a1   : > { %v6598_v47 = vpop.eup %5057  ;;  %5073 = vpow2.f32 %v1648_v28  ;;  %v6628_v28 = vpop.f32.mrb[20].mxu1 }
 0x6a2   : > { %v1736_v63 = vadd.f32 %v6598_v47, %v6596_v7  ;;  %v5060_v37 = vpop.eup %5059  ;;  %5075 = vpow2.f32 %v1650_v61  ;;  %1880 = vmatprep.subr.bf16.mxu1 %v1849_v38 }
 0x6a3   : > { %v6602_v53 = vpop.eup %5061  ;;  %5077 = vrcp.f32 %v1681_v1  ;;  %1881 = vmatpush1.bf16.xpose.msra.mxu1 %v1848_v52  ;;  %v1793_v29 = vmul.f32 %v5060_v37, %v6401_v46  ;;  %v1792_v62 = vmul.f32 %v5060_v37, %v6396_v23 }
 0x6a4   : > { %1737 = vadd.xlane.f32.xlu1 %v1736_v63  ;;  %v6604_v19 = vpop.eup %5063  ;;  %v1684_v36 = vpop.xlane.xlu1 %1683 }
 0x6a5   : > { %v5066_v34 = vpop.eup %5065  ;;  %v1739_v0 = vadd.f32 %v6604_v19, %v6602_v53  ;;  %5079 = vrcp.f32 %v1684_v36 }
 0x6a6   : > { %v1795_v10 = vmul.f32 %v5066_v34, %v6409_v20  ;;  %v1794_v57 = vmul.f32 %v5066_v34, %v6403_v25 }
 0x6a7   : > { %1740 = vadd.xlane.f32.xlu0 %v1739_v0  ;;  %v1687_v45 = vpop.xlane.xlu0 %1686 }
 0x6a8   : > { %v6612_v6 = vpop.eup %5067  ;;  %5081 = vrcp.f32 %v1687_v45  ;;  %v1851_v58 = vpack.c.bf16 %v1795_v10, %v1793_v29  ;;  %v1850_v44 = vpack.c.bf16 %v1794_v57, %v1792_v62 }
 0x6a9   : > { %v6614_v55 = vpop.eup %5069 }
 0x6aa   : > { %v1742_v39 = vadd.f32 %v6614_v55, %v6612_v6  ;;  %v5072_v46 = vpop.eup %5071  ;;  %1882 = vmatprep.subr.bf16.mxu1 %v1851_v58 }
 0x6ab   : > { %v6618_v3 = vpop.eup %5073  ;;  %1883 = vmatpush1.bf16.xpose.msra.mxu1 %v1850_v44  ;;  %v1797_v24 = vmul.f32 %v5072_v46, %v6423_v56  ;;  %v1796_v15 = vmul.f32 %v5072_v46, %v6418_v33 }
 0x6ac   : > { %1743 = vadd.xlane.f32.xlu1 %v1742_v39  ;;  %v6620_v23 = vpop.eup %5075  ;;  %v1690_v25 = vpop.xlane.xlu1 %1689 }
 0x6ad   : > { %v5078_v20 = vpop.eup %5077  ;;  %v1745_v35 = vadd.f32 %v6620_v23, %v6618_v3  ;;  %5083 = vrcp.f32 %v1690_v25 }
 0x6ae   : > { %v1799_v14 = vmul.f32 %v5078_v20, %v6431_v30  ;;  %v1798_v8 = vmul.f32 %v5078_v20, %v6425_v51  ;;  %v6632_v30 = vpop.f32.mrb[21].mxu1 }
 0x6af   : > { %1746 = vadd.xlane.f32.xlu0 %v1745_v35  ;;  %v1693_v26 = vpop.xlane.xlu0 %1692  ;;  %v5080_v40 = vpop.eup %5079 }
 0x6b0   : > { %5085 = vrcp.f32 %v1693_v26  ;;  %v1853_v17 = vpack.c.bf16 %v1799_v14, %v1797_v24  ;;  %v1852_v42 = vpack.c.bf16 %v1798_v8, %v1796_v15  ;;  %v1801_v56 = vmul.f32 %v5080_v40, %v6442_v49  ;;  %v6635_v52 = vpop.f32.mrb[22].mxu1 }
 0x6b1   : > { %v1046_v63 = vpack.c.bf16 %v6635_v52, %v6628_v28  ;;  %v6639_v37 = vpop.f32.mrb[23].mxu1  ;;  %v1800_v49 = vmul.f32 %v5080_v40, %v6440_v48 }
 0x6b2   : > { %v5082_v61 = vpop.eup %5081  ;;  %1884 = vmatprep.subr.bf16.mxu1 %v1853_v17  ;;  %v6647_v29 = vpop.f32.mrb[24].mxu1 }
 0x6b3   : > { %1885 = vmatpush1.bf16.xpose.msra.mxu1 %v1852_v42  ;;  %v1803_v38 = vmul.f32 %v5082_v61, %v6450_v41  ;;  %v1802_v51 = vmul.f32 %v5082_v61, %v6444_v31  ;;  %v1047_v41 = vpack.c.bf16 %v6639_v37, %v6632_v30  ;;  %v4908_v31 = vld [vmem:[%s8651_s4 + $0x48] sm:$0xff]   ;;  %8892 = vst [vmem:[#allocation43_spill] sm:$0xff] %v6647_v29  ;;  %v6650_v62 = vpop.f32.mrb[25].mxu1  ;;  %v8900_v42 = vld [vmem:[#allocation28_spill] sm:$0xff] }
 0x6b4   : > { %v1696_v33 = vpop.xlane.xlu1 %1695  ;;  %4747 = vmatmul.mubr.msk.bf16.gmra.mrb[36].mxu1 %vm377_vm0, %v4908_v31  ;;  %8893 = vst [vmem:[#allocation44_spill] sm:$0xff] %v6650_v62  ;;  %v6656_v39 = vpop.f32.mrb[26].mxu1 }
 0x6b5   : > { %v1855_v1 = vpack.c.bf16 %v1803_v38, %v1801_v56  ;;  %5087 = vrcp.f32 %v1696_v33  ;;  %v1854_v0 = vpack.c.bf16 %v1802_v51, %v1800_v49  ;;  %1015 = vmatprep.mubr.bf16.mxu1 %v8856_v2  ;;  %8894 = vst [vmem:[#allocation45_spill] sm:$0xff] %v6656_v39  ;;  %v6660_v25 = vpop.f32.mrb[27].mxu1 }
 0x6b6   : > { %8895 = vst [vmem:[#allocation46_spill] sm:$0xff] %v6660_v25 }
 0x6b7   : > { %1886 = vmatprep.subr.bf16.mxu1 %v1855_v1  ;;  %v1699_v36 = vpop.xlane.xlu0 %1698  ;;  %v5084_v34 = vpop.eup %5083  ;;  %v8902_v1 = vld [vmem:[#allocation42_spill] sm:$0xff] }
 0x6b8   : > { %5089 = vrcp.f32 %v1699_v36  ;;  %v1805_v48 = vmul.f32 %v5084_v34, %v6458_v60  ;;  %v4909_v60 = vld [vmem:[%s8651_s4 + $0x50] sm:$0xff]   ;;  %v1804_v20 = vmul.f32 %v5084_v34, %v6456_v54  ;;  %v8899_v54 = vld [vmem:[#allocation41_spill] sm:$0xff]  ;;  %v4910_v34 = vld [vmem:[%s8651_s4 + $0x58] sm:$0xff]  }
 0x6ba   : > { %v5086_v10 = vpop.eup %5085 }
 0x6bb   : > { %1887 = vmatpush1.bf16.xpose.msra.mxu1 %v1854_v0  ;;  %v1807_v57 = vmul.f32 %v5086_v10, %v6466_v43  ;;  %v1806_v44 = vmul.f32 %v5086_v10, %v6460_v21  ;;  %v6668_v21 = vpop.f32.mrb[28].mxu1  ;;  %v8903_v10 = vld [vmem:[#allocation40_spill] sm:$0xff] }
 0x6bc   : > { %v1702_v45 = vpop.xlane.xlu1 %1701  ;;  %8896 = vst [vmem:[#allocation47_spill] sm:$0xff] %v6668_v21  ;;  %v6670_v14 = vpop.f32.mrb[29].mxu1  ;;  %4748 = vmatmul.mubr.msk.bf16.gmra.mrb[40].mxu1 %vm377_vm0, %v4909_v60 }
 0x6bd   : > { %v1857_v58 = vpack.c.bf16 %v1807_v57, %v1805_v48  ;;  %5091 = vrcp.f32 %v1702_v45  ;;  %8897 = vst [vmem:[#allocation48_spill] sm:$0xff] %v6670_v14  ;;  %v1856_v15 = vpack.c.bf16 %v1806_v44, %v1804_v20  ;;  %v6672_v8 = vpop.f32.mrb[30].mxu1  ;;  %1025 = vmatprep.mubr.bf16.mxu1 %v8856_v2 }
 0x6be   : > { %8898 = vst [vmem:[#allocation49_spill] sm:$0xff] %v6672_v8  ;;  %v6680_v38 = vpop.f32.mrb[31].mxu1 }
 0x6bf   : > { %1888 = vmatprep.subr.bf16.mxu1 %v1857_v58  ;;  %v1705_v43 = vpop.xlane.xlu0 %1704  ;;  %v5088_v24 = vpop.eup %5087  ;;  %8901 = vst [vmem:[#allocation41_spill] sm:$0xff] %v6680_v38 }
 0x6c0   : > { %5093 = vrcp.f32 %v1705_v43  ;;  %v1809_v17 = vmul.f32 %v5088_v24, %v8899_v54  ;;  %v6685_v49 = vpop.f32.mrb[32].mxu1  ;;  %v1808_v48 = vmul.f32 %v5088_v24, %v8903_v10  ;;  %v8904_v43 = vld [vmem:[#allocation30_spill] sm:$0xff] }
 0x6c1   : > { %v999_v31 = vpop.f32.mrb[33].mxu1 }
 0x6c2   : > { %v5090_v26 = vpop.eup %5089  ;;  %v6691_v57 = vpop.f32.mrb[34].mxu1 }
 0x6c3   : > { %1889 = vmatpush1.bf16.xpose.msra.mxu1 %v1856_v15  ;;  %v1811_v61 = vmul.f32 %v5090_v26, %v8900_v42  ;;  %v1810_v51 = vmul.f32 %v5090_v26, %v8902_v1  ;;  %v1052_v58 = vpack.c.bf16 %v6691_v57, %v6685_v49  ;;  %v8905_v15 = vld [vmem:[#allocation32_spill] sm:$0xff]  ;;  %v8906_v42 = vld [vmem:[#allocation31_spill] sm:$0xff]  ;;  %v8907_v1 = vld [vmem:[#allocation29_spill] sm:$0xff] }
 0x6c4   : > { %v1708_v56 = vpop.xlane.xlu1 %1707  ;;  %4749 = vmatmul.mubr.msk.bf16.gmra.mrb[44].mxu1 %vm377_vm0, %v4910_v34 }
 0x6c5   : > { %v1859_v33 = vpack.c.bf16 %v1811_v61, %v1809_v17  ;;  %5095 = vrcp.f32 %v1708_v56  ;;  %v1858_v44 = vpack.c.bf16 %v1810_v51, %v1808_v48  ;;  %v1003_v17 = vpop.f32.mrb[35].mxu1 }
 0x6c6   : > { %v1053_v56 = vpack.c.bf16 %v1003_v17, %v999_v31 }
 0x6c7   : > { %1890 = vmatprep.subr.bf16.mxu1 %v1859_v33  ;;  %v1711_v0 = vpop.xlane.xlu0 %1710  ;;  %v5092_v45 = vpop.eup %5091 }
 0x6c8   : > { %5097 = vrcp.f32 %v1711_v0  ;;  %v1813_v20 = vmul.f32 %v5092_v45, %v8904_v43  ;;  %v1812_v51 = vmul.f32 %v5092_v45, %v8907_v1  ;;  %1908 = vmatprep.mubr.bf16.mxu1 %v1053_v56  ;;  %v8912_v56 = vld [vmem:[#allocation19_spill] sm:$0xff] }
 0x6ca   : > { %v5094_v60 = vpop.eup %5093 }
 0x6cb   : > { %1891 = vmatpush1.bf16.xpose.msra.mxu1 %v1858_v44  ;;  %v1815_v26 = vmul.f32 %v5094_v60, %v8905_v15  ;;  %v1814_v61 = vmul.f32 %v5094_v60, %v8906_v42 }
 0x6cc   : > { %v1714_v54 = vpop.xlane.xlu1 %1713 }
 0x6cd   : > { %5099 = vrcp.f32 %v1714_v54  ;;  %v1861_v24 = vpack.c.bf16 %v1815_v26, %v1813_v20  ;;  %v1860_v34 = vpack.c.bf16 %v1814_v61, %v1812_v51  ;;  %v8908_v26 = vld [vmem:[#allocation18_spill] sm:$0xff]  ;;  %v8909_v54 = vld [vmem:[#allocation16_spill] sm:$0xff] }
 0x6ce   : > { %v1717_v33 = vpop.xlane.xlu0 %1716  ;;  %v8910_v17 = vpack.c.bf16 %v8908_v26, %v8909_v54  ;;  %v8915_v51 = vld [vmem:[#allocation34_spill] sm:$0xff]  ;;  %v8920_v54 = vld [vmem:[#allocation36_spill] sm:$0xff] }
 0x6cf   : > { %1892 = vmatprep.subr.bf16.mxu1 %v1861_v24  ;;  %5101 = vrcp.f32 %v1717_v33  ;;  %v5096_v0 = vpop.eup %5095  ;;  %v8913_v33 = vld [vmem:[#allocation17_spill] sm:$0xff] }
 0x6d0   : > { %v1817_v48 = vmul.f32 %v5096_v0, %v6506_v13  ;;  %v1816_v45 = vmul.f32 %v5096_v0, %v6504_v4  ;;  %v8916_v0 = vld [vmem:[#allocation33_spill] sm:$0xff] }
 0x6d2   : > { %v5098_v10 = vpop.eup %5097 }
 0x6d3   : > { %1893 = vmatpush1.bf16.xpose.msra.mxu1 %v1860_v34  ;;  %v1819_v44 = vmul.f32 %v5098_v10, %v6514_v22  ;;  %v1818_v60 = vmul.f32 %v5098_v10, %v6508_v18  ;;  %v8911_v22 = vld [vmem:[#allocation35_spill] sm:$0xff]  ;;  %v8914_v18 = vpack.c.bf16 %v8912_v56, %v8913_v33 }
 0x6d4   : > { %v1720_v43 = vpop.xlane.xlu1 %1719 }
 0x6d5   : > { %5103 = vrcp.f32 %v1720_v43  ;;  %v1863_v20 = vpack.c.bf16 %v1819_v44, %v1817_v48  ;;  %v1862_v42 = vpack.c.bf16 %v1818_v60, %v1816_v45  ;;  %v8917_v43 = vld [vmem:[#allocation37_spill] sm:$0xff]  ;;  %v8918_v60 = vld [vmem:[#allocation39_spill] sm:$0xff]  ;;  %v8919_v45 = vld [vmem:[#allocation38_spill] sm:$0xff] }
 0x6d6   : > { %v1723_v31 = vpop.xlane.xlu0 %1722 }
 0x6d7   : > { %v5100_v15 = vpop.eup %5099  ;;  %1894 = vmatprep.subr.bf16.mxu1 %v1863_v20  ;;  %5105 = vrcp.f32 %v1723_v31 }
 0x6d8   : > { %v1821_v13 = vmul.f32 %v5100_v15, %v6522_v5  ;;  %v1820_v10 = vmul.f32 %v5100_v15, %v8916_v0 }
 0x6d9   : > { %1929 = vxpose.xlu1.c.b16.start.end [1/1] (short) %v8910_v17, 128  ;;  %v5102_v24 = vpop.eup %5101 }
 0x6da   : > { %v1823_v61 = vmul.f32 %v5102_v24, %v8911_v22  ;;  %v1822_v34 = vmul.f32 %v5102_v24, %v8915_v51 }
 0x6db   : > { %1895 = vmatpush1.bf16.xpose.msra.mxu1 %v1862_v42 }
 0x6dc   : > { %1945 = vxpose.xlu0.c.b16.start.end [1/1] (short) %v8914_v18, 128  ;;  %v1865_v1 = vpack.c.bf16 %v1823_v61, %v1821_v13  ;;  %v1864_v44 = vpack.c.bf16 %v1822_v34, %v1820_v10 }
 0x6de   : > { %1896 = vmatprep.subr.bf16.mxu1 %v1865_v1 }
 0x6df   : > { %v5104_v4 = vpop.eup %5103 }
 0x6e0   : > { %v1825_v20 = vmul.f32 %v5104_v4, %v8917_v43  ;;  %v1824_v17 = vmul.f32 %v5104_v4, %v8920_v54 }
 0x6e1   : > { %v5106_v48 = vpop.eup %5105 }
 0x6e2   : > { %v1827_v5 = vmul.f32 %v5106_v48, %v8918_v60  ;;  %v1826_v26 = vmul.f32 %v5106_v48, %v8919_v45 }
 0x6e3   : > { %1897 = vmatpush1.bf16.xpose.msra.mxu1 %v1864_v44 }
 0x6e4   : > { %v1867_v31 = vpack.c.bf16 %v1827_v5, %v1825_v20  ;;  %v1866_v42 = vpack.c.bf16 %v1826_v26, %v1824_v17 }
 0x6e6   : > { %1898 = vmatprep.subr.bf16.mxu1 %v1867_v31 }
 0x6eb   : > { %1899 = vmatpush1.bf16.xpose.msra.mxu1 %v1866_v42 }
 0x720   : > { %v1726_v24 = vpop.xlane.xlu1 %1725 }
 0x721   : > { %5107 = vrcp.f32 %v1726_v24 }
 0x723   : > { %v1729_v13 = vpop.xlane.xlu0 %1728 }
 0x724   : > { %5109 = vrcp.f32 %v1729_v13 }
 0x728   : > { %v1732_v15 = vpop.xlane.xlu1 %1731 }
 0x729   : > { %5111 = vrcp.f32 %v1732_v15 }
 0x72b   : > { %v5108_v22 = vpop.eup %5107 }
 0x72c   : > { %v1735_v61 = vpop.xlane.xlu0 %1734  ;;  %v1829_v33 = vmul.f32 %v5108_v22, %v6558_v12  ;;  %v1828_v1 = vmul.f32 %v5108_v22, %v6556_v50 }
 0x72d   : > { %5113 = vrcp.f32 %v1735_v61 }
 0x72e   : > { %v5110_v56 = vpop.eup %5109 }
 0x72f   : > { %v1831_v18 = vmul.f32 %v5110_v56, %v6566_v11  ;;  %v1830_v51 = vmul.f32 %v5110_v56, %v6564_v16 }
 0x731   : > { %v1738_v34 = vpop.xlane.xlu1 %1737  ;;  %v1869_v4 = vpack.c.bf16 %v1831_v18, %v1829_v33  ;;  %v1868_v0 = vpack.c.bf16 %v1830_v51, %v1828_v1 }
 0x732   : > { %5115 = vrcp.f32 %v1738_v34 }
 0x733   : > { %1900 = vmatprep.subr.bf16.mxu1 %v1869_v4  ;;  %v5112_v48 = vpop.eup %5111 }
 0x734   : > { %1901 = vmatpush1.bf16.xpose.msra.mxu1 %v1868_v0  ;;  %v1741_v10 = vpop.xlane.xlu0 %1740  ;;  %v1833_v20 = vmul.f32 %v5112_v48, %v6578_v59  ;;  %v1832_v11 = vmul.f32 %v5112_v48, %v6576_v32 }
 0x735   : > { %5117 = vrcp.f32 %v1741_v10 }
 0x737   : > { %v5114_v44 = vpop.eup %5113 }
 0x738   : > { %v1835_v12 = vmul.f32 %v5114_v44, %v6586_v9  ;;  %v1834_v50 = vmul.f32 %v5114_v44, %v6584_v27 }
 0x739   : > { %v1744_v43 = vpop.xlane.xlu1 %1743 }
 0x73a   : > { %v1871_v16 = vpack.c.bf16 %v1835_v12, %v1833_v20  ;;  %v1870_v60 = vpack.c.bf16 %v1834_v50, %v1832_v11  ;;  %5119 = vrcp.f32 %v1744_v43 }
 0x73c   : > { %1902 = vmatprep.subr.bf16.mxu1 %v1871_v16  ;;  %v1747_v5 = vpop.xlane.xlu0 %1746  ;;  %v5116_v31 = vpop.eup %5115 }
 0x73d   : > { %5121 = vrcp.f32 %v1747_v5  ;;  %1903 = vmatpush1.bf16.xpose.msra.mxu1 %v1870_v60  ;;  %v1837_v26 = vmul.f32 %v5116_v31, %v6598_v47  ;;  %v1836_v59 = vmul.f32 %v5116_v31, %v6596_v7 }
 0x73f   : > { %v5118_v45 = vpop.eup %5117  ;;  %v1937_v7 = vpop.trf.xlu1 }
 0x740   : > { %v1839_v54 = vmul.f32 %v5118_v45, %v6604_v19  ;;  %v1838_v9 = vmul.f32 %v5118_v45, %v6602_v53 }
 0x742   : > { %v1873_v32 = vpack.c.bf16 %v1839_v54, %v1837_v26  ;;  %v1872_v17 = vpack.c.bf16 %v1838_v9, %v1836_v59  ;;  %v1953_v1 = vpop.trf.xlu0 }
 0x743   : > { %v1938_v53 = vpop.trf.xlu1 }
 0x744   : > { %1904 = vmatprep.subr.bf16.mxu1 %v1873_v32  ;;  %v5120_v27 = vpop.eup %5119 }
 0x745   : > { %1905 = vmatpush1.bf16.xpose.msra.mxu1 %v1872_v17  ;;  %v1841_v24 = vmul.f32 %v5120_v27, %v6614_v55  ;;  %v1840_v15 = vmul.f32 %v5120_v27, %v6612_v6 }
 0x746   : > { %v1954_v44 = vpop.trf.xlu0 }
 0x747   : > { %v5122_v42 = vpop.eup %5121  ;;  %v1939_v6 = vpop.trf.xlu1 }
 0x748   : > { %v1843_v13 = vmul.f32 %v5122_v42, %v6620_v23  ;;  %v1842_v47 = vmul.f32 %v5122_v42, %v6618_v3 }
 0x74a   : > { %v1875_v22 = vpack.c.bf16 %v1843_v13, %v1841_v24  ;;  %v1874_v19 = vpack.c.bf16 %v1842_v47, %v1840_v15  ;;  %v1955_v20 = vpop.trf.xlu0 }
 0x74b   : > { %v1940_v55 = vpop.trf.xlu1 }
 0x74c   : > { %1906 = vmatprep.subr.bf16.mxu1 %v1875_v22 }
 0x74d   : > { %1907 = vmatpush1.bf16.xpose.msra.mxu1 %v1874_v19 }
 0x74e   : > { %2009 = vmatprep.subr.bf16.mxu1 %v1047_v41  ;;  %v1956_v12 = vpop.trf.xlu0 }
 0x74f   : > { %v1941_v3 = vpop.trf.xlu1 }
 0x752   : > { %v1957_v11 = vpop.trf.xlu0 }
 0x753   : > { %v1942_v23 = vpop.trf.xlu1 }
 0x754   : > { %1909 = vmatmul.mubr.bf16.vlgmr.msra.gmra.mrb[48].mxu1 %v1052_v58 }
 0x755   : > { %2010 = vmatpush1.bf16.msra.mxu1 %v1046_v63  ;;  %2041 = vmatprep.mubr.bf16.mxu1 %v8856_v2 }
 0x756   : > { %v1958_v50 = vpop.trf.xlu0 }
 0x757   : > { %v1943_v28 = vpop.trf.xlu1 }
 0x75a   : > { %v1959_v16 = vpop.trf.xlu0 }
 0x75b   : > { %v1944_v49 = vpop.trf.xlu1 }
 0x75c   : > { %4766 = vmatmul.mubr.msk.bf16.vlgmr.msra.gmra.mrb[52].mxu1 %vm1122_vm2, %v1937_v7 }
 0x75d   : > { %2051 = vmatprep.mubr.bf16.mxu1 %v8856_v2 }
 0x75e   : > { %v1960_v60 = vpop.trf.xlu0 }
 0x764   : > { %4767 = vmatmul.mubr.msk.bf16.gmra.mrb[56].mxu1 %vm1122_vm2, %v1938_v53 }
 0x765   : > { %2061 = vmatprep.mubr.bf16.mxu1 %v8856_v2 }
 0x76c   : > { %4768 = vmatmul.mubr.msk.bf16.gmra.mrb[60].mxu1 %vm1122_vm2, %v1939_v6 }
 0x76d   : > { %2071 = vmatprep.mubr.bf16.mxu1 %v8856_v2 }
 0x774   : > { %4769 = vmatmul.mubr.msk.bf16.gmra.mrb[64].mxu1 %vm1122_vm2, %v1940_v55 }
 0x775   : > { %2081 = vmatprep.mubr.bf16.mxu1 %v8856_v2 }
 0x77c   : > { %4770 = vmatmul.mubr.msk.bf16.gmra.mrb[68].mxu1 %vm1122_vm2, %v1941_v3 }
 0x77d   : > { %2091 = vmatprep.mubr.bf16.mxu1 %v8856_v2 }
 0x784   : > { %4771 = vmatmul.mubr.msk.bf16.gmra.mrb[72].mxu1 %vm1122_vm2, %v1942_v23 }
 0x785   : > { %2101 = vmatprep.mubr.bf16.mxu1 %v8856_v2 }
 0x787   : > { %v6758_v30 = vpop.f32.mrb[36].mxu1 }
 0x788   : > { %8921 = vst [vmem:[#allocation28_spill] sm:$0xff] %v6758_v30  ;;  %v1009_v52 = vpop.f32.mrb[37].mxu1 }
 0x789   : > { %v6760_v63 = vpop.f32.mrb[38].mxu1 }
 0x78a   : > { %8922 = vst [vmem:[#allocation42_spill] sm:$0xff] %v6760_v63  ;;  %v1013_v41 = vpop.f32.mrb[39].mxu1 }
 0x78b   : > { %v1055_v57 = vpack.c.bf16 %v1013_v41, %v1009_v52 }
 0x78c   : > { %4772 = vmatmul.mubr.msk.bf16.gmra.mrb[76].mxu1 %vm1122_vm2, %v1943_v28 }
 0x78d   : > { %2111 = vmatprep.mubr.bf16.mxu1 %v8856_v2  ;;  %2746 = vmatprep.mubr.bf16.mxu0 %v1055_v57 }
 0x78f   : > { %v6766_v58 = vpop.f32.mrb[40].mxu1 }
 0x790   : > { %8923 = vst [vmem:[#allocation40_spill] sm:$0xff] %v6766_v58  ;;  %v1019_v61 = vpop.f32.mrb[41].mxu1 }
 0x791   : > { %v6768_v56 = vpop.f32.mrb[42].mxu1 }
 0x792   : > { %8924 = vst [vmem:[#allocation30_spill] sm:$0xff] %v6768_v56  ;;  %v1023_v18 = vpop.f32.mrb[43].mxu1 }
 0x793   : > { %v1057_v51 = vpack.c.bf16 %v1023_v18, %v1019_v61 }
 0x794   : > { %4773 = vmatmul.mubr.msk.bf16.gmra.mrb[80].mxu1 %vm1122_vm2, %v1944_v49 }
 0x795   : > { %2121 = vmatprep.mubr.bf16.mxu1 %v8856_v2 }
 0x797   : > { %v6774_v34 = vpop.f32.mrb[44].mxu1 }
 0x798   : > { %8925 = vst [vmem:[#allocation32_spill] sm:$0xff] %v6774_v34  ;;  %v6776_v4 = vpop.f32.mrb[45].mxu1 }
 0x799   : > { %8926 = vst [vmem:[#allocation31_spill] sm:$0xff] %v6776_v4  ;;  %v6778_v0 = vpop.f32.mrb[46].mxu1 }
 0x79a   : > { %8927 = vst [vmem:[#allocation29_spill] sm:$0xff] %v6778_v0  ;;  %v6782_v48 = vpop.f32.mrb[47].mxu1 }
 0x79b   : > { %8928 = vst [vmem:[#allocation18_spill] sm:$0xff] %v6782_v48 }
 0x79c   : > { %4774 = vmatmul.mubr.msk.bf16.gmra.mrb[84].mxu1 %vm1122_vm2, %v1953_v1 }
 0x79d   : > { %2131 = vmatprep.mubr.bf16.mxu1 %v8856_v2 }
 0x7a4   : > { %4775 = vmatmul.mubr.msk.bf16.gmra.mrb[88].mxu1 %vm1122_vm2, %v1954_v44 }
 0x7a5   : > { %2141 = vmatprep.mubr.bf16.mxu1 %v8856_v2 }
 0x7ac   : > { %4776 = vmatmul.mubr.msk.bf16.gmra.mrb[92].mxu1 %vm1122_vm2, %v1955_v20 }
 0x7ad   : > { %2151 = vmatprep.mubr.bf16.mxu1 %v8856_v2 }
 0x7b4   : > { %4777 = vmatmul.mubr.msk.bf16.gmra.mrb[96].mxu1 %vm1122_vm2, %v1956_v12 }
 0x7b5   : > { %2161 = vmatprep.mubr.bf16.mxu1 %v8856_v2 }
 0x7bc   : > { %4778 = vmatmul.mubr.msk.bf16.gmra.mrb[100].mxu1 %vm1122_vm2, %v1957_v11 }
 0x7bd   : > { %2171 = vmatprep.mubr.bf16.mxu1 %v8856_v2 }
 0x7c4   : > { %4779 = vmatmul.mubr.msk.bf16.gmra.mrb[104].mxu1 %vm1122_vm2, %v1958_v50 }
 0x7c5   : > { %2181 = vmatprep.mubr.bf16.mxu1 %v8856_v2 }
 0x7cc   : > { %4780 = vmatmul.mubr.msk.bf16.gmra.mrb[108].mxu1 %vm1122_vm2, %v1959_v16 }
 0x7cd   : > { %2191 = vmatprep.mubr.bf16.mxu1 %v8856_v2 }
 0x7d4   : > { %4781 = vmatmul.mubr.msk.bf16.gmra.mrb[112].mxu1 %vm1122_vm2, %v1960_v60 }
 0x7d5   : > { %3584 = vmatprep.mubr.bf16.mxu1 %v1057_v51 }
 0x827   : > { %v6799_v5 = vpop.f32.mrb[48].mxu1 }
 0x828   : > { %8929 = vst [vmem:[#allocation16_spill] sm:$0xff] %v6799_v5  ;;  %v6801_v31 = vpop.f32.mrb[49].mxu1 }
 0x829   : > { %8930 = vst [vmem:[#allocation35_spill] sm:$0xff] %v6801_v31  ;;  %v6803_v45 = vpop.f32.mrb[50].mxu1 }
 0x82a   : > { %8931 = vst [vmem:[#allocation19_spill] sm:$0xff] %v6803_v45  ;;  %v6807_v54 = vpop.f32.mrb[51].mxu1 }
 0x82b   : > { %8932 = vst [vmem:[#allocation17_spill] sm:$0xff] %v6807_v54 }
 0x82f   : > { %v6811_v9 = vpop.f32.mrb[52].mxu1 }
 0x830   : > { %v6813_v32 = vpop.f32.mrb[53].mxu1 }
 0x831   : > { %v2202_v17 = vmax.f32 %v6811_v9, %v6813_v32  ;;  %v6817_v27 = vpop.f32.mrb[54].mxu1 }
 0x832   : > { %v6819_v42 = vpop.f32.mrb[55].mxu1 }
 0x833   : > { %v2205_v24 = vmax.f32 %v6817_v27, %v6819_v42  ;;  %2203 = vmax.xlane.f32.xlu1 %v2202_v17 }
 0x835   : > { %2206 = vmax.xlane.f32.xlu0 %v2205_v24 }
 0x837   : > { %v6823_v13 = vpop.f32.mrb[56].mxu1 }
 0x838   : > { %v6825_v15 = vpop.f32.mrb[57].mxu1 }
 0x839   : > { %v2208_v47 = vmax.f32 %v6823_v13, %v6825_v15  ;;  %v6829_v22 = vpop.f32.mrb[58].mxu1 }
 0x83a   : > { %v6831_v19 = vpop.f32.mrb[59].mxu1 }
 0x83b   : > { %v2211_v7 = vmax.f32 %v6829_v22, %v6831_v19  ;;  %2209 = vmax.xlane.f32.xlu1 %v2208_v47 }
 0x83d   : > { %2212 = vmax.xlane.f32.xlu0 %v2211_v7 }
 0x83f   : > { %v6835_v53 = vpop.f32.mrb[60].mxu1 }
 0x840   : > { %v6837_v6 = vpop.f32.mrb[61].mxu1 }
 0x841   : > { %v2214_v55 = vmax.f32 %v6835_v53, %v6837_v6  ;;  %v6841_v3 = vpop.f32.mrb[62].mxu1 }
 0x842   : > { %v6843_v23 = vpop.f32.mrb[63].mxu1 }
 0x843   : > { %v2217_v28 = vmax.f32 %v6841_v3, %v6843_v23  ;;  %2215 = vmax.xlane.f32.xlu1 %v2214_v55 }
 0x845   : > { %2218 = vmax.xlane.f32.xlu0 %v2217_v28 }
 0x847   : > { %v6847_v52 = vpop.f32.mrb[64].mxu1 }
 0x848   : > { %v6849_v41 = vpop.f32.mrb[65].mxu1 }
 0x849   : > { %v2220_v49 = vmax.f32 %v6847_v52, %v6849_v41  ;;  %v6853_v57 = vpop.f32.mrb[66].mxu1 }
 0x84a   : > { %v6855_v61 = vpop.f32.mrb[67].mxu1 }
 0x84b   : > { %v2223_v18 = vmax.f32 %v6853_v57, %v6855_v61  ;;  %2221 = vmax.xlane.f32.xlu1 %v2220_v49 }
 0x84d   : > { %2224 = vmax.xlane.f32.xlu0 %v2223_v18 }
 0x84f   : > { %v6859_v1 = vpop.f32.mrb[68].mxu1 }
 0x850   : > { %v6861_v51 = vpop.f32.mrb[69].mxu1 }
 0x851   : > { %v2226_v44 = vmax.f32 %v6859_v1, %v6861_v51  ;;  %v6865_v20 = vpop.f32.mrb[70].mxu1 }
 0x852   : > { %v6867_v12 = vpop.f32.mrb[71].mxu1 }
 0x853   : > { %v2229_v11 = vmax.f32 %v6865_v20, %v6867_v12  ;;  %2227 = vmax.xlane.f32.xlu1 %v2226_v44 }
 0x855   : > { %2230 = vmax.xlane.f32.xlu0 %v2229_v11 }
 0x857   : > { %v6871_v50 = vpop.f32.mrb[72].mxu1 }
 0x858   : > { %v6873_v16 = vpop.f32.mrb[73].mxu1 }
 0x859   : > { %v2232_v60 = vmax.f32 %v6871_v50, %v6873_v16  ;;  %v6877_v17 = vpop.f32.mrb[74].mxu1 }
 0x85a   : > { %v6879_v24 = vpop.f32.mrb[75].mxu1 }
 0x85b   : > { %v2235_v47 = vmax.f32 %v6877_v17, %v6879_v24  ;;  %2233 = vmax.xlane.f32.xlu1 %v2232_v60 }
 0x85d   : > { %2236 = vmax.xlane.f32.xlu0 %v2235_v47 }
 0x85f   : > { %v6883_v7 = vpop.f32.mrb[76].mxu1 }
 0x860   : > { %v6885_v55 = vpop.f32.mrb[77].mxu1 }
 0x861   : > { %v2238_v28 = vmax.f32 %v6883_v7, %v6885_v55  ;;  %v6889_v49 = vpop.f32.mrb[78].mxu1 }
 0x862   : > { %v6891_v18 = vpop.f32.mrb[79].mxu1 }
 0x863   : > { %v2241_v44 = vmax.f32 %v6889_v49, %v6891_v18  ;;  %2239 = vmax.xlane.f32.xlu1 %v2238_v28 }
 0x865   : > { %2242 = vmax.xlane.f32.xlu0 %v2241_v44 }
 0x867   : > { %v6895_v11 = vpop.f32.mrb[80].mxu1 }
 0x868   : > { %v6897_v60 = vpop.f32.mrb[81].mxu1 }
 0x869   : > { %v2244_v47 = vmax.f32 %v6895_v11, %v6897_v60  ;;  %v6901_v26 = vpop.f32.mrb[82].mxu1 }
 0x86a   : > { %v6903_v10 = vpop.f32.mrb[83].mxu1 }
 0x86b   : > { %v2247_v59 = vmax.f32 %v6901_v26, %v6903_v10  ;;  %2245 = vmax.xlane.f32.xlu1 %v2244_v47 }
 0x86d   : > { %2248 = vmax.xlane.f32.xlu0 %v2247_v59 }
 0x86f   : > { %v6907_v40 = vpop.f32.mrb[84].mxu1 }
 0x870   : > { %v6909_v28 = vpop.f32.mrb[85].mxu1 }
 0x871   : > { %v2250_v44 = vmax.f32 %v6907_v40, %v6909_v28  ;;  %v6913_v33 = vpop.f32.mrb[86].mxu1 }
 0x872   : > { %v6915_v36 = vpop.f32.mrb[87].mxu1 }
 0x873   : > { %8933 = vst [vmem:[#allocation34_spill] sm:$0xff] %v6915_v36  ;;  %v2253_v43 = vmax.f32 %v6913_v33, %v6915_v36  ;;  %2251 = vmax.xlane.f32.xlu1 %v2250_v44 }
 0x875   : > { %2254 = vmax.xlane.f32.xlu0 %v2253_v43 }
 0x877   : > { %v6919_v46 = vpop.f32.mrb[88].mxu1 }
 0x878   : > { %8934 = vst [vmem:[#allocation33_spill] sm:$0xff] %v6919_v46  ;;  %v6921_v47 = vpop.f32.mrb[89].mxu1 }
 0x879   : > { %8935 = vst [vmem:[#allocation37_spill] sm:$0xff] %v6921_v47  ;;  %v2256_v59 = vmax.f32 %v6919_v46, %v6921_v47  ;;  %v6925_v37 = vpop.f32.mrb[90].mxu1 }
 0x87a   : > { %8936 = vst [vmem:[#allocation39_spill] sm:$0xff] %v6925_v37  ;;  %v6927_v35 = vpop.f32.mrb[91].mxu1 }
 0x87b   : > { %8937 = vst [vmem:[#allocation38_spill] sm:$0xff] %v6927_v35  ;;  %v2259_v5 = vmax.f32 %v6925_v37, %v6927_v35  ;;  %2257 = vmax.xlane.f32.xlu1 %v2256_v59 }
 0x87d   : > { %2260 = vmax.xlane.f32.xlu0 %v2259_v5 }
 0x87f   : > { %v6931_v45 = vpop.f32.mrb[92].mxu1 }
 0x880   : > { %8938 = vst [vmem:[#allocation36_spill] sm:$0xff] %v6931_v45  ;;  %v6933_v44 = vpop.f32.mrb[93].mxu1 }
 0x881   : > { %8939 = vst [vmem:[#allocation50_spill] sm:$0xff] %v6933_v44  ;;  %v2262_v43 = vmax.f32 %v6931_v45, %v6933_v44  ;;  %v6937_v34 = vpop.f32.mrb[94].mxu1 }
 0x882   : > { %8940 = vst [vmem:[#allocation51_spill] sm:$0xff] %v6937_v34  ;;  %v6939_v0 = vpop.f32.mrb[95].mxu1 }
 0x883   : > { %8941 = vst [vmem:[#allocation52_spill] sm:$0xff] %v6939_v0  ;;  %v2265_v31 = vmax.f32 %v6937_v34, %v6939_v0  ;;  %2263 = vmax.xlane.f32.xlu1 %v2262_v43 }
 0x885   : > { %2266 = vmax.xlane.f32.xlu0 %v2265_v31 }
 0x887   : > { %v6943_v54 = vpop.f32.mrb[96].mxu1 }
 0x888   : > { %8942 = vst [vmem:[#allocation53_spill] sm:$0xff] %v6943_v54  ;;  %v6945_v59 = vpop.f32.mrb[97].mxu1 }
 0x889   : > { %8943 = vst [vmem:[#allocation54_spill] sm:$0xff] %v6945_v59  ;;  %v2268_v5 = vmax.f32 %v6943_v54, %v6945_v59  ;;  %v6949_v21 = vpop.f32.mrb[98].mxu1 }
 0x88a   : > { %8944 = vst [vmem:[#allocation55_spill] sm:$0xff] %v6949_v21  ;;  %v6951_v8 = vpop.f32.mrb[99].mxu1 }
 0x88b   : > { %8945 = vst [vmem:[#allocation56_spill] sm:$0xff] %v6951_v8  ;;  %v2271_v58 = vmax.f32 %v6949_v21, %v6951_v8  ;;  %2269 = vmax.xlane.f32.xlu1 %v2268_v5 }
 0x88d   : > { %2272 = vmax.xlane.f32.xlu0 %v2271_v58 }
 0x88f   : > { %v6955_v56 = vpop.f32.mrb[100].mxu1 }
 0x890   : > { %v6957_v43 = vpop.f32.mrb[101].mxu1 }
 0x891   : > { %v6961_v14 = vpop.f32.mrb[102].mxu1 }
 0x892   : > { %v6963_v38 = vpop.f32.mrb[103].mxu1 }
 0x897   : > { %v6967_v48 = vpop.f32.mrb[104].mxu1 }
 0x898   : > { %v6969_v2 = vpop.f32.mrb[105].mxu1 }
 0x899   : > { %v6973_v5 = vpop.f32.mrb[106].mxu1 }
 0x89a   : > { %v6975_v29 = vpop.f32.mrb[107].mxu1 }
 0x89f   : > { %v6979_v39 = vpop.f32.mrb[108].mxu1 }
 0x8a0   : > { %v6981_v30 = vpop.f32.mrb[109].mxu1 }
 0x8a1   : > { %v6985_v63 = vpop.f32.mrb[110].mxu1 }
 0x8a2   : > { %v6987_v62 = vpop.f32.mrb[111].mxu1 }
 0x8a7   : > { %v6991_v25 = vpop.f32.mrb[112].mxu1 }
 0x8a8   : > { %v6993_v8 = vpop.f32.mrb[113].mxu1 }
 0x8a9   : > { %v6997_v21 = vpop.f32.mrb[114].mxu1 }
 0x8aa   : > { %v6999_v59 = vpop.f32.mrb[115].mxu1 }
 0x8c0   : > { %v2204_v54 = vpop.xlane.xlu1 %2203 }
 0x8c1   : > { %v2298_v0 = vsub.f32 %v6811_v9, %v2204_v54  ;;  %v2299_v34 = vsub.f32 %v6813_v32, %v2204_v54 }
 0x8c2   : > { %v2207_v58 = vpop.xlane.xlu0 %2206 }
 0x8c3   : > { %v2362_v44 = vmul.f32 1.442695, %v2298_v0  ;;  %v2364_v45 = vmul.f32 1.442695, %v2299_v34  ;;  %v2300_v35 = vsub.f32 %v6817_v27, %v2207_v58  ;;  %v2301_v37 = vsub.f32 %v6819_v42, %v2207_v58 }
 0x8c5   : > { %5123 = vpow2.f32 %v2362_v44  ;;  %v2366_v31 = vmul.f32 1.442695, %v2300_v35  ;;  %v2368_v47 = vmul.f32 1.442695, %v2301_v37 }
 0x8c6   : > { %5125 = vpow2.f32 %v2364_v45 }
 0x8c7   : > { %5127 = vpow2.f32 %v2366_v31 }
 0x8c8   : > { %5129 = vpow2.f32 %v2368_v47  ;;  %v2210_v46 = vpop.xlane.xlu1 %2209 }
 0x8c9   : > { %v2302_v4 = vsub.f32 %v6823_v13, %v2210_v46  ;;  %v2303_v9 = vsub.f32 %v6825_v15, %v2210_v46 }
 0x8ca   : > { %v2213_v36 = vpop.xlane.xlu0 %2212 }
 0x8cb   : > { %v2370_v54 = vmul.f32 1.442695, %v2302_v4  ;;  %v2372_v32 = vmul.f32 1.442695, %v2303_v9  ;;  %v2304_v34 = vsub.f32 %v6829_v22, %v2213_v36  ;;  %v2305_v0 = vsub.f32 %v6831_v19, %v2213_v36 }
 0x8cd   : > { %5131 = vpow2.f32 %v2370_v54  ;;  %v2374_v27 = vmul.f32 1.442695, %v2304_v34  ;;  %v2376_v42 = vmul.f32 1.442695, %v2305_v0  ;;  %v8946_v54 = vmax.f32 %v6955_v56, %v6957_v43 }
 0x8ce   : > { %5133 = vpow2.f32 %v2372_v32 }
 0x8cf   : > { %v7011_v35 = vpop.eup %5123  ;;  %5135 = vpow2.f32 %v2374_v27 }
 0x8d0   : > { %v7013_v37 = vpop.eup %5125  ;;  %5137 = vpow2.f32 %v2376_v42  ;;  %v2216_v45 = vpop.xlane.xlu1 %2215 }
 0x8d1   : > { %v7015_v13 = vpop.eup %5127  ;;  %v2306_v46 = vsub.f32 %v6835_v53, %v2216_v45  ;;  %v2307_v4 = vsub.f32 %v6837_v6, %v2216_v45  ;;  %v2490_v36 = vadd.f32 %v7013_v37, %v7011_v35  ;;  %v8947_v45 = vmax.f32 %v6961_v14, %v6963_v38 }
 0x8d2   : > { %v7021_v15 = vpop.eup %5129  ;;  %v2219_v22 = vpop.xlane.xlu0 %2218 }
 0x8d3   : > { %v2378_v19 = vmul.f32 1.442695, %v2306_v46  ;;  %v2380_v47 = vmul.f32 1.442695, %v2307_v4  ;;  %v2308_v44 = vsub.f32 %v6841_v3, %v2219_v22  ;;  %v2309_v31 = vsub.f32 %v6843_v23, %v2219_v22  ;;  %2491 = vadd.xlane.f32.xlu1 %v2490_v36 }
 0x8d4   : > { %v2493_v58 = vadd.f32 %v7021_v15, %v7015_v13 }
 0x8d5   : > { %5139 = vpow2.f32 %v2378_v19  ;;  %v2382_v53 = vmul.f32 1.442695, %v2308_v44  ;;  %v2384_v9 = vmul.f32 1.442695, %v2309_v31  ;;  %v8948_v31 = vmax.f32 %v6967_v48, %v6969_v2 }
 0x8d6   : > { %5141 = vpow2.f32 %v2380_v47  ;;  %2494 = vadd.xlane.f32.xlu0 %v2493_v58 }
 0x8d7   : > { %v7027_v6 = vpop.eup %5131  ;;  %5143 = vpow2.f32 %v2382_v53  ;;  %2275 = vmax.xlane.f32.xlu1 %v8946_v54 }
 0x8d8   : > { %v7032_v32 = vpop.eup %5133  ;;  %5145 = vpow2.f32 %v2384_v9  ;;  %v2222_v3 = vpop.xlane.xlu1 %2221 }
 0x8d9   : > { %v7034_v23 = vpop.eup %5135  ;;  %v2310_v34 = vsub.f32 %v6847_v52, %v2222_v3  ;;  %v2311_v0 = vsub.f32 %v6849_v41, %v2222_v3  ;;  %v2496_v27 = vadd.f32 %v7032_v32, %v7027_v6 }
 0x8da   : > { %v7040_v42 = vpop.eup %5137  ;;  %2278 = vmax.xlane.f32.xlu0 %v8947_v45  ;;  %v2225_v46 = vpop.xlane.xlu0 %2224 }
 0x8db   : > { %v2386_v4 = vmul.f32 1.442695, %v2310_v34  ;;  %v2388_v36 = vmul.f32 1.442695, %v2311_v0  ;;  %v2312_v22 = vsub.f32 %v6853_v57, %v2225_v46  ;;  %v2313_v19 = vsub.f32 %v6855_v61, %v2225_v46  ;;  %2497 = vadd.xlane.f32.xlu1 %v2496_v27 }
 0x8dc   : > { %v2499_v52 = vadd.f32 %v7040_v42, %v7034_v23  ;;  %v8949_v34 = vmax.f32 %v6973_v5, %v6975_v29 }
 0x8dd   : > { %5147 = vpow2.f32 %v2386_v4  ;;  %v2390_v41 = vmul.f32 1.442695, %v2312_v22  ;;  %v2392_v47 = vmul.f32 1.442695, %v2313_v19  ;;  %v8950_v19 = vmax.f32 %v6979_v39, %v6981_v30 }
 0x8de   : > { %5149 = vpow2.f32 %v2388_v36  ;;  %2500 = vadd.xlane.f32.xlu0 %v2499_v52 }
 0x8df   : > { %v7049_v44 = vpop.eup %5139  ;;  %5151 = vpow2.f32 %v2390_v41  ;;  %2281 = vmax.xlane.f32.xlu1 %v8948_v31 }
 0x8e0   : > { %v7054_v58 = vpop.eup %5141  ;;  %5153 = vpow2.f32 %v2392_v47  ;;  %v2228_v57 = vpop.xlane.xlu1 %2227 }
 0x8e1   : > { %v7056_v61 = vpop.eup %5143  ;;  %v2314_v53 = vsub.f32 %v6859_v1, %v2228_v57  ;;  %v2315_v9 = vsub.f32 %v6861_v51, %v2228_v57  ;;  %v2502_v54 = vadd.f32 %v7054_v58, %v7049_v44 }
 0x8e2   : > { %v7062_v3 = vpop.eup %5145  ;;  %2284 = vmax.xlane.f32.xlu0 %v8949_v34  ;;  %v2231_v0 = vpop.xlane.xlu0 %2230 }
 0x8e3   : > { %v2394_v27 = vmul.f32 1.442695, %v2314_v53  ;;  %v2396_v45 = vmul.f32 1.442695, %v2315_v9  ;;  %v2316_v46 = vsub.f32 %v6865_v20, %v2231_v0  ;;  %v2317_v4 = vsub.f32 %v6867_v12, %v2231_v0  ;;  %2503 = vadd.xlane.f32.xlu1 %v2502_v54 }
 0x8e4   : > { %v2505_v1 = vadd.f32 %v7062_v3, %v7056_v61  ;;  %v8951_v53 = vmax.f32 %v6985_v63, %v6987_v62 }
 0x8e5   : > { %5155 = vpow2.f32 %v2394_v27  ;;  %v2398_v51 = vmul.f32 1.442695, %v2316_v46  ;;  %v2400_v36 = vmul.f32 1.442695, %v2317_v4  ;;  %v8952_v4 = vmax.f32 %v6991_v25, %v6993_v8 }
 0x8e6   : > { %5157 = vpow2.f32 %v2396_v45  ;;  %2506 = vadd.xlane.f32.xlu0 %v2505_v1 }
 0x8e7   : > { %v7071_v22 = vpop.eup %5147  ;;  %5159 = vpow2.f32 %v2398_v51  ;;  %2287 = vmax.xlane.f32.xlu1 %v8950_v19 }
 0x8e8   : > { %v7076_v52 = vpop.eup %5149  ;;  %5161 = vpow2.f32 %v2400_v36  ;;  %v2234_v20 = vpop.xlane.xlu1 %2233 }
 0x8e9   : > { %v7078_v12 = vpop.eup %5151  ;;  %v2318_v41 = vsub.f32 %v6871_v50, %v2234_v20  ;;  %v2319_v47 = vsub.f32 %v6873_v16, %v2234_v20  ;;  %v2508_v31 = vadd.f32 %v7076_v52, %v7071_v22 }
 0x8ea   : > { %v7084_v57 = vpop.eup %5153  ;;  %2290 = vmax.xlane.f32.xlu0 %v8951_v53  ;;  %v2237_v9 = vpop.xlane.xlu0 %2236 }
 0x8eb   : > { %v2402_v54 = vmul.f32 1.442695, %v2318_v41  ;;  %v2404_v34 = vmul.f32 1.442695, %v2319_v47  ;;  %v2320_v0 = vsub.f32 %v6877_v17, %v2237_v9  ;;  %v2321_v27 = vsub.f32 %v6879_v24, %v2237_v9  ;;  %2509 = vadd.xlane.f32.xlu1 %v2508_v31 }
 0x8ec   : > { %v2511_v50 = vadd.f32 %v7084_v57, %v7078_v12  ;;  %v8953_v41 = vmax.f32 %v6997_v21, %v6999_v59 }
 0x8ed   : > { %5163 = vpow2.f32 %v2402_v54  ;;  %v2406_v16 = vmul.f32 1.442695, %v2320_v0  ;;  %v2408_v45 = vmul.f32 1.442695, %v2321_v27 }
 0x8ee   : > { %5165 = vpow2.f32 %v2404_v34  ;;  %2512 = vadd.xlane.f32.xlu0 %v2511_v50 }
 0x8ef   : > { %v7093_v46 = vpop.eup %5155  ;;  %5167 = vpow2.f32 %v2406_v16  ;;  %2293 = vmax.xlane.f32.xlu1 %v8952_v4 }
 0x8f0   : > { %v7098_v1 = vpop.eup %5157  ;;  %5169 = vpow2.f32 %v2408_v45  ;;  %v2240_v17 = vpop.xlane.xlu1 %2239 }
 0x8f1   : > { %v7100_v24 = vpop.eup %5159  ;;  %v2322_v51 = vsub.f32 %v6883_v7, %v2240_v17  ;;  %v2323_v36 = vsub.f32 %v6885_v55, %v2240_v17  ;;  %v2514_v19 = vadd.f32 %v7098_v1, %v7093_v46 }
 0x8f2   : > { %v7106_v20 = vpop.eup %5161  ;;  %2296 = vmax.xlane.f32.xlu0 %v8953_v41  ;;  %v2243_v47 = vpop.xlane.xlu0 %2242 }
 0x8f3   : > { %v2410_v31 = vmul.f32 1.442695, %v2322_v51  ;;  %v2412_v53 = vmul.f32 1.442695, %v2323_v36  ;;  %v2324_v9 = vsub.f32 %v6889_v49, %v2243_v47  ;;  %v2325_v54 = vsub.f32 %v6891_v18, %v2243_v47  ;;  %2515 = vadd.xlane.f32.xlu1 %v2514_v19 }
 0x8f4   : > { %v2517_v7 = vadd.f32 %v7106_v20, %v7100_v24 }
 0x8f5   : > { %5171 = vpow2.f32 %v2410_v31  ;;  %v2414_v55 = vmul.f32 1.442695, %v2324_v9  ;;  %v2416_v34 = vmul.f32 1.442695, %v2325_v54 }
 0x8f6   : > { %5173 = vpow2.f32 %v2412_v53  ;;  %2518 = vadd.xlane.f32.xlu0 %v2517_v7 }
 0x8f7   : > { %v7115_v0 = vpop.eup %5163  ;;  %5175 = vpow2.f32 %v2414_v55 }
 0x8f8   : > { %v7117_v27 = vpop.eup %5165  ;;  %5177 = vpow2.f32 %v2416_v34  ;;  %v2246_v50 = vpop.xlane.xlu1 %2245 }
 0x8f9   : > { %v7119_v16 = vpop.eup %5167  ;;  %v2326_v49 = vsub.f32 %v6895_v11, %v2246_v50  ;;  %v2327_v18 = vsub.f32 %v6897_v60, %v2246_v50  ;;  %v2520_v45 = vadd.f32 %v7117_v27, %v7115_v0 }
 0x8fa   : > { %v7125_v4 = vpop.eup %5169  ;;  %v2249_v17 = vpop.xlane.xlu0 %2248 }
 0x8fb   : > { %v2418_v51 = vmul.f32 1.442695, %v2326_v49  ;;  %v2420_v36 = vmul.f32 1.442695, %v2327_v18  ;;  %v2328_v19 = vsub.f32 %v6901_v26, %v2249_v17  ;;  %v2329_v41 = vsub.f32 %v6903_v10, %v2249_v17  ;;  %2521 = vadd.xlane.f32.xlu1 %v2520_v45  ;;  %v8954_v45 = vld [vmem:[#allocation34_spill] sm:$0xff] }
 0x8fc   : > { %v2523_v47 = vadd.f32 %v7125_v4, %v7119_v16 }
 0x8fd   : > { %5179 = vpow2.f32 %v2418_v51  ;;  %v2422_v11 = vmul.f32 1.442695, %v2328_v19  ;;  %v2424_v31 = vmul.f32 1.442695, %v2329_v41 }
 0x8fe   : > { %5181 = vpow2.f32 %v2420_v36  ;;  %2524 = vadd.xlane.f32.xlu0 %v2523_v47 }
 0x8ff   : > { %v7131_v60 = vpop.eup %5171  ;;  %5183 = vpow2.f32 %v2422_v11 }
 0x900   : > { %v7133_v53 = vpop.eup %5173  ;;  %5185 = vpow2.f32 %v2424_v31  ;;  %v2252_v9 = vpop.xlane.xlu1 %2251  ;;  %v8958_v31 = vld [vmem:[#allocation37_spill] sm:$0xff] }
 0x901   : > { %v7135_v54 = vpop.eup %5175  ;;  %v2330_v10 = vsub.f32 %v6907_v40, %v2252_v9  ;;  %v2331_v26 = vsub.f32 %v6909_v28, %v2252_v9  ;;  %v2526_v7 = vadd.f32 %v7133_v53, %v7131_v60 }
 0x902   : > { %v7141_v55 = vpop.eup %5177  ;;  %v2255_v34 = vpop.xlane.xlu0 %2254 }
 0x903   : > { %v2426_v50 = vmul.f32 1.442695, %v2330_v10  ;;  %v2428_v49 = vmul.f32 1.442695, %v2331_v26  ;;  %v2332_v18 = vsub.f32 %v6913_v33, %v2255_v34  ;;  %v2333_v17 = vsub.f32 %v8954_v45, %v2255_v34  ;;  %2527 = vadd.xlane.f32.xlu1 %v2526_v7  ;;  %v8957_v33 = vld [vmem:[#allocation33_spill] sm:$0xff]  ;;  %v8961_v45 = vld [vmem:[#allocation38_spill] sm:$0xff] }
 0x904   : > { %v2529_v51 = vadd.f32 %v7141_v55, %v7135_v54 }
 0x905   : > { %5187 = vpow2.f32 %v2426_v50  ;;  %v2430_v40 = vmul.f32 1.442695, %v2332_v18  ;;  %v2432_v36 = vmul.f32 1.442695, %v2333_v17 }
 0x906   : > { %5189 = vpow2.f32 %v2428_v49  ;;  %2530 = vadd.xlane.f32.xlu0 %v2529_v51  ;;  %v8960_v49 = vld [vmem:[#allocation39_spill] sm:$0xff] }
 0x907   : > { %v7147_v28 = vpop.eup %5179  ;;  %5191 = vpow2.f32 %v2430_v40 }
 0x908   : > { %8955 = vst [vmem:[#allocation34_spill] sm:$0xff] %v7147_v28  ;;  %v7149_v19 = vpop.eup %5181  ;;  %5193 = vpow2.f32 %v2432_v36  ;;  %v2258_v41 = vpop.xlane.xlu1 %2257 }
 0x909   : > { %v7151_v47 = vpop.eup %5183  ;;  %v2334_v11 = vsub.f32 %v8957_v33, %v2258_v41  ;;  %v2335_v9 = vsub.f32 %v8958_v31, %v2258_v41  ;;  %v2532_v10 = vadd.f32 %v7149_v19, %v7147_v28  ;;  %v8969_v28 = vld [vmem:[#allocation52_spill] sm:$0xff] }
 0x90a   : > { %8956 = vst [vmem:[#allocation57_spill] sm:$0xff] %v7151_v47  ;;  %v7157_v26 = vpop.eup %5185  ;;  %v2261_v7 = vpop.xlane.xlu0 %2260 }
 0x90b   : > { %8959 = vst [vmem:[#allocation33_spill] sm:$0xff] %v7157_v26  ;;  %v2434_v34 = vmul.f32 1.442695, %v2334_v11  ;;  %v2436_v50 = vmul.f32 1.442695, %v2335_v9  ;;  %v2336_v18 = vsub.f32 %v8960_v49, %v2261_v7  ;;  %v2337_v17 = vsub.f32 %v8961_v45, %v2261_v7  ;;  %2533 = vadd.xlane.f32.xlu1 %v2532_v10  ;;  %v8965_v9 = vld [vmem:[#allocation36_spill] sm:$0xff] }
 0x90c   : > { %v2535_v51 = vadd.f32 %v7157_v26, %v7151_v47  ;;  %v8966_v10 = vld [vmem:[#allocation50_spill] sm:$0xff] }
 0x90d   : > { %5195 = vpow2.f32 %v2434_v34  ;;  %v2438_v40 = vmul.f32 1.442695, %v2336_v18  ;;  %v2440_v36 = vmul.f32 1.442695, %v2337_v17 }
 0x90e   : > { %5197 = vpow2.f32 %v2436_v50  ;;  %2536 = vadd.xlane.f32.xlu0 %v2535_v51  ;;  %v8968_v51 = vld [vmem:[#allocation51_spill] sm:$0xff] }
 0x90f   : > { %v7163_v41 = vpop.eup %5187  ;;  %5199 = vpow2.f32 %v2438_v40 }
 0x910   : > { %8962 = vst [vmem:[#allocation37_spill] sm:$0xff] %v7163_v41  ;;  %v7165_v33 = vpop.eup %5189  ;;  %5201 = vpow2.f32 %v2440_v36  ;;  %v2264_v11 = vpop.xlane.xlu1 %2263 }
 0x911   : > { %8963 = vst [vmem:[#allocation39_spill] sm:$0xff] %v7165_v33  ;;  %v7167_v31 = vpop.eup %5191  ;;  %v2338_v7 = vsub.f32 %v8965_v9, %v2264_v11  ;;  %v2339_v49 = vsub.f32 %v8966_v10, %v2264_v11  ;;  %v2538_v34 = vadd.f32 %v7165_v33, %v7163_v41  ;;  %v8972_v41 = vld [vmem:[#allocation55_spill] sm:$0xff] }
 0x912   : > { %8964 = vst [vmem:[#allocation38_spill] sm:$0xff] %v7167_v31  ;;  %v7173_v18 = vpop.eup %5193  ;;  %v2267_v50 = vpop.xlane.xlu0 %2266 }
 0x913   : > { %8967 = vst [vmem:[#allocation36_spill] sm:$0xff] %v7173_v18  ;;  %v2442_v45 = vmul.f32 1.442695, %v2338_v7  ;;  %v2444_v17 = vmul.f32 1.442695, %v2339_v49  ;;  %v2340_v40 = vsub.f32 %v8968_v51, %v2267_v50  ;;  %v2341_v47 = vsub.f32 %v8969_v28, %v2267_v50  ;;  %2539 = vadd.xlane.f32.xlu1 %v2538_v34  ;;  %v8970_v51 = vld [vmem:[#allocation53_spill] sm:$0xff] }
 0x914   : > { %v2541_v36 = vadd.f32 %v7173_v18, %v7167_v31  ;;  %v8971_v34 = vld [vmem:[#allocation54_spill] sm:$0xff]  ;;  %v8973_v31 = vld [vmem:[#allocation56_spill] sm:$0xff] }
 0x915   : > { %5203 = vpow2.f32 %v2442_v45  ;;  %v2446_v9 = vmul.f32 1.442695, %v2340_v40  ;;  %v2448_v26 = vmul.f32 1.442695, %v2341_v47 }
 0x916   : > { %5205 = vpow2.f32 %v2444_v17  ;;  %2542 = vadd.xlane.f32.xlu0 %v2541_v36 }
 0x917   : > { %v7179_v11 = vpop.eup %5195  ;;  %5207 = vpow2.f32 %v2446_v9 }
 0x918   : > { %v7181_v10 = vpop.eup %5197  ;;  %5209 = vpow2.f32 %v2448_v26  ;;  %v2270_v7 = vpop.xlane.xlu1 %2269 }
 0x919   : > { %v7183_v49 = vpop.eup %5199  ;;  %v2342_v28 = vsub.f32 %v8970_v51, %v2270_v7  ;;  %v2343_v50 = vsub.f32 %v8971_v34, %v2270_v7  ;;  %v2544_v45 = vadd.f32 %v7181_v10, %v7179_v11 }
 0x91a   : > { %v7189_v40 = vpop.eup %5201  ;;  %v2273_v47 = vpop.xlane.xlu0 %2272 }
 0x91b   : > { %v2450_v17 = vmul.f32 1.442695, %v2342_v28  ;;  %v2452_v36 = vmul.f32 1.442695, %v2343_v50  ;;  %v2344_v9 = vsub.f32 %v8972_v41, %v2273_v47  ;;  %v2345_v18 = vsub.f32 %v8973_v31, %v2273_v47  ;;  %2545 = vadd.xlane.f32.xlu1 %v2544_v45 }
 0x91c   : > { %v2547_v26 = vadd.f32 %v7189_v40, %v7183_v49 }
 0x91d   : > { %5211 = vpow2.f32 %v2450_v17  ;;  %v2454_v51 = vmul.f32 1.442695, %v2344_v9  ;;  %v2456_v33 = vmul.f32 1.442695, %v2345_v18 }
 0x91e   : > { %5213 = vpow2.f32 %v2452_v36  ;;  %2548 = vadd.xlane.f32.xlu0 %v2547_v26 }
 0x91f   : > { %v7195_v7 = vpop.eup %5203  ;;  %5215 = vpow2.f32 %v2454_v51 }
 0x920   : > { %8974 = vst [vmem:[#allocation50_spill] sm:$0xff] %v7195_v7  ;;  %v7197_v34 = vpop.eup %5205  ;;  %5217 = vpow2.f32 %v2456_v33 }
 0x921   : > { %v7199_v28 = vpop.eup %5207  ;;  %v2550_v41 = vadd.f32 %v7197_v34, %v7195_v7 }
 0x922   : > { %8975 = vst [vmem:[#allocation51_spill] sm:$0xff] %v7199_v28  ;;  %v7203_v31 = vpop.eup %5209 }
 0x923   : > { %8976 = vst [vmem:[#allocation52_spill] sm:$0xff] %v7203_v31  ;;  %2551 = vadd.xlane.f32.xlu1 %v2550_v41  ;;  %v2553_v50 = vadd.f32 %v7203_v31, %v7199_v28 }
 0x925   : > { %2554 = vadd.xlane.f32.xlu0 %v2553_v50 }
 0x927   : > { %v7207_v18 = vpop.eup %5211 }
 0x928   : > { %8977 = vst [vmem:[#allocation53_spill] sm:$0xff] %v7207_v18  ;;  %v7209_v45 = vpop.eup %5213 }
 0x929   : > { %8978 = vst [vmem:[#allocation54_spill] sm:$0xff] %v7209_v45  ;;  %v7211_v47 = vpop.eup %5215  ;;  %v2556_v33 = vadd.f32 %v7209_v45, %v7207_v18 }
 0x92a   : > { %8979 = vst [vmem:[#allocation55_spill] sm:$0xff] %v7211_v47  ;;  %v7215_v17 = vpop.eup %5217 }
 0x92b   : > { %8980 = vst [vmem:[#allocation56_spill] sm:$0xff] %v7215_v17  ;;  %2557 = vadd.xlane.f32.xlu1 %v2556_v33  ;;  %v2559_v36 = vadd.f32 %v7215_v17, %v7211_v47 }
 0x92d   : > { %2560 = vadd.xlane.f32.xlu0 %v2559_v36 }
 0x960   : > { %v2492_v9 = vpop.xlane.xlu1 %2491 }
 0x961   : > { %5219 = vrcp.f32 %v2492_v9 }
 0x963   : > { %v2495_v26 = vpop.xlane.xlu0 %2494 }
 0x964   : > { %5221 = vrcp.f32 %v2495_v26  ;;  %v2276_v51 = vpop.xlane.xlu1 %2275 }
 0x965   : > { %v2346_v41 = vsub.f32 %v6955_v56, %v2276_v51  ;;  %v2347_v50 = vsub.f32 %v6957_v43, %v2276_v51 }
 0x967   : > { %v2458_v7 = vmul.f32 1.442695, %v2346_v41  ;;  %v2460_v28 = vmul.f32 1.442695, %v2347_v50  ;;  %v2279_v31 = vpop.xlane.xlu0 %2278 }
 0x968   : > { %v2348_v18 = vsub.f32 %v6961_v14, %v2279_v31  ;;  %v2349_v33 = vsub.f32 %v6963_v38, %v2279_v31  ;;  %v2498_v45 = vpop.xlane.xlu1 %2497 }
 0x969   : > { %5223 = vpow2.f32 %v2458_v7 }
 0x96a   : > { %5225 = vpow2.f32 %v2460_v28  ;;  %v2462_v36 = vmul.f32 1.442695, %v2348_v18  ;;  %v2464_v47 = vmul.f32 1.442695, %v2349_v33 }
 0x96b   : > { %v5220_v9 = vpop.eup %5219  ;;  %5227 = vrcp.f32 %v2498_v45  ;;  %v2501_v26 = vpop.xlane.xlu0 %2500 }
 0x96c   : > { %5229 = vpow2.f32 %v2462_v36  ;;  %v2282_v17 = vpop.xlane.xlu1 %2281  ;;  %v2619_v14 = vmul.f32 %v5220_v9, %v7013_v37  ;;  %v2618_v38 = vmul.f32 %v5220_v9, %v7011_v35 }
 0x96d   : > { %5231 = vpow2.f32 %v2464_v47  ;;  %v2350_v56 = vsub.f32 %v6967_v48, %v2282_v17  ;;  %v2351_v43 = vsub.f32 %v6969_v2, %v2282_v17 }
 0x96e   : > { %v5222_v51 = vpop.eup %5221  ;;  %5233 = vrcp.f32 %v2501_v26 }
 0x96f   : > { %v2466_v7 = vmul.f32 1.442695, %v2350_v56  ;;  %v2468_v28 = vmul.f32 1.442695, %v2351_v43  ;;  %v2285_v31 = vpop.xlane.xlu0 %2284  ;;  %v2621_v18 = vmul.f32 %v5222_v51, %v7021_v15  ;;  %v2620_v45 = vmul.f32 %v5222_v51, %v7015_v13 }
 0x970   : > { %v2352_v41 = vsub.f32 %v6973_v5, %v2285_v31  ;;  %v2353_v47 = vsub.f32 %v6975_v29, %v2285_v31  ;;  %v2504_v48 = vpop.xlane.xlu1 %2503 }
 0x971   : > { %5235 = vpow2.f32 %v2466_v7  ;;  %v2683_v2 = vpack.c.bf16 %v2621_v18, %v2619_v14  ;;  %v2682_v17 = vpack.c.bf16 %v2620_v45, %v2618_v38 }
 0x972   : > { %5237 = vpow2.f32 %v2468_v28  ;;  %v2470_v50 = vmul.f32 1.442695, %v2352_v41  ;;  %v2472_v37 = vmul.f32 1.442695, %v2353_v47 }
 0x973   : > { %v7231_v33 = vpop.eup %5223  ;;  %5239 = vrcp.f32 %v2504_v48  ;;  %2714 = vmatprep.subr.bf16.mxu0 %v2683_v2  ;;  %v2507_v35 = vpop.xlane.xlu0 %2506 }
 0x974   : > { %v7233_v36 = vpop.eup %5225  ;;  %5241 = vpow2.f32 %v2470_v50  ;;  %2715 = vmatpush1.bf16.xpose.msra.mxu0 %v2682_v17  ;;  %v2288_v13 = vpop.xlane.xlu1 %2287 }
 0x975   : > { %v5228_v5 = vpop.eup %5227  ;;  %5243 = vpow2.f32 %v2472_v37  ;;  %v2354_v29 = vsub.f32 %v6979_v39, %v2288_v13  ;;  %v2355_v15 = vsub.f32 %v6981_v30, %v2288_v13  ;;  %v2562_v9 = vadd.f32 %v7233_v36, %v7231_v33 }
 0x976   : > { %v7239_v26 = vpop.eup %5229  ;;  %5245 = vrcp.f32 %v2507_v35  ;;  %v2623_v31 = vmul.f32 %v5228_v5, %v7032_v32  ;;  %v2622_v45 = vmul.f32 %v5228_v5, %v7027_v6 }
 0x977   : > { %v7241_v56 = vpop.eup %5231  ;;  %v2474_v43 = vmul.f32 1.442695, %v2354_v29  ;;  %v2476_v51 = vmul.f32 1.442695, %v2355_v15  ;;  %v2291_v14 = vpop.xlane.xlu0 %2290  ;;  %2563 = vadd.xlane.f32.xlu1 %v2562_v9 }
 0x978   : > { %v5234_v38 = vpop.eup %5233  ;;  %v2356_v7 = vsub.f32 %v6985_v63, %v2291_v14  ;;  %v2357_v28 = vsub.f32 %v6987_v62, %v2291_v14  ;;  %v2510_v39 = vpop.xlane.xlu1 %2509  ;;  %v2565_v30 = vadd.f32 %v7241_v56, %v7239_v26 }
 0x979   : > { %5247 = vpow2.f32 %v2474_v43  ;;  %v2625_v18 = vmul.f32 %v5234_v38, %v7040_v42  ;;  %v2624_v41 = vmul.f32 %v5234_v38, %v7034_v23 }
 0x97a   : > { %5249 = vpow2.f32 %v2476_v51  ;;  %v2478_v47 = vmul.f32 1.442695, %v2356_v7  ;;  %v2480_v48 = vmul.f32 1.442695, %v2357_v28  ;;  %2566 = vadd.xlane.f32.xlu0 %v2565_v30 }
 0x97b   : > { %v7251_v63 = vpop.eup %5235  ;;  %5251 = vrcp.f32 %v2510_v39  ;;  %v2685_v62 = vpack.c.bf16 %v2625_v18, %v2623_v31  ;;  %v2513_v2 = vpop.xlane.xlu0 %2512  ;;  %v2684_v17 = vpack.c.bf16 %v2624_v41, %v2622_v45 }
 0x97c   : > { %v7253_v50 = vpop.eup %5237  ;;  %5253 = vpow2.f32 %v2478_v47  ;;  %v2294_v32 = vpop.xlane.xlu1 %2293 }
 0x97d   : > { %v5240_v37 = vpop.eup %5239  ;;  %5255 = vpow2.f32 %v2480_v48  ;;  %2716 = vmatprep.subr.bf16.mxu0 %v2685_v62  ;;  %v2358_v6 = vsub.f32 %v6991_v25, %v2294_v32  ;;  %v2359_v23 = vsub.f32 %v6993_v8, %v2294_v32  ;;  %v2568_v42 = vadd.f32 %v7253_v50, %v7251_v63 }
 0x97e   : > { %v7259_v35 = vpop.eup %5241  ;;  %5257 = vrcp.f32 %v2513_v2  ;;  %2717 = vmatpush1.bf16.xpose.msra.mxu0 %v2684_v17  ;;  %v2627_v14 = vmul.f32 %v5240_v37, %v7054_v58  ;;  %v2626_v7 = vmul.f32 %v5240_v37, %v7049_v44 }
 0x97f   : > { %v7261_v13 = vpop.eup %5243  ;;  %v2482_v5 = vmul.f32 1.442695, %v2358_v6  ;;  %v2484_v29 = vmul.f32 1.442695, %v2359_v23  ;;  %2569 = vadd.xlane.f32.xlu1 %v2568_v42  ;;  %v2297_v15 = vpop.xlane.xlu0 %2296 }
 0x980   : > { %v5246_v9 = vpop.eup %5245  ;;  %v2360_v43 = vsub.f32 %v6997_v21, %v2297_v15  ;;  %v2361_v25 = vsub.f32 %v6999_v59, %v2297_v15  ;;  %v2516_v51 = vpop.xlane.xlu1 %2515  ;;  %v2571_v8 = vadd.f32 %v7261_v13, %v7259_v35 }
 0x981   : > { %5259 = vpow2.f32 %v2482_v5  ;;  %v2629_v38 = vmul.f32 %v5246_v9, %v7062_v3  ;;  %v2628_v28 = vmul.f32 %v5246_v9, %v7056_v61 }
 0x982   : > { %5261 = vpow2.f32 %v2484_v29  ;;  %v2486_v39 = vmul.f32 1.442695, %v2360_v43  ;;  %v2488_v30 = vmul.f32 1.442695, %v2361_v25  ;;  %2572 = vadd.xlane.f32.xlu0 %v2571_v8 }
 0x983   : > { %v7271_v21 = vpop.eup %5247  ;;  %5263 = vrcp.f32 %v2516_v51  ;;  %v2687_v59 = vpack.c.bf16 %v2629_v38, %v2627_v14  ;;  %v2519_v31 = vpop.xlane.xlu0 %2518  ;;  %v2686_v18 = vpack.c.bf16 %v2628_v28, %v2626_v7 }
 0x984   : > { %v7273_v45 = vpop.eup %5249  ;;  %5265 = vpow2.f32 %v2486_v39 }
 0x985   : > { %v5252_v58 = vpop.eup %5251  ;;  %5267 = vpow2.f32 %v2488_v30  ;;  %2718 = vmatprep.subr.bf16.mxu0 %v2687_v59  ;;  %v2574_v44 = vadd.f32 %v7273_v45, %v7271_v21 }
 0x986   : > { %v7277_v61 = vpop.eup %5253  ;;  %5269 = vrcp.f32 %v2519_v31  ;;  %2719 = vmatpush1.bf16.xpose.msra.mxu0 %v2686_v18  ;;  %v2631_v62 = vmul.f32 %v5252_v58, %v7076_v52  ;;  %v2630_v17 = vmul.f32 %v5252_v58, %v7071_v22 }
 0x987   : > { %v7279_v3 = vpop.eup %5255  ;;  %2575 = vadd.xlane.f32.xlu1 %v2574_v44 }
 0x988   : > { %v5258_v41 = vpop.eup %5257  ;;  %v2522_v47 = vpop.xlane.xlu1 %2521  ;;  %v2577_v48 = vadd.f32 %v7279_v3, %v7277_v61 }
 0x989   : > { %v2633_v2 = vmul.f32 %v5258_v41, %v7084_v57  ;;  %v2632_v32 = vmul.f32 %v5258_v41, %v7078_v12  ;;  %5271 = vrcp.f32 %v2522_v47 }
 0x98a   : > { %2578 = vadd.xlane.f32.xlu0 %v2577_v48 }
 0x98b   : > { %v7287_v37 = vpop.eup %5259  ;;  %v2689_v6 = vpack.c.bf16 %v2633_v2, %v2631_v62  ;;  %v2525_v23 = vpop.xlane.xlu0 %2524  ;;  %v2688_v42 = vpack.c.bf16 %v2632_v32, %v2630_v17 }
 0x98c   : > { %v7289_v5 = vpop.eup %5261  ;;  %5273 = vrcp.f32 %v2525_v23  ;;  %v8982_v23 = vld [vmem:[#allocation57_spill] sm:$0xff] }
 0x98d   : > { %v5264_v29 = vpop.eup %5263  ;;  %2720 = vmatprep.subr.bf16.mxu0 %v2689_v6  ;;  %v2580_v52 = vadd.f32 %v7289_v5, %v7287_v37  ;;  %v8981_v6 = vld [vmem:[#allocation33_spill] sm:$0xff] }
 0x98e   : > { %v7293_v57 = vpop.eup %5265  ;;  %2721 = vmatpush1.bf16.xpose.msra.mxu0 %v2688_v42  ;;  %v2635_v43 = vmul.f32 %v5264_v29, %v7098_v1  ;;  %v2634_v51 = vmul.f32 %v5264_v29, %v7093_v46 }
 0x98f   : > { %v7295_v22 = vpop.eup %5267  ;;  %2581 = vadd.xlane.f32.xlu1 %v2580_v52 }
 0x990   : > { %v5270_v12 = vpop.eup %5269  ;;  %v2528_v15 = vpop.xlane.xlu1 %2527  ;;  %v2583_v9 = vadd.f32 %v7295_v22, %v7293_v57 }
 0x991   : > { %v2637_v25 = vmul.f32 %v5270_v12, %v7106_v20  ;;  %v2636_v8 = vmul.f32 %v5270_v12, %v7100_v24  ;;  %5275 = vrcp.f32 %v2528_v15 }
 0x992   : > { %2584 = vadd.xlane.f32.xlu0 %v2583_v9 }
 0x993   : > { %v2691_v14 = vpack.c.bf16 %v2637_v25, %v2635_v43  ;;  %v2531_v38 = vpop.xlane.xlu0 %2530  ;;  %v2690_v7 = vpack.c.bf16 %v2636_v8, %v2634_v51  ;;  %v5272_v28 = vpop.eup %5271  ;;  %v8984_v43 = vld [vmem:[#allocation39_spill] sm:$0xff]  ;;  %v8985_v51 = vld [vmem:[#allocation36_spill] sm:$0xff]  ;;  %v8986_v8 = vld [vmem:[#allocation38_spill] sm:$0xff] }
 0x994   : > { %5277 = vrcp.f32 %v2531_v38  ;;  %v2639_v30 = vmul.f32 %v5272_v28, %v7117_v27  ;;  %v2638_v46 = vmul.f32 %v5272_v28, %v7115_v0 }
 0x995   : > { %2722 = vmatprep.subr.bf16.mxu0 %v2691_v14 }
 0x996   : > { %v5274_v39 = vpop.eup %5273  ;;  %2723 = vmatpush1.bf16.xpose.msra.mxu0 %v2690_v7  ;;  %v8987_v7 = vld [vmem:[#allocation37_spill] sm:$0xff] }
 0x997   : > { %v2641_v1 = vmul.f32 %v5274_v39, %v7125_v4  ;;  %v2640_v20 = vmul.f32 %v5274_v39, %v7119_v16 }
 0x998   : > { %v2534_v59 = vpop.xlane.xlu1 %2533 }
 0x999   : > { %v2693_v24 = vpack.c.bf16 %v2641_v1, %v2639_v30  ;;  %5279 = vrcp.f32 %v2534_v59  ;;  %v2692_v31 = vpack.c.bf16 %v2640_v20, %v2638_v46 }
 0x99b   : > { %2724 = vmatprep.subr.bf16.mxu0 %v2693_v24  ;;  %v2537_v18 = vpop.xlane.xlu0 %2536  ;;  %v5276_v58 = vpop.eup %5275 }
 0x99c   : > { %5281 = vrcp.f32 %v2537_v18  ;;  %v2643_v41 = vmul.f32 %v5276_v58, %v7133_v53  ;;  %v2642_v16 = vmul.f32 %v5276_v58, %v7131_v60 }
 0x99e   : > { %v5278_v44 = vpop.eup %5277  ;;  %2725 = vmatpush1.bf16.xpose.msra.mxu0 %v2692_v31 }
 0x99f   : > { %v2645_v27 = vmul.f32 %v5278_v44, %v7141_v55  ;;  %v2644_v4 = vmul.f32 %v5278_v44, %v7135_v54  ;;  %v8983_v54 = vld [vmem:[#allocation34_spill] sm:$0xff] }
 0x9a0   : > { %v2540_v47 = vpop.xlane.xlu1 %2539 }
 0x9a1   : > { %v2695_v48 = vpack.c.bf16 %v2645_v27, %v2643_v41  ;;  %5283 = vrcp.f32 %v2540_v47  ;;  %v2694_v0 = vpack.c.bf16 %v2644_v4, %v2642_v16  ;;  %v8988_v47 = vld [vmem:[#allocation22_spill] sm:$0xff]  ;;  %v8989_v16 = vld [vmem:[#allocation20_spill] sm:$0xff] }
 0x9a3   : > { %2726 = vmatprep.subr.bf16.mxu0 %v2695_v48  ;;  %v2543_v62 = vpop.xlane.xlu0 %2542  ;;  %v5280_v2 = vpop.eup %5279  ;;  %v8990_v48 = vpack.c.bf16 %v8988_v47, %v8989_v16 }
 0x9a4   : > { %5285 = vrcp.f32 %v2543_v62  ;;  %v2647_v32 = vmul.f32 %v5280_v2, %v7149_v19  ;;  %v2646_v29 = vmul.f32 %v5280_v2, %v8983_v54  ;;  %v8992_v62 = vld [vmem:[#allocation51_spill] sm:$0xff] }
 0x9a6   : > { %v5282_v17 = vpop.eup %5281  ;;  %2727 = vmatpush1.bf16.xpose.msra.mxu0 %v2694_v0 }
 0x9a7   : > { %v2649_v53 = vmul.f32 %v5282_v17, %v8981_v6  ;;  %v2648_v55 = vmul.f32 %v5282_v17, %v8982_v23  ;;  %v8994_v17 = vld [vmem:[#allocation21_spill] sm:$0xff] }
 0x9a8   : > { %v2546_v42 = vpop.xlane.xlu1 %2545 }
 0x9a9   : > { %v2697_v52 = vpack.c.bf16 %v2649_v53, %v2647_v32  ;;  %5287 = vrcp.f32 %v2546_v42  ;;  %v2696_v60 = vpack.c.bf16 %v2648_v55, %v2646_v29  ;;  %v8996_v53 = vld [vmem:[#allocation50_spill] sm:$0xff] }
 0x9aa   : > { %v8997_v29 = vld [vmem:[#allocation54_spill] sm:$0xff] }
 0x9ab   : > { %2728 = vmatprep.subr.bf16.mxu0 %v2697_v52  ;;  %v2549_v12 = vpop.xlane.xlu0 %2548  ;;  %v5284_v15 = vpop.eup %5283 }
 0x9ac   : > { %5289 = vrcp.f32 %v2549_v12  ;;  %v2651_v25 = vmul.f32 %v5284_v15, %v8984_v43  ;;  %v2650_v28 = vmul.f32 %v5284_v15, %v8987_v7  ;;  %v8999_v12 = vld [vmem:[#allocation55_spill] sm:$0xff]  ;;  %v9000_v43 = vld [vmem:[#allocation53_spill] sm:$0xff] }
 0x9ae   : > { %v5286_v9 = vpop.eup %5285  ;;  %2729 = vmatpush1.bf16.xpose.msra.mxu0 %v2696_v60  ;;  %v8998_v60 = vld [vmem:[#allocation56_spill] sm:$0xff] }
 0x9af   : > { %v2653_v19 = vmul.f32 %v5286_v9, %v8985_v51  ;;  %v2652_v14 = vmul.f32 %v5286_v9, %v8986_v8 }
 0x9b0   : > { %v2552_v38 = vpop.xlane.xlu1 %2551 }
 0x9b1   : > { %5291 = vrcp.f32 %v2552_v38  ;;  %v2699_v39 = vpack.c.bf16 %v2653_v19, %v2651_v25  ;;  %v2698_v1 = vpack.c.bf16 %v2652_v14, %v2650_v28 }
 0x9b2   : > { %v2555_v30 = vpop.xlane.xlu0 %2554 }
 0x9b3   : > { %2730 = vmatprep.subr.bf16.mxu0 %v2699_v39  ;;  %5293 = vrcp.f32 %v2555_v30  ;;  %v5288_v20 = vpop.eup %5287 }
 0x9b4   : > { %v2655_v46 = vmul.f32 %v5288_v20, %v7181_v10  ;;  %v2654_v58 = vmul.f32 %v5288_v20, %v7179_v11  ;;  %v8993_v11 = vld [vmem:[#allocation23_spill] sm:$0xff] }
 0x9b5   : > { %v8995_v32 = vpack.c.bf16 %v8993_v11, %v8994_v17 }
 0x9b6   : > { %v5290_v59 = vpop.eup %5289  ;;  %2731 = vmatpush1.bf16.xpose.msra.mxu0 %v2698_v1 }
 0x9b7   : > { %v2657_v24 = vmul.f32 %v5290_v59, %v7189_v40  ;;  %v2656_v31 = vmul.f32 %v5290_v59, %v7183_v49  ;;  %v8991_v40 = vld [vmem:[#allocation52_spill] sm:$0xff] }
 0x9b8   : > { %v2558_v18 = vpop.xlane.xlu1 %2557 }
 0x9b9   : > { %5295 = vrcp.f32 %v2558_v18  ;;  %v2701_v44 = vpack.c.bf16 %v2657_v24, %v2655_v46  ;;  %v2700_v27 = vpack.c.bf16 %v2656_v31, %v2654_v58 }
 0x9ba   : > { %v2561_v41 = vpop.xlane.xlu0 %2560 }
 0x9bb   : > { %v5292_v4 = vpop.eup %5291  ;;  %2732 = vmatprep.subr.bf16.mxu0 %v2701_v44  ;;  %5297 = vrcp.f32 %v2561_v41 }
 0x9bc   : > { %2767 = vxpose.xlu1.c.b16.start.end [1/1] (short) %v8990_v48, 128  ;;  %v2659_v10 = vmul.f32 %v5292_v4, %v7197_v34  ;;  %v2658_v23 = vmul.f32 %v5292_v4, %v8996_v53 }
 0x9bd   : > { %v5294_v0 = vpop.eup %5293 }
 0x9be   : > { %2733 = vmatpush1.bf16.xpose.msra.mxu0 %v2700_v27  ;;  %v2661_v49 = vmul.f32 %v5294_v0, %v8991_v40  ;;  %v2660_v2 = vmul.f32 %v5294_v0, %v8992_v62 }
 0x9bf   : > { %2783 = vxpose.xlu0.c.b16.start.end [1/1] (short) %v8995_v32, 128  ;;  %v9004_v32 = vld [vmem:[#allocation42_spill] sm:$0xff] }
 0x9c0   : > { %v2703_v6 = vpack.c.bf16 %v2661_v49, %v2659_v10  ;;  %v2702_v55 = vpack.c.bf16 %v2660_v2, %v2658_v23  ;;  %v9007_v23 = vld [vmem:[#allocation45_spill] sm:$0xff] }
 0x9c2   : > { %2734 = vmatprep.subr.bf16.mxu0 %v2703_v6  ;;  %v9005_v6 = vld [vmem:[#allocation28_spill] sm:$0xff] }
 0x9c3   : > { %v5296_v42 = vpop.eup %5295  ;;  %v9006_v53 = vpack.c.bf16 %v9004_v32, %v9005_v6 }
 0x9c4   : > { %v2663_v52 = vmul.f32 %v5296_v42, %v8997_v29  ;;  %v2662_v25 = vmul.f32 %v5296_v42, %v9000_v43 }
 0x9c5   : > { %v5298_v54 = vpop.eup %5297 }
 0x9c6   : > { %2735 = vmatpush1.bf16.xpose.msra.mxu0 %v2702_v55  ;;  %v2665_v34 = vmul.f32 %v5298_v54, %v8998_v60  ;;  %v2664_v15 = vmul.f32 %v5298_v54, %v8999_v12 }
 0x9c8   : > { %v2705_v9 = vpack.c.bf16 %v2665_v34, %v2663_v52  ;;  %v2704_v51 = vpack.c.bf16 %v2664_v15, %v2662_v25 }
 0x9ca   : > { %2736 = vmatprep.subr.bf16.mxu0 %v2705_v9 }
 0x9ce   : > { %2737 = vmatpush1.bf16.xpose.msra.mxu0 %v2704_v51 }
 0xa04   : > { %v2564_v19 = vpop.xlane.xlu1 %2563 }
 0xa05   : > { %5299 = vrcp.f32 %v2564_v19 }
 0xa07   : > { %v2567_v8 = vpop.xlane.xlu0 %2566 }
 0xa08   : > { %5301 = vrcp.f32 %v2567_v8 }
 0xa0c   : > { %v2570_v14 = vpop.xlane.xlu1 %2569 }
 0xa0d   : > { %5303 = vrcp.f32 %v2570_v14  ;;  %v9011_v14 = vld [vmem:[#allocation18_spill] sm:$0xff] }
 0xa0f   : > { %v2573_v38 = vpop.xlane.xlu0 %2572  ;;  %v5300_v7 = vpop.eup %5299 }
 0xa10   : > { %5305 = vrcp.f32 %v2573_v38  ;;  %v2667_v39 = vmul.f32 %v5300_v7, %v7233_v36  ;;  %v2666_v1 = vmul.f32 %v5300_v7, %v7231_v33  ;;  %v9012_v38 = vld [vmem:[#allocation31_spill] sm:$0xff] }
 0xa11   : > { %v9013_v7 = vpack.c.bf16 %v9011_v14, %v9012_v38 }
 0xa12   : > { %v5302_v28 = vpop.eup %5301 }
 0xa13   : > { %v2669_v30 = vmul.f32 %v5302_v28, %v7241_v56  ;;  %v2668_v20 = vmul.f32 %v5302_v28, %v7239_v26 }
 0xa14   : > { %v2576_v59 = vpop.xlane.xlu1 %2575 }
 0xa15   : > { %v2707_v46 = vpack.c.bf16 %v2669_v30, %v2667_v39  ;;  %v2706_v24 = vpack.c.bf16 %v2668_v20, %v2666_v1  ;;  %5307 = vrcp.f32 %v2576_v59 }
 0xa17   : > { %2738 = vmatprep.subr.bf16.mxu0 %v2707_v46  ;;  %v2579_v31 = vpop.xlane.xlu0 %2578  ;;  %v5304_v18 = vpop.eup %5303 }
 0xa18   : > { %5309 = vrcp.f32 %v2579_v31  ;;  %2739 = vmatpush1.bf16.xpose.msra.mxu0 %v2706_v24  ;;  %v2671_v44 = vmul.f32 %v5304_v18, %v7253_v50  ;;  %v2670_v56 = vmul.f32 %v5304_v18, %v7251_v63 }
 0xa1a   : > { %v5306_v58 = vpop.eup %5305 }
 0xa1b   : > { %v2673_v36 = vmul.f32 %v5306_v58, %v7261_v13  ;;  %v2672_v33 = vmul.f32 %v5306_v58, %v7259_v35 }
 0xa1c   : > { %v2582_v41 = vpop.xlane.xlu1 %2581 }
 0xa1d   : > { %v2709_v26 = vpack.c.bf16 %v2673_v36, %v2671_v44  ;;  %v2708_v27 = vpack.c.bf16 %v2672_v33, %v2670_v56  ;;  %5311 = vrcp.f32 %v2582_v41 }
 0xa1f   : > { %2740 = vmatprep.subr.bf16.mxu0 %v2709_v26  ;;  %v2585_v4 = vpop.xlane.xlu0 %2584  ;;  %v5308_v47 = vpop.eup %5307 }
 0xa20   : > { %5313 = vrcp.f32 %v2585_v4  ;;  %2741 = vmatpush1.bf16.xpose.msra.mxu0 %v2708_v27  ;;  %v2675_v48 = vmul.f32 %v5308_v47, %v7273_v45  ;;  %v2674_v13 = vmul.f32 %v5308_v47, %v7271_v21  ;;  %v9001_v21 = vld [vmem:[#allocation46_spill] sm:$0xff] }
 0xa22   : > { %v5310_v16 = vpop.eup %5309 }
 0xa23   : > { %v2677_v50 = vmul.f32 %v5310_v16, %v7279_v3  ;;  %v2676_v63 = vmul.f32 %v5310_v16, %v7277_v61  ;;  %v9002_v61 = vld [vmem:[#allocation44_spill] sm:$0xff] }
 0xa24   : > { %v9003_v17 = vpack.c.bf16 %v9001_v21, %v9002_v61 }
 0xa25   : > { %v2711_v0 = vpack.c.bf16 %v2677_v50, %v2675_v48  ;;  %v2710_v35 = vpack.c.bf16 %v2676_v63, %v2674_v13  ;;  %v2791_v12 = vpop.trf.xlu0 }
 0xa27   : > { %2742 = vmatprep.subr.bf16.mxu0 %v2711_v0  ;;  %v5312_v10 = vpop.eup %5311 }
 0xa28   : > { %2743 = vmatpush1.bf16.xpose.msra.mxu0 %v2710_v35  ;;  %v2679_v49 = vmul.f32 %v5312_v10, %v7289_v5  ;;  %v2678_v2 = vmul.f32 %v5312_v10, %v7287_v37  ;;  %v9008_v5 = vld [vmem:[#allocation43_spill] sm:$0xff]  ;;  %v2775_v37 = vpop.trf.xlu1 }
 0xa29   : > { %v9009_v55 = vpack.c.bf16 %v9007_v23, %v9008_v5  ;;  %v2792_v15 = vpop.trf.xlu0 }
 0xa2a   : > { %v5314_v40 = vpop.eup %5313 }
 0xa2b   : > { %v2681_v62 = vmul.f32 %v5314_v40, %v7295_v22  ;;  %v2680_v45 = vmul.f32 %v5314_v40, %v7293_v57  ;;  %v9010_v22 = vmov 0  }
 0xa2c   : > { %v2776_v57 = vpop.trf.xlu1 }
 0xa2d   : > { %v2713_v11 = vpack.c.bf16 %v2681_v62, %v2679_v49  ;;  %v2712_v3 = vpack.c.bf16 %v2680_v45, %v2678_v2  ;;  %v2793_v9 = vpop.trf.xlu0 }
 0xa2f   : > { %2744 = vmatprep.subr.bf16.mxu0 %v2713_v11 }
 0xa30   : > { %2745 = vmatpush1.bf16.xpose.msra.mxu0 %v2712_v3  ;;  %v2777_v42 = vpop.trf.xlu1 }
 0xa31   : > { %2847 = vmatprep.subr.bf16.mxu0 %v9003_v17  ;;  %v2794_v43 = vpop.trf.xlu0 }
 0xa34   : > { %v2778_v54 = vpop.trf.xlu1 }
 0xa35   : > { %v2795_v25 = vpop.trf.xlu0 }
 0xa37   : > { %2747 = vmatmul.mubr.bf16.vlgmr.msra.gmra.mrb[72].mxu0 %v9006_v53 }
 0xa38   : > { %2848 = vmatpush1.bf16.msra.mxu0 %v9009_v55  ;;  %2879 = vmatprep.mubr.bf16.mxu0 %v9010_v22  ;;  %v2779_v29 = vpop.trf.xlu1 }
 0xa39   : > { %v2796_v51 = vpop.trf.xlu0 }
 0xa3c   : > { %v2780_v52 = vpop.trf.xlu1 }
 0xa3d   : > { %v2797_v19 = vpop.trf.xlu0 }
 0xa3f   : > { %4782 = vmatmul.mubr.msk.bf16.vlgmr.msra.gmra.mrb[76].mxu0 %vm1122_vm2, %v2775_v37 }
 0xa40   : > { %2889 = vmatprep.mubr.bf16.mxu0 %v9010_v22  ;;  %v2781_v60 = vpop.trf.xlu1 }
 0xa41   : > { %v2798_v8 = vpop.trf.xlu0 }
 0xa44   : > { %v2782_v34 = vpop.trf.xlu1 }
 0xa47   : > { %4783 = vmatmul.mubr.msk.bf16.gmra.mrb[80].mxu0 %vm1122_vm2, %v2776_v57 }
 0xa48   : > { %2899 = vmatprep.mubr.bf16.mxu0 %v9010_v22 }
 0xa4f   : > { %4784 = vmatmul.mubr.msk.bf16.gmra.mrb[84].mxu0 %vm1122_vm2, %v2777_v42 }
 0xa50   : > { %2909 = vmatprep.mubr.bf16.mxu0 %v9010_v22 }
 0xa57   : > { %4785 = vmatmul.mubr.msk.bf16.gmra.mrb[88].mxu0 %vm1122_vm2, %v2778_v54 }
 0xa58   : > { %2919 = vmatprep.mubr.bf16.mxu0 %v9010_v22 }
 0xa5f   : > { %4786 = vmatmul.mubr.msk.bf16.gmra.mrb[92].mxu0 %vm1122_vm2, %v2779_v29 }
 0xa60   : > { %2929 = vmatprep.mubr.bf16.mxu0 %v9010_v22 }
 0xa67   : > { %4787 = vmatmul.mubr.msk.bf16.gmra.mrb[96].mxu0 %vm1122_vm2, %v2780_v52 }
 0xa68   : > { %2939 = vmatprep.mubr.bf16.mxu0 %v9010_v22 }
 0xa6f   : > { %4788 = vmatmul.mubr.msk.bf16.gmra.mrb[100].mxu0 %vm1122_vm2, %v2781_v60 }
 0xa70   : > { %2949 = vmatprep.mubr.bf16.mxu0 %v9010_v22 }
 0xa77   : > { %4789 = vmatmul.mubr.msk.bf16.gmra.mrb[104].mxu0 %vm1122_vm2, %v2782_v34 }
 0xa78   : > { %2959 = vmatprep.mubr.bf16.mxu0 %v9010_v22 }
 0xa7f   : > { %4790 = vmatmul.mubr.msk.bf16.gmra.mrb[108].mxu0 %vm1122_vm2, %v2791_v12 }
 0xa80   : > { %2969 = vmatprep.mubr.bf16.mxu0 %v9010_v22 }
 0xa87   : > { %4791 = vmatmul.mubr.msk.bf16.gmra.mrb[112].mxu0 %vm1122_vm2, %v2792_v15 }
 0xa88   : > { %2979 = vmatprep.mubr.bf16.mxu0 %v9010_v22 }
 0xa8f   : > { %4792 = vmatmul.mubr.msk.bf16.gmra.mrb[116].mxu0 %vm1122_vm2, %v2793_v9 }
 0xa90   : > { %2989 = vmatprep.mubr.bf16.mxu0 %v9010_v22 }
 0xa97   : > { %4793 = vmatmul.mubr.msk.bf16.gmra.mrb[120].mxu0 %vm1122_vm2, %v2794_v43 }
 0xa98   : > { %2999 = vmatprep.mubr.bf16.mxu0 %v9010_v22 }
 0xa9f   : > { %4794 = vmatmul.mubr.msk.bf16.gmra.mrb[124].mxu0 %vm1122_vm2, %v2795_v25 }
 0xaa0   : > { %3009 = vmatprep.mubr.bf16.mxu0 %v9010_v22 }
 0xaa7   : > { %4795 = vmatmul.mubr.msk.bf16.gmra.mrb[128].mxu0 %vm1122_vm2, %v2796_v51 }
 0xaa8   : > { %3019 = vmatprep.mubr.bf16.mxu0 %v9010_v22 }
 0xaaf   : > { %4796 = vmatmul.mubr.msk.bf16.gmra.mrb[132].mxu0 %vm1122_vm2, %v2797_v19 }
 0xab0   : > { %3029 = vmatprep.mubr.bf16.mxu0 %v9010_v22 }
 0xab7   : > { %4797 = vmatmul.mubr.msk.bf16.gmra.mrb[136].mxu0 %vm1122_vm2, %v2798_v8 }
 0xab8   : > { %4422 = vmatprep.mubr.bf16.mxu0 %v9013_v7 }
 0xb0a   : > { %v7397_v28 = vpop.f32.mrb[72].mxu0 }
 0xb0b   : > { %9014 = vst [vmem:[#allocation33_spill] sm:$0xff] %v7397_v28  ;;  %v7399_v39 = vpop.f32.mrb[73].mxu0 }
 0xb0c   : > { %9015 = vst [vmem:[#allocation57_spill] sm:$0xff] %v7399_v39  ;;  %v7401_v30 = vpop.f32.mrb[74].mxu0 }
 0xb0d   : > { %9016 = vst [vmem:[#allocation34_spill] sm:$0xff] %v7401_v30  ;;  %v7405_v20 = vpop.f32.mrb[75].mxu0 }
 0xb0e   : > { %9017 = vst [vmem:[#allocation39_spill] sm:$0xff] %v7405_v20 }
 0xb12   : > { %v7409_v46 = vpop.f32.mrb[76].mxu0 }
 0xb13   : > { %v7411_v24 = vpop.f32.mrb[77].mxu0 }
 0xb14   : > { %v3040_v31 = vmax.f32 %v7409_v46, %v7411_v24  ;;  %v7415_v18 = vpop.f32.mrb[78].mxu0 }
 0xb15   : > { %v7417_v58 = vpop.f32.mrb[79].mxu0 }
 0xb16   : > { %v3043_v44 = vmax.f32 %v7415_v18, %v7417_v58  ;;  %3041 = vmax.xlane.f32.xlu1 %v3040_v31 }
 0xb18   : > { %3044 = vmax.xlane.f32.xlu0 %v3043_v44 }
 0xb1a   : > { %v7421_v36 = vpop.f32.mrb[80].mxu0 }
 0xb1b   : > { %v7423_v56 = vpop.f32.mrb[81].mxu0 }
 0xb1c   : > { %v3046_v33 = vmax.f32 %v7421_v36, %v7423_v56  ;;  %v7427_v41 = vpop.f32.mrb[82].mxu0 }
 0xb1d   : > { %v7429_v26 = vpop.f32.mrb[83].mxu0 }
 0xb1e   : > { %v3049_v27 = vmax.f32 %v7427_v41, %v7429_v26  ;;  %3047 = vmax.xlane.f32.xlu1 %v3046_v33 }
 0xb20   : > { %3050 = vmax.xlane.f32.xlu0 %v3049_v27 }
 0xb22   : > { %v7433_v4 = vpop.f32.mrb[84].mxu0 }
 0xb23   : > { %v7435_v47 = vpop.f32.mrb[85].mxu0 }
 0xb24   : > { %v3052_v16 = vmax.f32 %v7433_v4, %v7435_v47  ;;  %v7439_v48 = vpop.f32.mrb[86].mxu0 }
 0xb25   : > { %v7441_v50 = vpop.f32.mrb[87].mxu0 }
 0xb26   : > { %v3055_v13 = vmax.f32 %v7439_v48, %v7441_v50  ;;  %3053 = vmax.xlane.f32.xlu1 %v3052_v16 }
 0xb28   : > { %3056 = vmax.xlane.f32.xlu0 %v3055_v13 }
 0xb2a   : > { %v7445_v63 = vpop.f32.mrb[88].mxu0 }
 0xb2b   : > { %v7447_v0 = vpop.f32.mrb[89].mxu0 }
 0xb2c   : > { %v3058_v35 = vmax.f32 %v7445_v63, %v7447_v0  ;;  %v7451_v10 = vpop.f32.mrb[90].mxu0 }
 0xb2d   : > { %v7453_v40 = vpop.f32.mrb[91].mxu0 }
 0xb2e   : > { %v3061_v49 = vmax.f32 %v7451_v10, %v7453_v40  ;;  %3059 = vmax.xlane.f32.xlu1 %v3058_v35 }
 0xb30   : > { %3062 = vmax.xlane.f32.xlu0 %v3061_v49 }
 0xb32   : > { %v7457_v62 = vpop.f32.mrb[92].mxu0 }
 0xb33   : > { %v7459_v2 = vpop.f32.mrb[93].mxu0 }
 0xb34   : > { %v3064_v45 = vmax.f32 %v7457_v62, %v7459_v2  ;;  %v7463_v11 = vpop.f32.mrb[94].mxu0 }
 0xb35   : > { %v7465_v3 = vpop.f32.mrb[95].mxu0 }
 0xb36   : > { %v3067_v21 = vmax.f32 %v7463_v11, %v7465_v3  ;;  %3065 = vmax.xlane.f32.xlu1 %v3064_v45 }
 0xb38   : > { %3068 = vmax.xlane.f32.xlu0 %v3067_v21 }
 0xb3a   : > { %v7469_v61 = vpop.f32.mrb[96].mxu0 }
 0xb3b   : > { %v7471_v17 = vpop.f32.mrb[97].mxu0 }
 0xb3c   : > { %v3070_v32 = vmax.f32 %v7469_v61, %v7471_v17  ;;  %v7475_v6 = vpop.f32.mrb[98].mxu0 }
 0xb3d   : > { %v7477_v53 = vpop.f32.mrb[99].mxu0 }
 0xb3e   : > { %v3073_v23 = vmax.f32 %v7475_v6, %v7477_v53  ;;  %3071 = vmax.xlane.f32.xlu1 %v3070_v32 }
 0xb40   : > { %3074 = vmax.xlane.f32.xlu0 %v3073_v23 }
 0xb42   : > { %v7481_v5 = vpop.f32.mrb[100].mxu0 }
 0xb43   : > { %v7483_v55 = vpop.f32.mrb[101].mxu0 }
 0xb44   : > { %v3076_v37 = vmax.f32 %v7481_v5, %v7483_v55  ;;  %v7487_v57 = vpop.f32.mrb[102].mxu0 }
 0xb45   : > { %v7489_v42 = vpop.f32.mrb[103].mxu0 }
 0xb46   : > { %v3079_v54 = vmax.f32 %v7487_v57, %v7489_v42  ;;  %3077 = vmax.xlane.f32.xlu1 %v3076_v37 }
 0xb48   : > { %3080 = vmax.xlane.f32.xlu0 %v3079_v54 }
 0xb4a   : > { %v7493_v29 = vpop.f32.mrb[104].mxu0 }
 0xb4b   : > { %v7495_v52 = vpop.f32.mrb[105].mxu0 }
 0xb4c   : > { %v3082_v60 = vmax.f32 %v7493_v29, %v7495_v52  ;;  %v7499_v34 = vpop.f32.mrb[106].mxu0 }
 0xb4d   : > { %v7501_v12 = vpop.f32.mrb[107].mxu0 }
 0xb4e   : > { %v3085_v15 = vmax.f32 %v7499_v34, %v7501_v12  ;;  %3083 = vmax.xlane.f32.xlu1 %v3082_v60 }
 0xb50   : > { %3086 = vmax.xlane.f32.xlu0 %v3085_v15 }
 0xb52   : > { %v7505_v9 = vpop.f32.mrb[108].mxu0 }
 0xb53   : > { %v7507_v43 = vpop.f32.mrb[109].mxu0 }
 0xb54   : > { %v3088_v25 = vmax.f32 %v7505_v9, %v7507_v43  ;;  %v7511_v51 = vpop.f32.mrb[110].mxu0 }
 0xb55   : > { %v7513_v19 = vpop.f32.mrb[111].mxu0 }
 0xb56   : > { %9018 = vst [vmem:[#allocation36_spill] sm:$0xff] %v7513_v19  ;;  %v3091_v8 = vmax.f32 %v7511_v51, %v7513_v19  ;;  %3089 = vmax.xlane.f32.xlu1 %v3088_v25 }
 0xb58   : > { %3092 = vmax.xlane.f32.xlu0 %v3091_v8 }
 0xb5a   : > { %v7517_v14 = vpop.f32.mrb[112].mxu0 }
 0xb5b   : > { %9019 = vst [vmem:[#allocation38_spill] sm:$0xff] %v7517_v14  ;;  %v7519_v38 = vpop.f32.mrb[113].mxu0 }
 0xb5c   : > { %9020 = vst [vmem:[#allocation37_spill] sm:$0xff] %v7519_v38  ;;  %v3094_v7 = vmax.f32 %v7517_v14, %v7519_v38  ;;  %v7523_v31 = vpop.f32.mrb[114].mxu0 }
 0xb5d   : > { %9021 = vst [vmem:[#allocation22_spill] sm:$0xff] %v7523_v31  ;;  %v7525_v44 = vpop.f32.mrb[115].mxu0 }
 0xb5e   : > { %9022 = vst [vmem:[#allocation20_spill] sm:$0xff] %v7525_v44  ;;  %v3097_v33 = vmax.f32 %v7523_v31, %v7525_v44  ;;  %3095 = vmax.xlane.f32.xlu1 %v3094_v7 }
 0xb60   : > { %3098 = vmax.xlane.f32.xlu0 %v3097_v33 }
 0xb62   : > { %v7529_v27 = vpop.f32.mrb[116].mxu0 }
 0xb63   : > { %9023 = vst [vmem:[#allocation52_spill] sm:$0xff] %v7529_v27  ;;  %v7531_v16 = vpop.f32.mrb[117].mxu0 }
 0xb64   : > { %9024 = vst [vmem:[#allocation51_spill] sm:$0xff] %v7531_v16  ;;  %v3100_v13 = vmax.f32 %v7529_v27, %v7531_v16  ;;  %v7535_v35 = vpop.f32.mrb[118].mxu0 }
 0xb65   : > { %9025 = vst [vmem:[#allocation23_spill] sm:$0xff] %v7535_v35  ;;  %v7537_v49 = vpop.f32.mrb[119].mxu0 }
 0xb66   : > { %9026 = vst [vmem:[#allocation21_spill] sm:$0xff] %v7537_v49  ;;  %v3103_v45 = vmax.f32 %v7535_v35, %v7537_v49  ;;  %3101 = vmax.xlane.f32.xlu1 %v3100_v13 }
 0xb68   : > { %3104 = vmax.xlane.f32.xlu0 %v3103_v45 }
 0xb6a   : > { %v7541_v21 = vpop.f32.mrb[120].mxu0 }
 0xb6b   : > { %9027 = vst [vmem:[#allocation50_spill] sm:$0xff] %v7541_v21  ;;  %v7543_v32 = vpop.f32.mrb[121].mxu0 }
 0xb6c   : > { %9028 = vst [vmem:[#allocation54_spill] sm:$0xff] %v7543_v32  ;;  %v3106_v23 = vmax.f32 %v7541_v21, %v7543_v32  ;;  %v7547_v37 = vpop.f32.mrb[122].mxu0 }
 0xb6d   : > { %9029 = vst [vmem:[#allocation56_spill] sm:$0xff] %v7547_v37  ;;  %v7549_v54 = vpop.f32.mrb[123].mxu0 }
 0xb6e   : > { %9030 = vst [vmem:[#allocation55_spill] sm:$0xff] %v7549_v54  ;;  %v3109_v60 = vmax.f32 %v7547_v37, %v7549_v54  ;;  %3107 = vmax.xlane.f32.xlu1 %v3106_v23 }
 0xb70   : > { %3110 = vmax.xlane.f32.xlu0 %v3109_v60 }
 0xb72   : > { %v7553_v15 = vpop.f32.mrb[124].mxu0 }
 0xb73   : > { %v7555_v25 = vpop.f32.mrb[125].mxu0 }
 0xb74   : > { %v7559_v7 = vpop.f32.mrb[126].mxu0 }
 0xb75   : > { %v7561_v33 = vpop.f32.mrb[127].mxu0 }
 0xb7a   : > { %v7565_v45 = vpop.f32.mrb[128].mxu0 }
 0xb7b   : > { %v7567_v1 = vpop.f32.mrb[129].mxu0 }
 0xb7c   : > { %v7571_v60 = vpop.f32.mrb[130].mxu0 }
 0xb7d   : > { %v7573_v59 = vpop.f32.mrb[131].mxu0 }
 0xb82   : > { %v7577_v28 = vpop.f32.mrb[132].mxu0 }
 0xb83   : > { %v7579_v30 = vpop.f32.mrb[133].mxu0 }
 0xb84   : > { %v7583_v39 = vpop.f32.mrb[134].mxu0 }
 0xb85   : > { %v7585_v20 = vpop.f32.mrb[135].mxu0 }
 0xb8a   : > { %v7589_v22 = vpop.f32.mrb[136].mxu0 }
 0xb8b   : > { %v7591_v54 = vpop.f32.mrb[137].mxu0 }
 0xb8c   : > { %v7595_v37 = vpop.f32.mrb[138].mxu0 }
 0xb8d   : > { %v7597_v32 = vpop.f32.mrb[139].mxu0 }
 0xba3   : > { %v3042_v21 = vpop.xlane.xlu1 %3041 }
 0xba4   : > { %v3136_v49 = vsub.f32 %v7409_v46, %v3042_v21  ;;  %v3137_v35 = vsub.f32 %v7411_v24, %v3042_v21 }
 0xba5   : > { %v3045_v23 = vpop.xlane.xlu0 %3044 }
 0xba6   : > { %v3200_v16 = vmul.f32 1.442695, %v3136_v49  ;;  %v3202_v27 = vmul.f32 1.442695, %v3137_v35  ;;  %v3138_v44 = vsub.f32 %v7415_v18, %v3045_v23  ;;  %v3139_v31 = vsub.f32 %v7417_v58, %v3045_v23 }
 0xba8   : > { %5315 = vpow2.f32 %v3200_v16  ;;  %v3204_v8 = vmul.f32 1.442695, %v3138_v44  ;;  %v3206_v38 = vmul.f32 1.442695, %v3139_v31 }
 0xba9   : > { %5317 = vpow2.f32 %v3202_v27 }
 0xbaa   : > { %5319 = vpow2.f32 %v3204_v8 }
 0xbab   : > { %5321 = vpow2.f32 %v3206_v38  ;;  %v3048_v14 = vpop.xlane.xlu1 %3047 }
 0xbac   : > { %v3140_v13 = vsub.f32 %v7421_v36, %v3048_v14  ;;  %v3141_v46 = vsub.f32 %v7423_v56, %v3048_v14 }
 0xbad   : > { %v3051_v19 = vpop.xlane.xlu0 %3050 }
 0xbae   : > { %v3208_v24 = vmul.f32 1.442695, %v3140_v13  ;;  %v3210_v21 = vmul.f32 1.442695, %v3141_v46  ;;  %v3142_v35 = vsub.f32 %v7427_v41, %v3051_v19  ;;  %v3143_v18 = vsub.f32 %v7429_v26, %v3051_v19 }
 0xbb0   : > { %5323 = vpow2.f32 %v3208_v24  ;;  %v3212_v58 = vmul.f32 1.442695, %v3142_v35  ;;  %v3214_v16 = vmul.f32 1.442695, %v3143_v18  ;;  %v9031_v24 = vmax.f32 %v7553_v15, %v7555_v25 }
 0xbb1   : > { %5325 = vpow2.f32 %v3210_v21 }
 0xbb2   : > { %v7609_v31 = vpop.eup %5315  ;;  %5327 = vpow2.f32 %v3212_v58 }
 0xbb3   : > { %v7611_v38 = vpop.eup %5317  ;;  %5329 = vpow2.f32 %v3214_v16  ;;  %v3054_v36 = vpop.xlane.xlu1 %3053 }
 0xbb4   : > { %v7613_v44 = vpop.eup %5319  ;;  %v3144_v56 = vsub.f32 %v7433_v4, %v3054_v36  ;;  %v3145_v14 = vsub.f32 %v7435_v47, %v3054_v36  ;;  %v3328_v41 = vadd.f32 %v7611_v38, %v7609_v31  ;;  %v9032_v36 = vmax.f32 %v7559_v7, %v7561_v33 }
 0xbb5   : > { %v7619_v26 = vpop.eup %5321  ;;  %v3057_v19 = vpop.xlane.xlu0 %3056 }
 0xbb6   : > { %v3216_v27 = vmul.f32 1.442695, %v3144_v56  ;;  %v3218_v49 = vmul.f32 1.442695, %v3145_v14  ;;  %3329 = vadd.xlane.f32.xlu1 %v3328_v41  ;;  %v3146_v8 = vsub.f32 %v7439_v48, %v3057_v19  ;;  %v3147_v13 = vsub.f32 %v7441_v50, %v3057_v19 }
 0xbb7   : > { %v3331_v23 = vadd.f32 %v7619_v26, %v7613_v44 }
 0xbb8   : > { %5331 = vpow2.f32 %v3216_v27  ;;  %v3220_v4 = vmul.f32 1.442695, %v3146_v8  ;;  %v3222_v46 = vmul.f32 1.442695, %v3147_v13  ;;  %v9033_v13 = vmax.f32 %v7565_v45, %v7567_v1 }
 0xbb9   : > { %5333 = vpow2.f32 %v3218_v49  ;;  %3332 = vadd.xlane.f32.xlu0 %v3331_v23 }
 0xbba   : > { %v7625_v47 = vpop.eup %5323  ;;  %5335 = vpow2.f32 %v3220_v4  ;;  %3113 = vmax.xlane.f32.xlu1 %v9031_v24 }
 0xbbb   : > { %v7630_v21 = vpop.eup %5325  ;;  %5337 = vpow2.f32 %v3222_v46  ;;  %v3060_v48 = vpop.xlane.xlu1 %3059 }
 0xbbc   : > { %v7632_v50 = vpop.eup %5327  ;;  %v3148_v35 = vsub.f32 %v7445_v63, %v3060_v48  ;;  %v3149_v18 = vsub.f32 %v7447_v0, %v3060_v48  ;;  %v3334_v58 = vadd.f32 %v7630_v21, %v7625_v47 }
 0xbbd   : > { %v7638_v16 = vpop.eup %5329  ;;  %3116 = vmax.xlane.f32.xlu0 %v9032_v36  ;;  %v3063_v56 = vpop.xlane.xlu0 %3062 }
 0xbbe   : > { %v3224_v14 = vmul.f32 1.442695, %v3148_v35  ;;  %v3226_v41 = vmul.f32 1.442695, %v3149_v18  ;;  %3335 = vadd.xlane.f32.xlu1 %v3334_v58  ;;  %v3150_v19 = vsub.f32 %v7451_v10, %v3063_v56  ;;  %v3151_v27 = vsub.f32 %v7453_v40, %v3063_v56 }
 0xbbf   : > { %v3337_v63 = vadd.f32 %v7638_v16, %v7632_v50  ;;  %v9034_v35 = vmax.f32 %v7571_v60, %v7573_v59 }
 0xbc0   : > { %5339 = vpow2.f32 %v3224_v14  ;;  %v3228_v0 = vmul.f32 1.442695, %v3150_v19  ;;  %v3230_v49 = vmul.f32 1.442695, %v3151_v27  ;;  %v9035_v27 = vmax.f32 %v7577_v28, %v7579_v30 }
 0xbc1   : > { %5341 = vpow2.f32 %v3226_v41  ;;  %3338 = vadd.xlane.f32.xlu0 %v3337_v63 }
 0xbc2   : > { %v7647_v8 = vpop.eup %5331  ;;  %5343 = vpow2.f32 %v3228_v0  ;;  %3119 = vmax.xlane.f32.xlu1 %v9033_v13 }
 0xbc3   : > { %v7652_v23 = vpop.eup %5333  ;;  %5345 = vpow2.f32 %v3230_v49  ;;  %v3066_v10 = vpop.xlane.xlu1 %3065 }
 0xbc4   : > { %v7654_v40 = vpop.eup %5335  ;;  %v3152_v4 = vsub.f32 %v7457_v62, %v3066_v10  ;;  %v3153_v46 = vsub.f32 %v7459_v2, %v3066_v10  ;;  %v3340_v24 = vadd.f32 %v7652_v23, %v7647_v8 }
 0xbc5   : > { %v7660_v48 = vpop.eup %5337  ;;  %3122 = vmax.xlane.f32.xlu0 %v9034_v35  ;;  %v3069_v18 = vpop.xlane.xlu0 %3068 }
 0xbc6   : > { %v3232_v58 = vmul.f32 1.442695, %v3152_v4  ;;  %v3234_v36 = vmul.f32 1.442695, %v3153_v46  ;;  %3341 = vadd.xlane.f32.xlu1 %v3340_v24  ;;  %v3154_v56 = vsub.f32 %v7463_v11, %v3069_v18  ;;  %v3155_v14 = vsub.f32 %v7465_v3, %v3069_v18 }
 0xbc7   : > { %v3343_v62 = vadd.f32 %v7660_v48, %v7654_v40  ;;  %v9036_v4 = vmax.f32 %v7583_v39, %v7585_v20 }
 0xbc8   : > { %5347 = vpow2.f32 %v3232_v58  ;;  %v3236_v2 = vmul.f32 1.442695, %v3154_v56  ;;  %v3238_v41 = vmul.f32 1.442695, %v3155_v14  ;;  %v9037_v14 = vmax.f32 %v7589_v22, %v7591_v54 }
 0xbc9   : > { %5349 = vpow2.f32 %v3234_v36  ;;  %3344 = vadd.xlane.f32.xlu0 %v3343_v62 }
 0xbca   : > { %v7669_v19 = vpop.eup %5339  ;;  %5351 = vpow2.f32 %v3236_v2  ;;  %3125 = vmax.xlane.f32.xlu1 %v9035_v27 }
 0xbcb   : > { %v7674_v63 = vpop.eup %5341  ;;  %5353 = vpow2.f32 %v3238_v41  ;;  %v3072_v11 = vpop.xlane.xlu1 %3071 }
 0xbcc   : > { %v7676_v3 = vpop.eup %5343  ;;  %v3156_v0 = vsub.f32 %v7469_v61, %v3072_v11  ;;  %v3157_v49 = vsub.f32 %v7471_v17, %v3072_v11  ;;  %v3346_v13 = vadd.f32 %v7674_v63, %v7669_v19 }
 0xbcd   : > { %v7682_v10 = vpop.eup %5345  ;;  %3128 = vmax.xlane.f32.xlu0 %v9036_v4  ;;  %v3075_v46 = vpop.xlane.xlu0 %3074 }
 0xbce   : > { %v3240_v24 = vmul.f32 1.442695, %v3156_v0  ;;  %v3242_v35 = vmul.f32 1.442695, %v3157_v49  ;;  %3347 = vadd.xlane.f32.xlu1 %v3346_v13  ;;  %v3158_v18 = vsub.f32 %v7475_v6, %v3075_v46  ;;  %v3159_v58 = vsub.f32 %v7477_v53, %v3075_v46 }
 0xbcf   : > { %v3349_v61 = vadd.f32 %v7682_v10, %v7676_v3  ;;  %v9038_v0 = vmax.f32 %v7595_v37, %v7597_v32 }
 0xbd0   : > { %5355 = vpow2.f32 %v3240_v24  ;;  %v3244_v17 = vmul.f32 1.442695, %v3158_v18  ;;  %v3246_v36 = vmul.f32 1.442695, %v3159_v58 }
 0xbd1   : > { %5357 = vpow2.f32 %v3242_v35  ;;  %3350 = vadd.xlane.f32.xlu0 %v3349_v61 }
 0xbd2   : > { %v7691_v56 = vpop.eup %5347  ;;  %5359 = vpow2.f32 %v3244_v17  ;;  %3131 = vmax.xlane.f32.xlu1 %v9037_v14 }
 0xbd3   : > { %v7696_v62 = vpop.eup %5349  ;;  %5361 = vpow2.f32 %v3246_v36  ;;  %v3078_v6 = vpop.xlane.xlu1 %3077 }
 0xbd4   : > { %v7698_v53 = vpop.eup %5351  ;;  %v3160_v2 = vsub.f32 %v7481_v5, %v3078_v6  ;;  %v3161_v41 = vsub.f32 %v7483_v55, %v3078_v6  ;;  %v3352_v27 = vadd.f32 %v7696_v62, %v7691_v56 }
 0xbd5   : > { %v7704_v11 = vpop.eup %5353  ;;  %3134 = vmax.xlane.f32.xlu0 %v9038_v0  ;;  %v3081_v49 = vpop.xlane.xlu0 %3080 }
 0xbd6   : > { %v3248_v13 = vmul.f32 1.442695, %v3160_v2  ;;  %v3250_v4 = vmul.f32 1.442695, %v3161_v41  ;;  %3353 = vadd.xlane.f32.xlu1 %v3352_v27  ;;  %v3162_v46 = vsub.f32 %v7487_v57, %v3081_v49  ;;  %v3163_v24 = vsub.f32 %v7489_v42, %v3081_v49 }
 0xbd7   : > { %v3355_v5 = vadd.f32 %v7704_v11, %v7698_v53 }
 0xbd8   : > { %5363 = vpow2.f32 %v3248_v13  ;;  %v3252_v55 = vmul.f32 1.442695, %v3162_v46  ;;  %v3254_v35 = vmul.f32 1.442695, %v3163_v24 }
 0xbd9   : > { %5365 = vpow2.f32 %v3250_v4  ;;  %3356 = vadd.xlane.f32.xlu0 %v3355_v5 }
 0xbda   : > { %v7713_v18 = vpop.eup %5355  ;;  %5367 = vpow2.f32 %v3252_v55 }
 0xbdb   : > { %v7715_v58 = vpop.eup %5357  ;;  %5369 = vpow2.f32 %v3254_v35  ;;  %v3084_v61 = vpop.xlane.xlu1 %3083 }
 0xbdc   : > { %v7717_v17 = vpop.eup %5359  ;;  %v3164_v57 = vsub.f32 %v7493_v29, %v3084_v61  ;;  %v3165_v42 = vsub.f32 %v7495_v52, %v3084_v61  ;;  %v3358_v36 = vadd.f32 %v7715_v58, %v7713_v18 }
 0xbdd   : > { %v7723_v14 = vpop.eup %5361  ;;  %v3087_v6 = vpop.xlane.xlu0 %3086 }
 0xbde   : > { %v3256_v2 = vmul.f32 1.442695, %v3164_v57  ;;  %v3258_v41 = vmul.f32 1.442695, %v3165_v42  ;;  %3359 = vadd.xlane.f32.xlu1 %v3358_v36  ;;  %v3166_v27 = vsub.f32 %v7499_v34, %v3087_v6  ;;  %v3167_v0 = vsub.f32 %v7501_v12, %v3087_v6  ;;  %v9039_v36 = vld [vmem:[#allocation36_spill] sm:$0xff] }
 0xbdf   : > { %v3361_v49 = vadd.f32 %v7723_v14, %v7717_v17 }
 0xbe0   : > { %5371 = vpow2.f32 %v3256_v2  ;;  %v3260_v29 = vmul.f32 1.442695, %v3166_v27  ;;  %v3262_v13 = vmul.f32 1.442695, %v3167_v0 }
 0xbe1   : > { %5373 = vpow2.f32 %v3258_v41  ;;  %3362 = vadd.xlane.f32.xlu0 %v3361_v49 }
 0xbe2   : > { %v7729_v52 = vpop.eup %5363  ;;  %5375 = vpow2.f32 %v3260_v29 }
 0xbe3   : > { %v7731_v4 = vpop.eup %5365  ;;  %5377 = vpow2.f32 %v3262_v13  ;;  %v3090_v46 = vpop.xlane.xlu1 %3089  ;;  %v9043_v13 = vld [vmem:[#allocation37_spill] sm:$0xff] }
 0xbe4   : > { %v7733_v24 = vpop.eup %5367  ;;  %v3168_v34 = vsub.f32 %v7505_v9, %v3090_v46  ;;  %v3169_v12 = vsub.f32 %v7507_v43, %v3090_v46  ;;  %v3364_v5 = vadd.f32 %v7731_v4, %v7729_v52 }
 0xbe5   : > { %v7739_v55 = vpop.eup %5369  ;;  %v3093_v35 = vpop.xlane.xlu0 %3092 }
 0xbe6   : > { %v3264_v61 = vmul.f32 1.442695, %v3168_v34  ;;  %v3266_v57 = vmul.f32 1.442695, %v3169_v12  ;;  %3365 = vadd.xlane.f32.xlu1 %v3364_v5  ;;  %v3170_v42 = vsub.f32 %v7511_v51, %v3093_v35  ;;  %v3171_v6 = vsub.f32 %v9039_v36, %v3093_v35  ;;  %v9042_v51 = vld [vmem:[#allocation38_spill] sm:$0xff]  ;;  %v9046_v36 = vld [vmem:[#allocation20_spill] sm:$0xff] }
 0xbe7   : > { %v3367_v2 = vadd.f32 %v7739_v55, %v7733_v24 }
 0xbe8   : > { %5379 = vpow2.f32 %v3264_v61  ;;  %v3268_v9 = vmul.f32 1.442695, %v3170_v42  ;;  %v3270_v41 = vmul.f32 1.442695, %v3171_v6 }
 0xbe9   : > { %5381 = vpow2.f32 %v3266_v57  ;;  %3368 = vadd.xlane.f32.xlu0 %v3367_v2  ;;  %v9045_v57 = vld [vmem:[#allocation22_spill] sm:$0xff] }
 0xbea   : > { %v7745_v43 = vpop.eup %5371  ;;  %5383 = vpow2.f32 %v3268_v9 }
 0xbeb   : > { %9040 = vst [vmem:[#allocation53_spill] sm:$0xff] %v7745_v43  ;;  %v7747_v27 = vpop.eup %5373  ;;  %5385 = vpow2.f32 %v3270_v41  ;;  %v3096_v0 = vpop.xlane.xlu1 %3095 }
 0xbec   : > { %v7749_v49 = vpop.eup %5375  ;;  %v3172_v29 = vsub.f32 %v9042_v51, %v3096_v0  ;;  %v3173_v46 = vsub.f32 %v9043_v13, %v3096_v0  ;;  %v3370_v34 = vadd.f32 %v7747_v27, %v7745_v43  ;;  %v9054_v43 = vld [vmem:[#allocation21_spill] sm:$0xff] }
 0xbed   : > { %9041 = vst [vmem:[#allocation46_spill] sm:$0xff] %v7749_v49  ;;  %v7755_v12 = vpop.eup %5377  ;;  %v3099_v5 = vpop.xlane.xlu0 %3098 }
 0xbee   : > { %9044 = vst [vmem:[#allocation44_spill] sm:$0xff] %v7755_v12  ;;  %v3272_v35 = vmul.f32 1.442695, %v3172_v29  ;;  %v3274_v61 = vmul.f32 1.442695, %v3173_v46  ;;  %3371 = vadd.xlane.f32.xlu1 %v3370_v34  ;;  %v3174_v42 = vsub.f32 %v9045_v57, %v3099_v5  ;;  %v3175_v6 = vsub.f32 %v9046_v36, %v3099_v5  ;;  %v9050_v46 = vld [vmem:[#allocation52_spill] sm:$0xff] }
 0xbef   : > { %v3373_v2 = vadd.f32 %v7755_v12, %v7749_v49  ;;  %v9051_v5 = vld [vmem:[#allocation51_spill] sm:$0xff] }
 0xbf0   : > { %5387 = vpow2.f32 %v3272_v35  ;;  %v3276_v9 = vmul.f32 1.442695, %v3174_v42  ;;  %v3278_v41 = vmul.f32 1.442695, %v3175_v6 }
 0xbf1   : > { %5389 = vpow2.f32 %v3274_v61  ;;  %3374 = vadd.xlane.f32.xlu0 %v3373_v2  ;;  %v9053_v2 = vld [vmem:[#allocation23_spill] sm:$0xff] }
 0xbf2   : > { %v7761_v0 = vpop.eup %5379  ;;  %5391 = vpow2.f32 %v3276_v9 }
 0xbf3   : > { %9047 = vst [vmem:[#allocation42_spill] sm:$0xff] %v7761_v0  ;;  %v7763_v51 = vpop.eup %5381  ;;  %5393 = vpow2.f32 %v3278_v41  ;;  %v3102_v29 = vpop.xlane.xlu1 %3101 }
 0xbf4   : > { %9048 = vst [vmem:[#allocation28_spill] sm:$0xff] %v7763_v51  ;;  %v7765_v13 = vpop.eup %5383  ;;  %v3176_v34 = vsub.f32 %v9050_v46, %v3102_v29  ;;  %v3177_v57 = vsub.f32 %v9051_v5, %v3102_v29  ;;  %v3376_v35 = vadd.f32 %v7763_v51, %v7761_v0 }
 0xbf5   : > { %9049 = vst [vmem:[#allocation45_spill] sm:$0xff] %v7765_v13  ;;  %v7771_v42 = vpop.eup %5385  ;;  %v3105_v61 = vpop.xlane.xlu0 %3104 }
 0xbf6   : > { %9052 = vst [vmem:[#allocation43_spill] sm:$0xff] %v7771_v42  ;;  %v3280_v36 = vmul.f32 1.442695, %v3176_v34  ;;  %v3282_v6 = vmul.f32 1.442695, %v3177_v57  ;;  %3377 = vadd.xlane.f32.xlu1 %v3376_v35  ;;  %v3178_v9 = vsub.f32 %v9053_v2, %v3105_v61  ;;  %v3179_v41 = vsub.f32 %v9054_v43, %v3105_v61  ;;  %v9055_v35 = vld [vmem:[#allocation50_spill] sm:$0xff] }
 0xbf7   : > { %v3379_v49 = vadd.f32 %v7771_v42, %v7765_v13  ;;  %v9056_v43 = vld [vmem:[#allocation54_spill] sm:$0xff]  ;;  %v9058_v13 = vld [vmem:[#allocation55_spill] sm:$0xff] }
 0xbf8   : > { %5395 = vpow2.f32 %v3280_v36  ;;  %v3284_v46 = vmul.f32 1.442695, %v3178_v9  ;;  %v3286_v12 = vmul.f32 1.442695, %v3179_v41 }
 0xbf9   : > { %5397 = vpow2.f32 %v3282_v6  ;;  %3380 = vadd.xlane.f32.xlu0 %v3379_v49 }
 0xbfa   : > { %v7777_v29 = vpop.eup %5387  ;;  %5399 = vpow2.f32 %v3284_v46  ;;  %v9057_v46 = vld [vmem:[#allocation56_spill] sm:$0xff] }
 0xbfb   : > { %v7779_v5 = vpop.eup %5389  ;;  %5401 = vpow2.f32 %v3286_v12  ;;  %v3108_v34 = vpop.xlane.xlu1 %3107 }
 0xbfc   : > { %v7781_v57 = vpop.eup %5391  ;;  %v3180_v2 = vsub.f32 %v9055_v35, %v3108_v34  ;;  %v3181_v61 = vsub.f32 %v9056_v43, %v3108_v34  ;;  %v3382_v36 = vadd.f32 %v7779_v5, %v7777_v29 }
 0xbfd   : > { %v7787_v9 = vpop.eup %5393  ;;  %v3111_v6 = vpop.xlane.xlu0 %3110 }
 0xbfe   : > { %v3288_v49 = vmul.f32 1.442695, %v3180_v2  ;;  %v3290_v41 = vmul.f32 1.442695, %v3181_v61  ;;  %3383 = vadd.xlane.f32.xlu1 %v3382_v36  ;;  %v3182_v0 = vsub.f32 %v9057_v46, %v3111_v6  ;;  %v3183_v12 = vsub.f32 %v9058_v13, %v3111_v6 }
 0xbff   : > { %v3385_v42 = vadd.f32 %v7787_v9, %v7781_v57 }
 0xc00   : > { %5403 = vpow2.f32 %v3288_v49  ;;  %v3292_v35 = vmul.f32 1.442695, %v3182_v0  ;;  %v3294_v51 = vmul.f32 1.442695, %v3183_v12 }
 0xc01   : > { %5405 = vpow2.f32 %v3290_v41  ;;  %3386 = vadd.xlane.f32.xlu0 %v3385_v42 }
 0xc02   : > { %v7793_v34 = vpop.eup %5395  ;;  %5407 = vpow2.f32 %v3292_v35 }
 0xc03   : > { %9059 = vst [vmem:[#allocation18_spill] sm:$0xff] %v7793_v34  ;;  %v7795_v43 = vpop.eup %5397  ;;  %5409 = vpow2.f32 %v3294_v51 }
 0xc04   : > { %v7797_v2 = vpop.eup %5399  ;;  %v3388_v61 = vadd.f32 %v7795_v43, %v7793_v34 }
 0xc05   : > { %9060 = vst [vmem:[#allocation31_spill] sm:$0xff] %v7797_v2  ;;  %v7801_v13 = vpop.eup %5401 }
 0xc06   : > { %9061 = vst [vmem:[#allocation36_spill] sm:$0xff] %v7801_v13  ;;  %3389 = vadd.xlane.f32.xlu1 %v3388_v61  ;;  %v3391_v0 = vadd.f32 %v7801_v13, %v7797_v2 }
 0xc08   : > { %3392 = vadd.xlane.f32.xlu0 %v3391_v0 }
 0xc0a   : > { %v7805_v36 = vpop.eup %5403 }
 0xc0b   : > { %9062 = vst [vmem:[#allocation38_spill] sm:$0xff] %v7805_v36  ;;  %v7807_v42 = vpop.eup %5405 }
 0xc0c   : > { %9063 = vst [vmem:[#allocation37_spill] sm:$0xff] %v7807_v42  ;;  %v7809_v6 = vpop.eup %5407  ;;  %v3394_v51 = vadd.f32 %v7807_v42, %v7805_v36 }
 0xc0d   : > { %9064 = vst [vmem:[#allocation22_spill] sm:$0xff] %v7809_v6  ;;  %v7813_v49 = vpop.eup %5409 }
 0xc0e   : > { %9065 = vst [vmem:[#allocation20_spill] sm:$0xff] %v7813_v49  ;;  %3395 = vadd.xlane.f32.xlu1 %v3394_v51  ;;  %v3397_v41 = vadd.f32 %v7813_v49, %v7809_v6 }
 0xc10   : > { %3398 = vadd.xlane.f32.xlu0 %v3397_v41 }
 0xc43   : > { %v3330_v46 = vpop.xlane.xlu1 %3329 }
 0xc44   : > { %5411 = vrcp.f32 %v3330_v46 }
 0xc46   : > { %v3333_v12 = vpop.xlane.xlu0 %3332 }
 0xc47   : > { %5413 = vrcp.f32 %v3333_v12  ;;  %v3114_v35 = vpop.xlane.xlu1 %3113 }
 0xc48   : > { %v3184_v61 = vsub.f32 %v7553_v15, %v3114_v35  ;;  %v3185_v0 = vsub.f32 %v7555_v25, %v3114_v35 }
 0xc4a   : > { %v3296_v34 = vmul.f32 1.442695, %v3184_v61  ;;  %v3298_v2 = vmul.f32 1.442695, %v3185_v0  ;;  %v3117_v13 = vpop.xlane.xlu0 %3116 }
 0xc4b   : > { %v3186_v36 = vsub.f32 %v7559_v7, %v3117_v13  ;;  %v3187_v51 = vsub.f32 %v7561_v33, %v3117_v13  ;;  %v3336_v42 = vpop.xlane.xlu1 %3335 }
 0xc4c   : > { %5415 = vpow2.f32 %v3296_v34 }
 0xc4d   : > { %5417 = vpow2.f32 %v3298_v2  ;;  %v3300_v41 = vmul.f32 1.442695, %v3186_v36  ;;  %v3302_v6 = vmul.f32 1.442695, %v3187_v51 }
 0xc4e   : > { %v5412_v46 = vpop.eup %5411  ;;  %5419 = vrcp.f32 %v3336_v42  ;;  %v3339_v12 = vpop.xlane.xlu0 %3338 }
 0xc4f   : > { %5421 = vpow2.f32 %v3300_v41  ;;  %v3120_v49 = vpop.xlane.xlu1 %3119  ;;  %v3457_v7 = vmul.f32 %v5412_v46, %v7611_v38  ;;  %v3456_v33 = vmul.f32 %v5412_v46, %v7609_v31 }
 0xc50   : > { %5423 = vpow2.f32 %v3302_v6  ;;  %v3188_v15 = vsub.f32 %v7565_v45, %v3120_v49  ;;  %v3189_v25 = vsub.f32 %v7567_v1, %v3120_v49 }
 0xc51   : > { %v5414_v35 = vpop.eup %5413  ;;  %5425 = vrcp.f32 %v3339_v12 }
 0xc52   : > { %v3304_v34 = vmul.f32 1.442695, %v3188_v15  ;;  %v3306_v2 = vmul.f32 1.442695, %v3189_v25  ;;  %v3123_v13 = vpop.xlane.xlu0 %3122  ;;  %v3459_v36 = vmul.f32 %v5414_v35, %v7619_v26  ;;  %v3458_v42 = vmul.f32 %v5414_v35, %v7613_v44 }
 0xc53   : > { %v3190_v61 = vsub.f32 %v7571_v60, %v3123_v13  ;;  %v3191_v6 = vsub.f32 %v7573_v59, %v3123_v13  ;;  %v3342_v45 = vpop.xlane.xlu1 %3341 }
 0xc54   : > { %5427 = vpow2.f32 %v3304_v34  ;;  %v3521_v1 = vpack.c.bf16 %v3459_v36, %v3457_v7  ;;  %v3520_v49 = vpack.c.bf16 %v3458_v42, %v3456_v33 }
 0xc55   : > { %5429 = vpow2.f32 %v3306_v2  ;;  %v3308_v0 = vmul.f32 1.442695, %v3190_v61  ;;  %v3310_v38 = vmul.f32 1.442695, %v3191_v6 }
 0xc56   : > { %v7829_v51 = vpop.eup %5415  ;;  %5431 = vrcp.f32 %v3342_v45  ;;  %3552 = vmatprep.subr.bf16.mxu1 %v3521_v1  ;;  %v3345_v31 = vpop.xlane.xlu0 %3344 }
 0xc57   : > { %v7831_v41 = vpop.eup %5417  ;;  %5433 = vpow2.f32 %v3308_v0  ;;  %3553 = vmatpush1.bf16.xpose.msra.mxu1 %v3520_v49  ;;  %v3126_v44 = vpop.xlane.xlu1 %3125 }
 0xc58   : > { %v5420_v60 = vpop.eup %5419  ;;  %5435 = vpow2.f32 %v3310_v38  ;;  %v3192_v59 = vsub.f32 %v7577_v28, %v3126_v44  ;;  %v3193_v26 = vsub.f32 %v7579_v30, %v3126_v44  ;;  %v3400_v46 = vadd.f32 %v7831_v41, %v7829_v51 }
 0xc59   : > { %v7837_v12 = vpop.eup %5421  ;;  %5437 = vrcp.f32 %v3345_v31  ;;  %v3461_v13 = vmul.f32 %v5420_v60, %v7630_v21  ;;  %v3460_v42 = vmul.f32 %v5420_v60, %v7625_v47 }
 0xc5a   : > { %v7839_v15 = vpop.eup %5423  ;;  %v3312_v25 = vmul.f32 1.442695, %v3192_v59  ;;  %v3314_v35 = vmul.f32 1.442695, %v3193_v26  ;;  %3401 = vadd.xlane.f32.xlu1 %v3400_v46  ;;  %v3129_v7 = vpop.xlane.xlu0 %3128 }
 0xc5b   : > { %v5426_v33 = vpop.eup %5425  ;;  %v3194_v34 = vsub.f32 %v7583_v39, %v3129_v7  ;;  %v3195_v2 = vsub.f32 %v7585_v20, %v3129_v7  ;;  %v3348_v28 = vpop.xlane.xlu1 %3347  ;;  %v3403_v30 = vadd.f32 %v7839_v15, %v7837_v12 }
 0xc5c   : > { %5439 = vpow2.f32 %v3312_v25  ;;  %v3463_v36 = vmul.f32 %v5426_v33, %v7638_v16  ;;  %v3462_v61 = vmul.f32 %v5426_v33, %v7632_v50 }
 0xc5d   : > { %5441 = vpow2.f32 %v3314_v35  ;;  %v3316_v6 = vmul.f32 1.442695, %v3194_v34  ;;  %v3318_v45 = vmul.f32 1.442695, %v3195_v2  ;;  %3404 = vadd.xlane.f32.xlu0 %v3403_v30 }
 0xc5e   : > { %v7849_v39 = vpop.eup %5427  ;;  %5443 = vrcp.f32 %v3348_v28  ;;  %v3523_v20 = vpack.c.bf16 %v3463_v36, %v3461_v13  ;;  %v3351_v1 = vpop.xlane.xlu0 %3350  ;;  %v3522_v49 = vpack.c.bf16 %v3462_v61, %v3460_v42 }
 0xc5f   : > { %v7851_v0 = vpop.eup %5429  ;;  %5445 = vpow2.f32 %v3316_v6  ;;  %v3132_v21 = vpop.xlane.xlu1 %3131 }
 0xc60   : > { %v5432_v38 = vpop.eup %5431  ;;  %5447 = vpow2.f32 %v3318_v45  ;;  %3554 = vmatprep.subr.bf16.mxu1 %v3523_v20  ;;  %v3196_v47 = vsub.f32 %v7589_v22, %v3132_v21  ;;  %v3197_v50 = vsub.f32 %v7591_v54, %v3132_v21  ;;  %v3406_v16 = vadd.f32 %v7851_v0, %v7849_v39 }
 0xc61   : > { %v7857_v31 = vpop.eup %5433  ;;  %5449 = vrcp.f32 %v3351_v1  ;;  %3555 = vmatpush1.bf16.xpose.msra.mxu1 %v3522_v49  ;;  %v3465_v7 = vmul.f32 %v5432_v38, %v7652_v23  ;;  %v3464_v34 = vmul.f32 %v5432_v38, %v7647_v8 }
 0xc62   : > { %v7859_v44 = vpop.eup %5435  ;;  %v3320_v60 = vmul.f32 1.442695, %v3196_v47  ;;  %v3322_v59 = vmul.f32 1.442695, %v3197_v50  ;;  %3407 = vadd.xlane.f32.xlu1 %v3406_v16  ;;  %v3135_v26 = vpop.xlane.xlu0 %3134 }
 0xc63   : > { %v5438_v46 = vpop.eup %5437  ;;  %v3198_v25 = vsub.f32 %v7595_v37, %v3135_v26  ;;  %v3199_v22 = vsub.f32 %v7597_v32, %v3135_v26  ;;  %v3354_v35 = vpop.xlane.xlu1 %3353  ;;  %v3409_v54 = vadd.f32 %v7859_v44, %v7857_v31 }
 0xc64   : > { %5451 = vpow2.f32 %v3320_v60  ;;  %v3467_v33 = vmul.f32 %v5438_v46, %v7660_v48  ;;  %v3466_v2 = vmul.f32 %v5438_v46, %v7654_v40 }
 0xc65   : > { %5453 = vpow2.f32 %v3322_v59  ;;  %v3324_v28 = vmul.f32 1.442695, %v3198_v25  ;;  %v3326_v30 = vmul.f32 1.442695, %v3199_v22  ;;  %3410 = vadd.xlane.f32.xlu0 %v3409_v54 }
 0xc66   : > { %v7869_v37 = vpop.eup %5439  ;;  %5455 = vrcp.f32 %v3354_v35  ;;  %v3525_v32 = vpack.c.bf16 %v3467_v33, %v3465_v7  ;;  %v3357_v13 = vpop.xlane.xlu0 %3356  ;;  %v3524_v36 = vpack.c.bf16 %v3466_v2, %v3464_v34 }
 0xc67   : > { %v7871_v42 = vpop.eup %5441  ;;  %5457 = vpow2.f32 %v3324_v28 }
 0xc68   : > { %v5444_v23 = vpop.eup %5443  ;;  %5459 = vpow2.f32 %v3326_v30  ;;  %3556 = vmatprep.subr.bf16.mxu1 %v3525_v32  ;;  %v3412_v8 = vadd.f32 %v7871_v42, %v7869_v37 }
 0xc69   : > { %v7875_v40 = vpop.eup %5445  ;;  %5461 = vrcp.f32 %v3357_v13  ;;  %3557 = vmatpush1.bf16.xpose.msra.mxu1 %v3524_v36  ;;  %v3469_v20 = vmul.f32 %v5444_v23, %v7674_v63  ;;  %v3468_v49 = vmul.f32 %v5444_v23, %v7669_v19 }
 0xc6a   : > { %v7877_v48 = vpop.eup %5447  ;;  %3413 = vadd.xlane.f32.xlu1 %v3412_v8 }
 0xc6b   : > { %v5450_v61 = vpop.eup %5449  ;;  %v3360_v6 = vpop.xlane.xlu1 %3359  ;;  %v3415_v45 = vadd.f32 %v7877_v48, %v7875_v40 }
 0xc6c   : > { %v3471_v1 = vmul.f32 %v5450_v61, %v7682_v10  ;;  %v3470_v21 = vmul.f32 %v5450_v61, %v7676_v3  ;;  %5463 = vrcp.f32 %v3360_v6 }
 0xc6d   : > { %3416 = vadd.xlane.f32.xlu0 %v3415_v45 }
 0xc6e   : > { %v7885_v38 = vpop.eup %5451  ;;  %v3527_v47 = vpack.c.bf16 %v3471_v1, %v3469_v20  ;;  %v3363_v50 = vpop.xlane.xlu0 %3362  ;;  %v3526_v16 = vpack.c.bf16 %v3470_v21, %v3468_v49 }
 0xc6f   : > { %v7887_v60 = vpop.eup %5453  ;;  %5465 = vrcp.f32 %v3363_v50  ;;  %v9067_v50 = vld [vmem:[#allocation46_spill] sm:$0xff] }
 0xc70   : > { %v5456_v59 = vpop.eup %5455  ;;  %3558 = vmatprep.subr.bf16.mxu1 %v3527_v47  ;;  %v3418_v63 = vadd.f32 %v7887_v60, %v7885_v38  ;;  %v9066_v47 = vld [vmem:[#allocation44_spill] sm:$0xff] }
 0xc71   : > { %v7891_v10 = vpop.eup %5457  ;;  %3559 = vmatpush1.bf16.xpose.msra.mxu1 %v3526_v16  ;;  %v3473_v25 = vmul.f32 %v5456_v59, %v7696_v62  ;;  %v3472_v35 = vmul.f32 %v5456_v59, %v7691_v56 }
 0xc72   : > { %v7893_v19 = vpop.eup %5459  ;;  %3419 = vadd.xlane.f32.xlu1 %v3418_v63 }
 0xc73   : > { %v5462_v3 = vpop.eup %5461  ;;  %v3366_v26 = vpop.xlane.xlu1 %3365  ;;  %v3421_v46 = vadd.f32 %v7893_v19, %v7891_v10 }
 0xc74   : > { %v3475_v22 = vmul.f32 %v5462_v3, %v7704_v11  ;;  %v3474_v54 = vmul.f32 %v5462_v3, %v7698_v53  ;;  %5467 = vrcp.f32 %v3366_v26 }
 0xc75   : > { %3422 = vadd.xlane.f32.xlu0 %v3421_v46 }
 0xc76   : > { %v3529_v7 = vpack.c.bf16 %v3475_v22, %v3473_v25  ;;  %v3369_v33 = vpop.xlane.xlu0 %3368  ;;  %v3528_v34 = vpack.c.bf16 %v3474_v54, %v3472_v35  ;;  %v5464_v2 = vpop.eup %5463  ;;  %v9069_v25 = vld [vmem:[#allocation28_spill] sm:$0xff]  ;;  %v9070_v35 = vld [vmem:[#allocation43_spill] sm:$0xff]  ;;  %v9071_v54 = vld [vmem:[#allocation45_spill] sm:$0xff] }
 0xc77   : > { %5469 = vrcp.f32 %v3369_v33  ;;  %v3477_v30 = vmul.f32 %v5464_v2, %v7715_v58  ;;  %v3476_v56 = vmul.f32 %v5464_v2, %v7713_v18 }
 0xc78   : > { %3560 = vmatprep.subr.bf16.mxu1 %v3529_v7 }
 0xc79   : > { %v5466_v28 = vpop.eup %5465  ;;  %3561 = vmatpush1.bf16.xpose.msra.mxu1 %v3528_v34  ;;  %v9072_v34 = vld [vmem:[#allocation42_spill] sm:$0xff] }
 0xc7a   : > { %v3479_v62 = vmul.f32 %v5466_v28, %v7723_v14  ;;  %v3478_v11 = vmul.f32 %v5466_v28, %v7717_v17 }
 0xc7b   : > { %v3372_v32 = vpop.xlane.xlu1 %3371 }
 0xc7c   : > { %v3531_v53 = vpack.c.bf16 %v3479_v62, %v3477_v30  ;;  %5471 = vrcp.f32 %v3372_v32  ;;  %v3530_v13 = vpack.c.bf16 %v3478_v11, %v3476_v56 }
 0xc7e   : > { %3562 = vmatprep.subr.bf16.mxu1 %v3531_v53  ;;  %v3375_v36 = vpop.xlane.xlu0 %3374  ;;  %v5468_v23 = vpop.eup %5467 }
 0xc7f   : > { %5473 = vrcp.f32 %v3375_v36  ;;  %v3481_v61 = vmul.f32 %v5468_v23, %v7731_v4  ;;  %v3480_v17 = vmul.f32 %v5468_v23, %v7729_v52 }
 0xc81   : > { %v5470_v8 = vpop.eup %5469  ;;  %3563 = vmatpush1.bf16.xpose.msra.mxu1 %v3530_v13 }
 0xc82   : > { %v3483_v58 = vmul.f32 %v5470_v8, %v7739_v55  ;;  %v3482_v14 = vmul.f32 %v5470_v8, %v7733_v24  ;;  %v9068_v24 = vld [vmem:[#allocation53_spill] sm:$0xff] }
 0xc83   : > { %v3378_v6 = vpop.xlane.xlu1 %3377 }
 0xc84   : > { %v3533_v45 = vpack.c.bf16 %v3483_v58, %v3481_v61  ;;  %5475 = vrcp.f32 %v3378_v6  ;;  %v3532_v18 = vpack.c.bf16 %v3482_v14, %v3480_v17  ;;  %v9073_v6 = vld [vmem:[#allocation26_spill] sm:$0xff]  ;;  %v9074_v17 = vld [vmem:[#allocation24_spill] sm:$0xff] }
 0xc86   : > { %3564 = vmatprep.subr.bf16.mxu1 %v3533_v45  ;;  %v3381_v20 = vpop.xlane.xlu0 %3380  ;;  %v5472_v1 = vpop.eup %5471  ;;  %v9075_v45 = vpack.c.bf16 %v9073_v6, %v9074_v17 }
 0xc87   : > { %5477 = vrcp.f32 %v3381_v20  ;;  %v3485_v21 = vmul.f32 %v5472_v1, %v7747_v27  ;;  %v3484_v59 = vmul.f32 %v5472_v1, %v9068_v24  ;;  %v9077_v20 = vld [vmem:[#allocation31_spill] sm:$0xff] }
 0xc89   : > { %v5474_v49 = vpop.eup %5473  ;;  %3565 = vmatpush1.bf16.xpose.msra.mxu1 %v3532_v18 }
 0xc8a   : > { %v3487_v4 = vmul.f32 %v5474_v49, %v9066_v47  ;;  %v3486_v55 = vmul.f32 %v5474_v49, %v9067_v50  ;;  %v9079_v49 = vld [vmem:[#allocation25_spill] sm:$0xff] }
 0xc8b   : > { %v3384_v16 = vpop.xlane.xlu1 %3383 }
 0xc8c   : > { %v3535_v63 = vpack.c.bf16 %v3487_v4, %v3485_v21  ;;  %5479 = vrcp.f32 %v3384_v16  ;;  %v3534_v52 = vpack.c.bf16 %v3486_v55, %v3484_v59  ;;  %v9081_v4 = vld [vmem:[#allocation18_spill] sm:$0xff]  ;;  %v9082_v59 = vld [vmem:[#allocation37_spill] sm:$0xff] }
 0xc8e   : > { %3566 = vmatprep.subr.bf16.mxu1 %v3535_v63  ;;  %v3387_v3 = vpop.xlane.xlu0 %3386  ;;  %v5476_v26 = vpop.eup %5475 }
 0xc8f   : > { %5481 = vrcp.f32 %v3387_v3  ;;  %v3489_v22 = vmul.f32 %v5476_v26, %v9069_v25  ;;  %v3488_v2 = vmul.f32 %v5476_v26, %v9072_v34  ;;  %v9084_v3 = vld [vmem:[#allocation22_spill] sm:$0xff] }
 0xc90   : > { %v9085_v25 = vld [vmem:[#allocation38_spill] sm:$0xff] }
 0xc91   : > { %v5478_v46 = vpop.eup %5477  ;;  %3567 = vmatpush1.bf16.xpose.msra.mxu1 %v3534_v52  ;;  %v9083_v52 = vld [vmem:[#allocation20_spill] sm:$0xff] }
 0xc92   : > { %v3491_v27 = vmul.f32 %v5478_v46, %v9070_v35  ;;  %v3490_v7 = vmul.f32 %v5478_v46, %v9071_v54 }
 0xc93   : > { %v3390_v33 = vpop.xlane.xlu1 %3389 }
 0xc94   : > { %5483 = vrcp.f32 %v3390_v33  ;;  %v3537_v28 = vpack.c.bf16 %v3491_v27, %v3489_v22  ;;  %v3536_v62 = vpack.c.bf16 %v3490_v7, %v3488_v2 }
 0xc95   : > { %v3393_v30 = vpop.xlane.xlu0 %3392 }
 0xc96   : > { %3568 = vmatprep.subr.bf16.mxu1 %v3537_v28  ;;  %5485 = vrcp.f32 %v3393_v30  ;;  %v5480_v11 = vpop.eup %5479 }
 0xc97   : > { %v3493_v56 = vmul.f32 %v5480_v11, %v7779_v5  ;;  %v3492_v23 = vmul.f32 %v5480_v11, %v7777_v29  ;;  %v9078_v29 = vld [vmem:[#allocation27_spill] sm:$0xff] }
 0xc98   : > { %v9080_v21 = vpack.c.bf16 %v9078_v29, %v9079_v49 }
 0xc99   : > { %v5482_v32 = vpop.eup %5481  ;;  %3569 = vmatpush1.bf16.xpose.msra.mxu1 %v3536_v62 }
 0xc9a   : > { %v3495_v53 = vmul.f32 %v5482_v32, %v7787_v9  ;;  %v3494_v13 = vmul.f32 %v5482_v32, %v7781_v57  ;;  %v9076_v9 = vld [vmem:[#allocation36_spill] sm:$0xff] }
 0xc9b   : > { %v3396_v36 = vpop.xlane.xlu1 %3395 }
 0xc9c   : > { %5487 = vrcp.f32 %v3396_v36  ;;  %v3539_v8 = vpack.c.bf16 %v3495_v53, %v3493_v56  ;;  %v3538_v58 = vpack.c.bf16 %v3494_v13, %v3492_v23 }
 0xc9d   : > { %v3399_v61 = vpop.xlane.xlu0 %3398 }
 0xc9e   : > { %v5484_v14 = vpop.eup %5483  ;;  %3570 = vmatprep.subr.bf16.mxu1 %v3539_v8  ;;  %5489 = vrcp.f32 %v3399_v61 }
 0xc9f   : > { %3605 = vxpose.xlu1.c.b16.start.end [1/1] (short) %v9075_v45, 128  ;;  %v3497_v5 = vmul.f32 %v5484_v14, %v7795_v43  ;;  %v3496_v50 = vmul.f32 %v5484_v14, %v9081_v4 }
 0xca0   : > { %v5486_v18 = vpop.eup %5485 }
 0xca1   : > { %3571 = vmatpush1.bf16.xpose.msra.mxu1 %v3538_v58  ;;  %v3499_v57 = vmul.f32 %v5486_v18, %v9076_v9  ;;  %v3498_v1 = vmul.f32 %v5486_v18, %v9077_v20 }
 0xca2   : > { %3621 = vxpose.xlu0.c.b16.start.end [1/1] (short) %v9080_v21, 128  ;;  %v9089_v21 = vld [vmem:[#allocation30_spill] sm:$0xff] }
 0xca3   : > { %v3541_v47 = vpack.c.bf16 %v3499_v57, %v3497_v5  ;;  %v3540_v55 = vpack.c.bf16 %v3498_v1, %v3496_v50  ;;  %v9092_v50 = vld [vmem:[#allocation49_spill] sm:$0xff] }
 0xca5   : > { %3572 = vmatprep.subr.bf16.mxu1 %v3541_v47  ;;  %v9090_v47 = vld [vmem:[#allocation40_spill] sm:$0xff] }
 0xca6   : > { %v5488_v16 = vpop.eup %5487  ;;  %v9091_v4 = vpack.c.bf16 %v9089_v21, %v9090_v47 }
 0xca7   : > { %v3501_v63 = vmul.f32 %v5488_v16, %v9082_v59  ;;  %v3500_v22 = vmul.f32 %v5488_v16, %v9085_v25 }
 0xca8   : > { %v5490_v24 = vpop.eup %5489 }
 0xca9   : > { %3573 = vmatpush1.bf16.xpose.msra.mxu1 %v3540_v55  ;;  %v3503_v43 = vmul.f32 %v5490_v24, %v9083_v52  ;;  %v3502_v26 = vmul.f32 %v5490_v24, %v9084_v3 }
 0xcab   : > { %v3543_v46 = vpack.c.bf16 %v3503_v43, %v3501_v63  ;;  %v3542_v35 = vpack.c.bf16 %v3502_v26, %v3500_v22 }
 0xcad   : > { %3574 = vmatprep.subr.bf16.mxu1 %v3543_v46 }
 0xcb1   : > { %3575 = vmatpush1.bf16.xpose.msra.mxu1 %v3542_v35 }
 0xce7   : > { %v3402_v27 = vpop.xlane.xlu1 %3401 }
 0xce8   : > { %5491 = vrcp.f32 %v3402_v27 }
 0xcea   : > { %v3405_v54 = vpop.xlane.xlu0 %3404 }
 0xceb   : > { %5493 = vrcp.f32 %v3405_v54 }
 0xcef   : > { %v3408_v7 = vpop.xlane.xlu1 %3407 }
 0xcf0   : > { %5495 = vrcp.f32 %v3408_v7 }
 0xcf2   : > { %v3411_v33 = vpop.xlane.xlu0 %3410  ;;  %v5492_v34 = vpop.eup %5491 }
 0xcf3   : > { %5497 = vrcp.f32 %v3411_v33  ;;  %v3505_v28 = vmul.f32 %v5492_v34, %v7831_v41  ;;  %v3504_v62 = vmul.f32 %v5492_v34, %v7829_v51 }
 0xcf5   : > { %v5494_v2 = vpop.eup %5493 }
 0xcf6   : > { %v3507_v30 = vmul.f32 %v5494_v2, %v7839_v15  ;;  %v3506_v11 = vmul.f32 %v5494_v2, %v7837_v12 }
 0xcf7   : > { %v3414_v32 = vpop.xlane.xlu1 %3413 }
 0xcf8   : > { %v3545_v56 = vpack.c.bf16 %v3507_v30, %v3505_v28  ;;  %v3544_v53 = vpack.c.bf16 %v3506_v11, %v3504_v62  ;;  %5499 = vrcp.f32 %v3414_v32 }
 0xcfa   : > { %3576 = vmatprep.subr.bf16.mxu1 %v3545_v56  ;;  %v3417_v13 = vpop.xlane.xlu0 %3416  ;;  %v5496_v36 = vpop.eup %5495 }
 0xcfb   : > { %5501 = vrcp.f32 %v3417_v13  ;;  %3577 = vmatpush1.bf16.xpose.msra.mxu1 %v3544_v53  ;;  %v3509_v8 = vmul.f32 %v5496_v36, %v7851_v0  ;;  %v3508_v15 = vmul.f32 %v5496_v36, %v7849_v39 }
 0xcfd   : > { %v5498_v23 = vpop.eup %5497 }
 0xcfe   : > { %v3511_v41 = vmul.f32 %v5498_v23, %v7859_v44  ;;  %v3510_v51 = vmul.f32 %v5498_v23, %v7857_v31 }
 0xcff   : > { %v3420_v61 = vpop.xlane.xlu1 %3419 }
 0xd00   : > { %v3547_v12 = vpack.c.bf16 %v3511_v41, %v3509_v8  ;;  %v3546_v58 = vpack.c.bf16 %v3510_v51, %v3508_v15  ;;  %5503 = vrcp.f32 %v3420_v61 }
 0xd02   : > { %3578 = vmatprep.subr.bf16.mxu1 %v3547_v12  ;;  %v3423_v14 = vpop.xlane.xlu0 %3422  ;;  %v5500_v6 = vpop.eup %5499 }
 0xd03   : > { %5505 = vrcp.f32 %v3423_v14  ;;  %3579 = vmatpush1.bf16.xpose.msra.mxu1 %v3546_v58  ;;  %v3513_v45 = vmul.f32 %v5500_v6, %v7871_v42  ;;  %v3512_v44 = vmul.f32 %v5500_v6, %v7869_v37  ;;  %v9086_v37 = vld [vmem:[#allocation41_spill] sm:$0xff] }
 0xd05   : > { %v5502_v17 = vpop.eup %5501 }
 0xd06   : > { %v3515_v0 = vmul.f32 %v5502_v17, %v7877_v48  ;;  %v3514_v39 = vmul.f32 %v5502_v17, %v7875_v40  ;;  %v9087_v40 = vld [vmem:[#allocation48_spill] sm:$0xff] }
 0xd07   : > { %v9088_v49 = vpack.c.bf16 %v9086_v37, %v9087_v40 }
 0xd08   : > { %v3549_v18 = vpack.c.bf16 %v3515_v0, %v3513_v45  ;;  %v3548_v31 = vpack.c.bf16 %v3514_v39, %v3512_v44  ;;  %v3629_v3 = vpop.trf.xlu0 }
 0xd0a   : > { %3580 = vmatprep.subr.bf16.mxu1 %v3549_v18  ;;  %v5504_v5 = vpop.eup %5503 }
 0xd0b   : > { %3581 = vmatpush1.bf16.xpose.msra.mxu1 %v3548_v31  ;;  %v3517_v57 = vmul.f32 %v5504_v5, %v7887_v60  ;;  %v3516_v1 = vmul.f32 %v5504_v5, %v7885_v38  ;;  %v9093_v60 = vld [vmem:[#allocation47_spill] sm:$0xff]  ;;  %v3613_v38 = vpop.trf.xlu1 }
 0xd0c   : > { %v9094_v55 = vpack.c.bf16 %v9092_v50, %v9093_v60  ;;  %v3630_v26 = vpop.trf.xlu0 }
 0xd0d   : > { %v5506_v9 = vpop.eup %5505 }
 0xd0e   : > { %v3519_v20 = vmul.f32 %v5506_v9, %v7893_v19  ;;  %v3518_v42 = vmul.f32 %v5506_v9, %v7891_v10  ;;  %v9095_v19 = vmov 0  }
 0xd0f   : > { %v3614_v10 = vpop.trf.xlu1 }
 0xd10   : > { %v3551_v29 = vpack.c.bf16 %v3519_v20, %v3517_v57  ;;  %v3550_v48 = vpack.c.bf16 %v3518_v42, %v3516_v1  ;;  %v3631_v46 = vpop.trf.xlu0 }
 0xd12   : > { %3582 = vmatprep.subr.bf16.mxu1 %v3551_v29 }
 0xd13   : > { %3583 = vmatpush1.bf16.xpose.msra.mxu1 %v3550_v48  ;;  %v3615_v16 = vpop.trf.xlu1 }
 0xd14   : > { %3685 = vmatprep.subr.bf16.mxu1 %v9088_v49  ;;  %v3632_v25 = vpop.trf.xlu0 }
 0xd17   : > { %v3616_v24 = vpop.trf.xlu1 }
 0xd18   : > { %v3633_v22 = vpop.trf.xlu0 }
 0xd1a   : > { %3585 = vmatmul.mubr.bf16.vlgmr.msra.gmra.mrb[116].mxu1 %v9091_v4 }
 0xd1b   : > { %3686 = vmatpush1.bf16.msra.mxu1 %v9094_v55  ;;  %3717 = vmatprep.mubr.bf16.mxu1 %v9095_v19  ;;  %v3617_v59 = vpop.trf.xlu1 }
 0xd1c   : > { %v3634_v35 = vpop.trf.xlu0 }
 0xd1f   : > { %v3618_v63 = vpop.trf.xlu1 }
 0xd20   : > { %v3635_v27 = vpop.trf.xlu0 }
 0xd22   : > { %4798 = vmatmul.mubr.msk.bf16.vlgmr.msra.gmra.mrb[120].mxu1 %vm1122_vm2, %v3613_v38 }
 0xd23   : > { %3727 = vmatprep.mubr.bf16.mxu1 %v9095_v19  ;;  %v3619_v52 = vpop.trf.xlu1 }
 0xd24   : > { %v3636_v54 = vpop.trf.xlu0 }
 0xd27   : > { %v3620_v43 = vpop.trf.xlu1 }
 0xd2a   : > { %4799 = vmatmul.mubr.msk.bf16.gmra.mrb[124].mxu1 %vm1122_vm2, %v3614_v10 }
 0xd2b   : > { %3737 = vmatprep.mubr.bf16.mxu1 %v9095_v19 }
 0xd32   : > { %4800 = vmatmul.mubr.msk.bf16.gmra.mrb[128].mxu1 %vm1122_vm2, %v3615_v16 }
 0xd33   : > { %3747 = vmatprep.mubr.bf16.mxu1 %v9095_v19 }
 0xd3a   : > { %4801 = vmatmul.mubr.msk.bf16.gmra.mrb[132].mxu1 %vm1122_vm2, %v3616_v24 }
 0xd3b   : > { %3757 = vmatprep.mubr.bf16.mxu1 %v9095_v19 }
 0xd42   : > { %4802 = vmatmul.mubr.msk.bf16.gmra.mrb[136].mxu1 %vm1122_vm2, %v3617_v59 }
 0xd43   : > { %3767 = vmatprep.mubr.bf16.mxu1 %v9095_v19 }
 0xd4a   : > { %4803 = vmatmul.mubr.msk.bf16.gmra.mrb[140].mxu1 %vm1122_vm2, %v3618_v63 }
 0xd4b   : > { %3777 = vmatprep.mubr.bf16.mxu1 %v9095_v19 }
 0xd52   : > { %4804 = vmatmul.mubr.msk.bf16.gmra.mrb[144].mxu1 %vm1122_vm2, %v3619_v52 }
 0xd53   : > { %3787 = vmatprep.mubr.bf16.mxu1 %v9095_v19 }
 0xd5a   : > { %4805 = vmatmul.mubr.msk.bf16.gmra.mrb[148].mxu1 %vm1122_vm2, %v3620_v43 }
 0xd5b   : > { %3797 = vmatprep.mubr.bf16.mxu1 %v9095_v19 }
 0xd62   : > { %4806 = vmatmul.mubr.msk.bf16.gmra.mrb[152].mxu1 %vm1122_vm2, %v3629_v3 }
 0xd63   : > { %3807 = vmatprep.mubr.bf16.mxu1 %v9095_v19 }
 0xd6a   : > { %4807 = vmatmul.mubr.msk.bf16.gmra.mrb[156].mxu1 %vm1122_vm2, %v3630_v26 }
 0xd6b   : > { %3817 = vmatprep.mubr.bf16.mxu1 %v9095_v19 }
 0xd72   : > { %4808 = vmatmul.mubr.msk.bf16.gmra.mrb[160].mxu1 %vm1122_vm2, %v3631_v46 }
 0xd73   : > { %3827 = vmatprep.mubr.bf16.mxu1 %v9095_v19 }
 0xd7a   : > { %4809 = vmatmul.mubr.msk.bf16.gmra.mrb[164].mxu1 %vm1122_vm2, %v3632_v25 }
 0xd7b   : > { %3837 = vmatprep.mubr.bf16.mxu1 %v9095_v19 }
 0xd82   : > { %4810 = vmatmul.mubr.msk.bf16.gmra.mrb[168].mxu1 %vm1122_vm2, %v3633_v22 }
 0xd83   : > { %3847 = vmatprep.mubr.bf16.mxu1 %v9095_v19 }
 0xd8a   : > { %4811 = vmatmul.mubr.msk.bf16.gmra.mrb[172].mxu1 %vm1122_vm2, %v3634_v35 }
 0xd8b   : > { %3857 = vmatprep.mubr.bf16.mxu1 %v9095_v19 }
 0xd92   : > { %4812 = vmatmul.mubr.msk.bf16.gmra.mrb[176].mxu1 %vm1122_vm2, %v3635_v27 }
 0xd93   : > { %3867 = vmatprep.mubr.bf16.mxu1 %v9095_v19 }
 0xd9a   : > { %4813 = vmatmul.mubr.msk.bf16.gmra.mrb[180].mxu1 %vm1122_vm2, %v3636_v54 }
 0xded   : > { %v7992_v7 = vpop.f32.mrb[116].mxu1 }
 0xdee   : > { %9096 = vst [vmem:[#allocation52_spill] sm:$0xff] %v7992_v7  ;;  %v7994_v33 = vpop.f32.mrb[117].mxu1 }
 0xdef   : > { %9097 = vst [vmem:[#allocation51_spill] sm:$0xff] %v7994_v33  ;;  %v7996_v34 = vpop.f32.mrb[118].mxu1 }
 0xdf0   : > { %9098 = vst [vmem:[#allocation23_spill] sm:$0xff] %v7996_v34  ;;  %v8000_v28 = vpop.f32.mrb[119].mxu1 }
 0xdf1   : > { %9099 = vst [vmem:[#allocation21_spill] sm:$0xff] %v8000_v28 }
 0xdf5   : > { %v8004_v62 = vpop.f32.mrb[120].mxu1 }
 0xdf6   : > { %v8006_v11 = vpop.f32.mrb[121].mxu1 }
 0xdf7   : > { %v3878_v32 = vmax.f32 %v8004_v62, %v8006_v11  ;;  %v8010_v56 = vpop.f32.mrb[122].mxu1 }
 0xdf8   : > { %v8012_v53 = vpop.f32.mrb[123].mxu1 }
 0xdf9   : > { %v3881_v13 = vmax.f32 %v8010_v56, %v8012_v53  ;;  %3879 = vmax.xlane.f32.xlu1 %v3878_v32 }
 0xdfb   : > { %3882 = vmax.xlane.f32.xlu0 %v3881_v13 }
 0xdfd   : > { %v8016_v36 = vpop.f32.mrb[124].mxu1 }
 0xdfe   : > { %v8018_v23 = vpop.f32.mrb[125].mxu1 }
 0xdff   : > { %v3884_v8 = vmax.f32 %v8016_v36, %v8018_v23  ;;  %v8022_v41 = vpop.f32.mrb[126].mxu1 }
 0xe00   : > { %v8024_v15 = vpop.f32.mrb[127].mxu1 }
 0xe01   : > { %v3887_v51 = vmax.f32 %v8022_v41, %v8024_v15  ;;  %3885 = vmax.xlane.f32.xlu1 %v3884_v8 }
 0xe03   : > { %3888 = vmax.xlane.f32.xlu0 %v3887_v51 }
 0xe05   : > { %v8028_v61 = vpop.f32.mrb[128].mxu1 }
 0xe06   : > { %v8030_v12 = vpop.f32.mrb[129].mxu1 }
 0xe07   : > { %v3890_v58 = vmax.f32 %v8028_v61, %v8030_v12  ;;  %v8034_v14 = vpop.f32.mrb[130].mxu1 }
 0xe08   : > { %v8036_v6 = vpop.f32.mrb[131].mxu1 }
 0xe09   : > { %v3893_v17 = vmax.f32 %v8034_v14, %v8036_v6  ;;  %3891 = vmax.xlane.f32.xlu1 %v3890_v58 }
 0xe0b   : > { %3894 = vmax.xlane.f32.xlu0 %v3893_v17 }
 0xe0d   : > { %v8040_v45 = vpop.f32.mrb[132].mxu1 }
 0xe0e   : > { %v8042_v0 = vpop.f32.mrb[133].mxu1 }
 0xe0f   : > { %v3896_v44 = vmax.f32 %v8040_v45, %v8042_v0  ;;  %v8046_v39 = vpop.f32.mrb[134].mxu1 }
 0xe10   : > { %v8048_v18 = vpop.f32.mrb[135].mxu1 }
 0xe11   : > { %v3899_v31 = vmax.f32 %v8046_v39, %v8048_v18  ;;  %3897 = vmax.xlane.f32.xlu1 %v3896_v44 }
 0xe13   : > { %3900 = vmax.xlane.f32.xlu0 %v3899_v31 }
 0xe15   : > { %v8052_v5 = vpop.f32.mrb[136].mxu1 }
 0xe16   : > { %v8054_v9 = vpop.f32.mrb[137].mxu1 }
 0xe17   : > { %v3902_v57 = vmax.f32 %v8052_v5, %v8054_v9  ;;  %v8058_v20 = vpop.f32.mrb[138].mxu1 }
 0xe18   : > { %v8060_v1 = vpop.f32.mrb[139].mxu1 }
 0xe19   : > { %v3905_v42 = vmax.f32 %v8058_v20, %v8060_v1  ;;  %3903 = vmax.xlane.f32.xlu1 %v3902_v57 }
 0xe1b   : > { %3906 = vmax.xlane.f32.xlu0 %v3905_v42 }
 0xe1d   : > { %v8064_v29 = vpop.f32.mrb[140].mxu1 }
 0xe1e   : > { %v8066_v48 = vpop.f32.mrb[141].mxu1 }
 0xe1f   : > { %v3908_v37 = vmax.f32 %v8064_v29, %v8066_v48  ;;  %v8070_v40 = vpop.f32.mrb[142].mxu1 }
 0xe20   : > { %v8072_v49 = vpop.f32.mrb[143].mxu1 }
 0xe21   : > { %v3911_v21 = vmax.f32 %v8070_v40, %v8072_v49  ;;  %3909 = vmax.xlane.f32.xlu1 %v3908_v37 }
 0xe23   : > { %3912 = vmax.xlane.f32.xlu0 %v3911_v21 }
 0xe25   : > { %v8076_v47 = vpop.f32.mrb[144].mxu1 }
 0xe26   : > { %v8078_v4 = vpop.f32.mrb[145].mxu1 }
 0xe27   : > { %v3914_v50 = vmax.f32 %v8076_v47, %v8078_v4  ;;  %v8082_v60 = vpop.f32.mrb[146].mxu1 }
 0xe28   : > { %v8084_v55 = vpop.f32.mrb[147].mxu1 }
 0xe29   : > { %v3917_v38 = vmax.f32 %v8082_v60, %v8084_v55  ;;  %3915 = vmax.xlane.f32.xlu1 %v3914_v50 }
 0xe2b   : > { %3918 = vmax.xlane.f32.xlu0 %v3917_v38 }
 0xe2d   : > { %v8088_v10 = vpop.f32.mrb[148].mxu1 }
 0xe2e   : > { %v8090_v16 = vpop.f32.mrb[149].mxu1 }
 0xe2f   : > { %v3920_v24 = vmax.f32 %v8088_v10, %v8090_v16  ;;  %v8094_v59 = vpop.f32.mrb[150].mxu1 }
 0xe30   : > { %v8096_v63 = vpop.f32.mrb[151].mxu1 }
 0xe31   : > { %v3923_v52 = vmax.f32 %v8094_v59, %v8096_v63  ;;  %3921 = vmax.xlane.f32.xlu1 %v3920_v24 }
 0xe33   : > { %3924 = vmax.xlane.f32.xlu0 %v3923_v52 }
 0xe35   : > { %v8100_v43 = vpop.f32.mrb[152].mxu1 }
 0xe36   : > { %v8102_v3 = vpop.f32.mrb[153].mxu1 }
 0xe37   : > { %v3926_v26 = vmax.f32 %v8100_v43, %v8102_v3  ;;  %v8106_v46 = vpop.f32.mrb[154].mxu1 }
 0xe38   : > { %v8108_v25 = vpop.f32.mrb[155].mxu1 }
 0xe39   : > { %9100 = vst [vmem:[#allocation50_spill] sm:$0xff] %v8108_v25  ;;  %v3929_v22 = vmax.f32 %v8106_v46, %v8108_v25  ;;  %3927 = vmax.xlane.f32.xlu1 %v3926_v26 }
 0xe3b   : > { %3930 = vmax.xlane.f32.xlu0 %v3929_v22 }
 0xe3d   : > { %v8112_v35 = vpop.f32.mrb[156].mxu1 }
 0xe3e   : > { %9101 = vst [vmem:[#allocation54_spill] sm:$0xff] %v8112_v35  ;;  %v8114_v27 = vpop.f32.mrb[157].mxu1 }
 0xe3f   : > { %9102 = vst [vmem:[#allocation56_spill] sm:$0xff] %v8114_v27  ;;  %v3932_v54 = vmax.f32 %v8112_v35, %v8114_v27  ;;  %v8118_v32 = vpop.f32.mrb[158].mxu1 }
 0xe40   : > { %9103 = vst [vmem:[#allocation55_spill] sm:$0xff] %v8118_v32  ;;  %v8120_v13 = vpop.f32.mrb[159].mxu1 }
 0xe41   : > { %9104 = vst [vmem:[#allocation44_spill] sm:$0xff] %v8120_v13  ;;  %v3935_v8 = vmax.f32 %v8118_v32, %v8120_v13  ;;  %3933 = vmax.xlane.f32.xlu1 %v3932_v54 }
 0xe43   : > { %3936 = vmax.xlane.f32.xlu0 %v3935_v8 }
 0xe45   : > { %v8124_v51 = vpop.f32.mrb[160].mxu1 }
 0xe46   : > { %9105 = vst [vmem:[#allocation46_spill] sm:$0xff] %v8124_v51  ;;  %v8126_v58 = vpop.f32.mrb[161].mxu1 }
 0xe47   : > { %9106 = vst [vmem:[#allocation53_spill] sm:$0xff] %v8126_v58  ;;  %v3938_v17 = vmax.f32 %v8124_v51, %v8126_v58  ;;  %v8130_v44 = vpop.f32.mrb[162].mxu1 }
 0xe48   : > { %9107 = vst [vmem:[#allocation28_spill] sm:$0xff] %v8130_v44  ;;  %v8132_v31 = vpop.f32.mrb[163].mxu1 }
 0xe49   : > { %9108 = vst [vmem:[#allocation43_spill] sm:$0xff] %v8132_v31  ;;  %v3941_v57 = vmax.f32 %v8130_v44, %v8132_v31  ;;  %3939 = vmax.xlane.f32.xlu1 %v3938_v17 }
 0xe4b   : > { %3942 = vmax.xlane.f32.xlu0 %v3941_v57 }
 0xe4d   : > { %v8136_v42 = vpop.f32.mrb[164].mxu1 }
 0xe4e   : > { %9109 = vst [vmem:[#allocation45_spill] sm:$0xff] %v8136_v42  ;;  %v8138_v37 = vpop.f32.mrb[165].mxu1 }
 0xe4f   : > { %9110 = vst [vmem:[#allocation42_spill] sm:$0xff] %v8138_v37  ;;  %v3944_v21 = vmax.f32 %v8136_v42, %v8138_v37  ;;  %v8142_v50 = vpop.f32.mrb[166].mxu1 }
 0xe50   : > { %9111 = vst [vmem:[#allocation26_spill] sm:$0xff] %v8142_v50  ;;  %v8144_v38 = vpop.f32.mrb[167].mxu1 }
 0xe51   : > { %9112 = vst [vmem:[#allocation24_spill] sm:$0xff] %v8144_v38  ;;  %v3947_v24 = vmax.f32 %v8142_v50, %v8144_v38  ;;  %3945 = vmax.xlane.f32.xlu1 %v3944_v21 }
 0xe53   : > { %3948 = vmax.xlane.f32.xlu0 %v3947_v24 }
 0xe55   : > { %v8148_v52 = vpop.f32.mrb[168].mxu1 }
 0xe56   : > { %v8150_v26 = vpop.f32.mrb[169].mxu1 }
 0xe57   : > { %v8154_v54 = vpop.f32.mrb[170].mxu1 }
 0xe58   : > { %v8156_v8 = vpop.f32.mrb[171].mxu1 }
 0xe5d   : > { %v8160_v57 = vpop.f32.mrb[172].mxu1 }
 0xe5e   : > { %v8162_v2 = vpop.f32.mrb[173].mxu1 }
 0xe5f   : > { %v8166_v24 = vpop.f32.mrb[174].mxu1 }
 0xe60   : > { %v8168_v30 = vpop.f32.mrb[175].mxu1 }
 0xe65   : > { %v8172_v7 = vpop.f32.mrb[176].mxu1 }
 0xe66   : > { %v8174_v34 = vpop.f32.mrb[177].mxu1 }
 0xe67   : > { %v8178_v33 = vpop.f32.mrb[178].mxu1 }
 0xe68   : > { %v8180_v28 = vpop.f32.mrb[179].mxu1 }
 0xe6d   : > { %v8184_v19 = vpop.f32.mrb[180].mxu1 }
 0xe6e   : > { %v8186_v38 = vpop.f32.mrb[181].mxu1 }
 0xe6f   : > { %v8190_v50 = vpop.f32.mrb[182].mxu1 }
 0xe70   : > { %v8192_v37 = vpop.f32.mrb[183].mxu1 }
 0xe86   : > { %v3880_v42 = vpop.xlane.xlu1 %3879 }
 0xe87   : > { %v3974_v31 = vsub.f32 %v8004_v62, %v3880_v42  ;;  %v3975_v44 = vsub.f32 %v8006_v11, %v3880_v42 }
 0xe88   : > { %v3883_v21 = vpop.xlane.xlu0 %3882 }
 0xe89   : > { %v4038_v58 = vmul.f32 1.442695, %v3974_v31  ;;  %v4040_v51 = vmul.f32 1.442695, %v3975_v44  ;;  %v3976_v13 = vsub.f32 %v8010_v56, %v3883_v21  ;;  %v3977_v32 = vsub.f32 %v8012_v53, %v3883_v21 }
 0xe8b   : > { %5507 = vpow2.f32 %v4038_v58  ;;  %v4042_v22 = vmul.f32 1.442695, %v3976_v13  ;;  %v4044_v27 = vmul.f32 1.442695, %v3977_v32 }
 0xe8c   : > { %5509 = vpow2.f32 %v4040_v51 }
 0xe8d   : > { %5511 = vpow2.f32 %v4042_v22 }
 0xe8e   : > { %5513 = vpow2.f32 %v4044_v27  ;;  %v3886_v35 = vpop.xlane.xlu1 %3885 }
 0xe8f   : > { %v3978_v17 = vsub.f32 %v8016_v36, %v3886_v35  ;;  %v3979_v62 = vsub.f32 %v8018_v23, %v3886_v35 }
 0xe90   : > { %v3889_v25 = vpop.xlane.xlu0 %3888 }
 0xe91   : > { %v4046_v11 = vmul.f32 1.442695, %v3978_v17  ;;  %v4048_v42 = vmul.f32 1.442695, %v3979_v62  ;;  %v3980_v44 = vsub.f32 %v8022_v41, %v3889_v25  ;;  %v3981_v56 = vsub.f32 %v8024_v15, %v3889_v25 }
 0xe93   : > { %5515 = vpow2.f32 %v4046_v11  ;;  %v4050_v53 = vmul.f32 1.442695, %v3980_v44  ;;  %v4052_v58 = vmul.f32 1.442695, %v3981_v56  ;;  %v9113_v11 = vmax.f32 %v8148_v52, %v8150_v26 }
 0xe94   : > { %5517 = vpow2.f32 %v4048_v42 }
 0xe95   : > { %v8204_v32 = vpop.eup %5507  ;;  %5519 = vpow2.f32 %v4050_v53 }
 0xe96   : > { %v8206_v27 = vpop.eup %5509  ;;  %5521 = vpow2.f32 %v4052_v58  ;;  %v3892_v36 = vpop.xlane.xlu1 %3891 }
 0xe97   : > { %v8208_v13 = vpop.eup %5511  ;;  %v3982_v23 = vsub.f32 %v8028_v61, %v3892_v36  ;;  %v3983_v35 = vsub.f32 %v8030_v12, %v3892_v36  ;;  %v4166_v41 = vadd.f32 %v8206_v27, %v8204_v32  ;;  %v9114_v36 = vmax.f32 %v8154_v54, %v8156_v8 }
 0xe98   : > { %v8214_v15 = vpop.eup %5513  ;;  %v3895_v25 = vpop.xlane.xlu0 %3894 }
 0xe99   : > { %v4054_v51 = vmul.f32 1.442695, %v3982_v23  ;;  %v4056_v31 = vmul.f32 1.442695, %v3983_v35  ;;  %4167 = vadd.xlane.f32.xlu1 %v4166_v41  ;;  %v3984_v22 = vsub.f32 %v8034_v14, %v3895_v25  ;;  %v3985_v17 = vsub.f32 %v8036_v6, %v3895_v25 }
 0xe9a   : > { %v4169_v21 = vadd.f32 %v8214_v15, %v8208_v13 }
 0xe9b   : > { %5523 = vpow2.f32 %v4054_v51  ;;  %v4058_v61 = vmul.f32 1.442695, %v3984_v22  ;;  %v4060_v62 = vmul.f32 1.442695, %v3985_v17  ;;  %v9115_v17 = vmax.f32 %v8160_v57, %v8162_v2 }
 0xe9c   : > { %5525 = vpow2.f32 %v4056_v31  ;;  %4170 = vadd.xlane.f32.xlu0 %v4169_v21 }
 0xe9d   : > { %v8220_v12 = vpop.eup %5515  ;;  %5527 = vpow2.f32 %v4058_v61  ;;  %3951 = vmax.xlane.f32.xlu1 %v9113_v11 }
 0xe9e   : > { %v8225_v42 = vpop.eup %5517  ;;  %5529 = vpow2.f32 %v4060_v62  ;;  %v3898_v14 = vpop.xlane.xlu1 %3897 }
 0xe9f   : > { %v8227_v6 = vpop.eup %5519  ;;  %v3986_v44 = vsub.f32 %v8040_v45, %v3898_v14  ;;  %v3987_v56 = vsub.f32 %v8042_v0, %v3898_v14  ;;  %v4172_v53 = vadd.f32 %v8225_v42, %v8220_v12 }
 0xea0   : > { %v8233_v58 = vpop.eup %5521  ;;  %3954 = vmax.xlane.f32.xlu0 %v9114_v36  ;;  %v3901_v23 = vpop.xlane.xlu0 %3900 }
 0xea1   : > { %v4062_v35 = vmul.f32 1.442695, %v3986_v44  ;;  %v4064_v41 = vmul.f32 1.442695, %v3987_v56  ;;  %4173 = vadd.xlane.f32.xlu1 %v4172_v53  ;;  %v3988_v25 = vsub.f32 %v8046_v39, %v3901_v23  ;;  %v3989_v51 = vsub.f32 %v8048_v18, %v3901_v23 }
 0xea2   : > { %v4175_v45 = vadd.f32 %v8233_v58, %v8227_v6  ;;  %v9116_v44 = vmax.f32 %v8166_v24, %v8168_v30 }
 0xea3   : > { %5531 = vpow2.f32 %v4062_v35  ;;  %v4066_v0 = vmul.f32 1.442695, %v3988_v25  ;;  %v4068_v31 = vmul.f32 1.442695, %v3989_v51  ;;  %v9117_v51 = vmax.f32 %v8172_v7, %v8174_v34 }
 0xea4   : > { %5533 = vpow2.f32 %v4064_v41  ;;  %4176 = vadd.xlane.f32.xlu0 %v4175_v45 }
 0xea5   : > { %v8242_v22 = vpop.eup %5523  ;;  %5535 = vpow2.f32 %v4066_v0  ;;  %3957 = vmax.xlane.f32.xlu1 %v9115_v17 }
 0xea6   : > { %v8247_v21 = vpop.eup %5525  ;;  %5537 = vpow2.f32 %v4068_v31  ;;  %v3904_v39 = vpop.xlane.xlu1 %3903 }
 0xea7   : > { %v8249_v18 = vpop.eup %5527  ;;  %v3990_v61 = vsub.f32 %v8052_v5, %v3904_v39  ;;  %v3991_v62 = vsub.f32 %v8054_v9, %v3904_v39  ;;  %v4178_v11 = vadd.f32 %v8247_v21, %v8242_v22 }
 0xea8   : > { %v8255_v14 = vpop.eup %5529  ;;  %3960 = vmax.xlane.f32.xlu0 %v9116_v44  ;;  %v3907_v56 = vpop.xlane.xlu0 %3906 }
 0xea9   : > { %v4070_v53 = vmul.f32 1.442695, %v3990_v61  ;;  %v4072_v36 = vmul.f32 1.442695, %v3991_v62  ;;  %4179 = vadd.xlane.f32.xlu1 %v4178_v11  ;;  %v3992_v23 = vsub.f32 %v8058_v20, %v3907_v56  ;;  %v3993_v35 = vsub.f32 %v8060_v1, %v3907_v56 }
 0xeaa   : > { %v4181_v5 = vadd.f32 %v8255_v14, %v8249_v18  ;;  %v9118_v61 = vmax.f32 %v8178_v33, %v8180_v28 }
 0xeab   : > { %5539 = vpow2.f32 %v4070_v53  ;;  %v4074_v9 = vmul.f32 1.442695, %v3992_v23  ;;  %v4076_v41 = vmul.f32 1.442695, %v3993_v35  ;;  %v9119_v35 = vmax.f32 %v8184_v19, %v8186_v38 }
 0xeac   : > { %5541 = vpow2.f32 %v4072_v36  ;;  %4182 = vadd.xlane.f32.xlu0 %v4181_v5 }
 0xead   : > { %v8264_v25 = vpop.eup %5531  ;;  %5543 = vpow2.f32 %v4074_v9  ;;  %3963 = vmax.xlane.f32.xlu1 %v9117_v51 }
 0xeae   : > { %v8269_v45 = vpop.eup %5533  ;;  %5545 = vpow2.f32 %v4076_v41  ;;  %v3910_v20 = vpop.xlane.xlu1 %3909 }
 0xeaf   : > { %v8271_v1 = vpop.eup %5535  ;;  %v3994_v0 = vsub.f32 %v8064_v29, %v3910_v20  ;;  %v3995_v31 = vsub.f32 %v8066_v48, %v3910_v20  ;;  %v4184_v17 = vadd.f32 %v8269_v45, %v8264_v25 }
 0xeb0   : > { %v8277_v39 = vpop.eup %5537  ;;  %3966 = vmax.xlane.f32.xlu0 %v9118_v61  ;;  %v3913_v62 = vpop.xlane.xlu0 %3912 }
 0xeb1   : > { %v4078_v11 = vmul.f32 1.442695, %v3994_v0  ;;  %v4080_v44 = vmul.f32 1.442695, %v3995_v31  ;;  %4185 = vadd.xlane.f32.xlu1 %v4184_v17  ;;  %v3996_v56 = vsub.f32 %v8070_v40, %v3913_v62  ;;  %v3997_v53 = vsub.f32 %v8072_v49, %v3913_v62 }
 0xeb2   : > { %v4187_v29 = vadd.f32 %v8277_v39, %v8271_v1  ;;  %v9120_v0 = vmax.f32 %v8190_v50, %v8192_v37 }
 0xeb3   : > { %5547 = vpow2.f32 %v4078_v11  ;;  %v4082_v48 = vmul.f32 1.442695, %v3996_v56  ;;  %v4084_v36 = vmul.f32 1.442695, %v3997_v53 }
 0xeb4   : > { %5549 = vpow2.f32 %v4080_v44  ;;  %4188 = vadd.xlane.f32.xlu0 %v4187_v29 }
 0xeb5   : > { %v8286_v23 = vpop.eup %5539  ;;  %5551 = vpow2.f32 %v4082_v48  ;;  %3969 = vmax.xlane.f32.xlu1 %v9119_v35 }
 0xeb6   : > { %v8291_v5 = vpop.eup %5541  ;;  %5553 = vpow2.f32 %v4084_v36  ;;  %v3916_v40 = vpop.xlane.xlu1 %3915 }
 0xeb7   : > { %v8293_v49 = vpop.eup %5543  ;;  %v3998_v9 = vsub.f32 %v8076_v47, %v3916_v40  ;;  %v3999_v41 = vsub.f32 %v8078_v4, %v3916_v40  ;;  %v4190_v51 = vadd.f32 %v8291_v5, %v8286_v23 }
 0xeb8   : > { %v8299_v20 = vpop.eup %5545  ;;  %3972 = vmax.xlane.f32.xlu0 %v9120_v0  ;;  %v3919_v31 = vpop.xlane.xlu0 %3918 }
 0xeb9   : > { %v4086_v17 = vmul.f32 1.442695, %v3998_v9  ;;  %v4088_v61 = vmul.f32 1.442695, %v3999_v41  ;;  %4191 = vadd.xlane.f32.xlu1 %v4190_v51  ;;  %v4000_v62 = vsub.f32 %v8082_v60, %v3919_v31  ;;  %v4001_v11 = vsub.f32 %v8084_v55, %v3919_v31 }
 0xeba   : > { %v4193_v47 = vadd.f32 %v8299_v20, %v8293_v49 }
 0xebb   : > { %5555 = vpow2.f32 %v4086_v17  ;;  %v4090_v4 = vmul.f32 1.442695, %v4000_v62  ;;  %v4092_v44 = vmul.f32 1.442695, %v4001_v11 }
 0xebc   : > { %5557 = vpow2.f32 %v4088_v61  ;;  %4194 = vadd.xlane.f32.xlu0 %v4193_v47 }
 0xebd   : > { %v8308_v56 = vpop.eup %5547  ;;  %5559 = vpow2.f32 %v4090_v4 }
 0xebe   : > { %v8310_v53 = vpop.eup %5549  ;;  %5561 = vpow2.f32 %v4092_v44  ;;  %v3922_v29 = vpop.xlane.xlu1 %3921 }
 0xebf   : > { %v8312_v48 = vpop.eup %5551  ;;  %v4002_v60 = vsub.f32 %v8088_v10, %v3922_v29  ;;  %v4003_v55 = vsub.f32 %v8090_v16, %v3922_v29  ;;  %v4196_v36 = vadd.f32 %v8310_v53, %v8308_v56 }
 0xec0   : > { %v8318_v35 = vpop.eup %5553  ;;  %v3925_v40 = vpop.xlane.xlu0 %3924 }
 0xec1   : > { %v4094_v9 = vmul.f32 1.442695, %v4002_v60  ;;  %v4096_v41 = vmul.f32 1.442695, %v4003_v55  ;;  %4197 = vadd.xlane.f32.xlu1 %v4196_v36  ;;  %v4004_v51 = vsub.f32 %v8094_v59, %v3925_v40  ;;  %v4005_v0 = vsub.f32 %v8096_v63, %v3925_v40  ;;  %v9121_v36 = vld [vmem:[#allocation50_spill] sm:$0xff] }
 0xec2   : > { %v4199_v31 = vadd.f32 %v8318_v35, %v8312_v48 }
 0xec3   : > { %5563 = vpow2.f32 %v4094_v9  ;;  %v4098_v10 = vmul.f32 1.442695, %v4004_v51  ;;  %v4100_v17 = vmul.f32 1.442695, %v4005_v0 }
 0xec4   : > { %5565 = vpow2.f32 %v4096_v41  ;;  %4200 = vadd.xlane.f32.xlu0 %v4199_v31 }
 0xec5   : > { %v8324_v16 = vpop.eup %5555  ;;  %5567 = vpow2.f32 %v4098_v10 }
 0xec6   : > { %v8326_v61 = vpop.eup %5557  ;;  %5569 = vpow2.f32 %v4100_v17  ;;  %v3928_v62 = vpop.xlane.xlu1 %3927  ;;  %v9125_v17 = vld [vmem:[#allocation56_spill] sm:$0xff] }
 0xec7   : > { %v8328_v11 = vpop.eup %5559  ;;  %v4006_v59 = vsub.f32 %v8100_v43, %v3928_v62  ;;  %v4007_v63 = vsub.f32 %v8102_v3, %v3928_v62  ;;  %v4202_v47 = vadd.f32 %v8326_v61, %v8324_v16 }
 0xec8   : > { %v8334_v4 = vpop.eup %5561  ;;  %v3931_v44 = vpop.xlane.xlu0 %3930 }
 0xec9   : > { %v4102_v29 = vmul.f32 1.442695, %v4006_v59  ;;  %v4104_v60 = vmul.f32 1.442695, %v4007_v63  ;;  %4203 = vadd.xlane.f32.xlu1 %v4202_v47  ;;  %v4008_v55 = vsub.f32 %v8106_v46, %v3931_v44  ;;  %v4009_v40 = vsub.f32 %v9121_v36, %v3931_v44  ;;  %v9124_v46 = vld [vmem:[#allocation54_spill] sm:$0xff]  ;;  %v9128_v36 = vld [vmem:[#allocation44_spill] sm:$0xff] }
 0xeca   : > { %v4205_v9 = vadd.f32 %v8334_v4, %v8328_v11 }
 0xecb   : > { %5571 = vpow2.f32 %v4102_v29  ;;  %v4106_v43 = vmul.f32 1.442695, %v4008_v55  ;;  %v4108_v41 = vmul.f32 1.442695, %v4009_v40 }
 0xecc   : > { %5573 = vpow2.f32 %v4104_v60  ;;  %4206 = vadd.xlane.f32.xlu0 %v4205_v9  ;;  %v9127_v60 = vld [vmem:[#allocation55_spill] sm:$0xff] }
 0xecd   : > { %v8340_v3 = vpop.eup %5563  ;;  %5575 = vpow2.f32 %v4106_v43 }
 0xece   : > { %9122 = vst [vmem:[#allocation36_spill] sm:$0xff] %v8340_v3  ;;  %v8342_v51 = vpop.eup %5565  ;;  %5577 = vpow2.f32 %v4108_v41  ;;  %v3934_v0 = vpop.xlane.xlu1 %3933 }
 0xecf   : > { %v8344_v31 = vpop.eup %5567  ;;  %v4010_v10 = vsub.f32 %v9124_v46, %v3934_v0  ;;  %v4011_v62 = vsub.f32 %v9125_v17, %v3934_v0  ;;  %v4208_v59 = vadd.f32 %v8342_v51, %v8340_v3  ;;  %v9136_v3 = vld [vmem:[#allocation43_spill] sm:$0xff] }
 0xed0   : > { %9123 = vst [vmem:[#allocation31_spill] sm:$0xff] %v8344_v31  ;;  %v8350_v63 = vpop.eup %5569  ;;  %v3937_v47 = vpop.xlane.xlu0 %3936 }
 0xed1   : > { %9126 = vst [vmem:[#allocation27_spill] sm:$0xff] %v8350_v63  ;;  %v4110_v44 = vmul.f32 1.442695, %v4010_v10  ;;  %v4112_v29 = vmul.f32 1.442695, %v4011_v62  ;;  %4209 = vadd.xlane.f32.xlu1 %v4208_v59  ;;  %v4012_v55 = vsub.f32 %v9127_v60, %v3937_v47  ;;  %v4013_v40 = vsub.f32 %v9128_v36, %v3937_v47  ;;  %v9132_v62 = vld [vmem:[#allocation46_spill] sm:$0xff] }
 0xed2   : > { %v4211_v9 = vadd.f32 %v8350_v63, %v8344_v31  ;;  %v9133_v47 = vld [vmem:[#allocation53_spill] sm:$0xff] }
 0xed3   : > { %5579 = vpow2.f32 %v4110_v44  ;;  %v4114_v43 = vmul.f32 1.442695, %v4012_v55  ;;  %v4116_v41 = vmul.f32 1.442695, %v4013_v40 }
 0xed4   : > { %5581 = vpow2.f32 %v4112_v29  ;;  %4212 = vadd.xlane.f32.xlu0 %v4211_v9  ;;  %v9135_v9 = vld [vmem:[#allocation28_spill] sm:$0xff] }
 0xed5   : > { %v8356_v0 = vpop.eup %5571  ;;  %5583 = vpow2.f32 %v4114_v43 }
 0xed6   : > { %9129 = vst [vmem:[#allocation25_spill] sm:$0xff] %v8356_v0  ;;  %v8358_v46 = vpop.eup %5573  ;;  %5585 = vpow2.f32 %v4116_v41  ;;  %v3940_v10 = vpop.xlane.xlu1 %3939 }
 0xed7   : > { %9130 = vst [vmem:[#allocation18_spill] sm:$0xff] %v8358_v46  ;;  %v8360_v17 = vpop.eup %5575  ;;  %v4014_v59 = vsub.f32 %v9132_v62, %v3940_v10  ;;  %v4015_v60 = vsub.f32 %v9133_v47, %v3940_v10  ;;  %v4214_v44 = vadd.f32 %v8358_v46, %v8356_v0 }
 0xed8   : > { %9131 = vst [vmem:[#allocation37_spill] sm:$0xff] %v8360_v17  ;;  %v8366_v55 = vpop.eup %5577  ;;  %v3943_v29 = vpop.xlane.xlu0 %3942 }
 0xed9   : > { %9134 = vst [vmem:[#allocation20_spill] sm:$0xff] %v8366_v55  ;;  %v4118_v36 = vmul.f32 1.442695, %v4014_v59  ;;  %v4120_v40 = vmul.f32 1.442695, %v4015_v60  ;;  %4215 = vadd.xlane.f32.xlu1 %v4214_v44  ;;  %v4016_v43 = vsub.f32 %v9135_v9, %v3943_v29  ;;  %v4017_v41 = vsub.f32 %v9136_v3, %v3943_v29  ;;  %v9137_v44 = vld [vmem:[#allocation45_spill] sm:$0xff] }
 0xeda   : > { %v4217_v31 = vadd.f32 %v8366_v55, %v8360_v17  ;;  %v9138_v3 = vld [vmem:[#allocation42_spill] sm:$0xff]  ;;  %v9140_v17 = vld [vmem:[#allocation24_spill] sm:$0xff] }
 0xedb   : > { %5587 = vpow2.f32 %v4118_v36  ;;  %v4122_v62 = vmul.f32 1.442695, %v4016_v43  ;;  %v4124_v63 = vmul.f32 1.442695, %v4017_v41 }
 0xedc   : > { %5589 = vpow2.f32 %v4120_v40  ;;  %4218 = vadd.xlane.f32.xlu0 %v4217_v31 }
 0xedd   : > { %v8372_v10 = vpop.eup %5579  ;;  %5591 = vpow2.f32 %v4122_v62  ;;  %v9139_v62 = vld [vmem:[#allocation26_spill] sm:$0xff] }
 0xede   : > { %v8374_v47 = vpop.eup %5581  ;;  %5593 = vpow2.f32 %v4124_v63  ;;  %v3946_v59 = vpop.xlane.xlu1 %3945 }
 0xedf   : > { %v8376_v60 = vpop.eup %5583  ;;  %v4018_v9 = vsub.f32 %v9137_v44, %v3946_v59  ;;  %v4019_v29 = vsub.f32 %v9138_v3, %v3946_v59  ;;  %v4220_v36 = vadd.f32 %v8374_v47, %v8372_v10 }
 0xee0   : > { %v8382_v43 = vpop.eup %5585  ;;  %v3949_v40 = vpop.xlane.xlu0 %3948 }
 0xee1   : > { %v4126_v31 = vmul.f32 1.442695, %v4018_v9  ;;  %v4128_v41 = vmul.f32 1.442695, %v4019_v29  ;;  %4221 = vadd.xlane.f32.xlu1 %v4220_v36  ;;  %v4020_v0 = vsub.f32 %v9139_v62, %v3949_v40  ;;  %v4021_v63 = vsub.f32 %v9140_v17, %v3949_v40 }
 0xee2   : > { %v4223_v55 = vadd.f32 %v8382_v43, %v8376_v60 }
 0xee3   : > { %5595 = vpow2.f32 %v4126_v31  ;;  %v4130_v44 = vmul.f32 1.442695, %v4020_v0  ;;  %v4132_v46 = vmul.f32 1.442695, %v4021_v63 }
 0xee4   : > { %5597 = vpow2.f32 %v4128_v41  ;;  %4224 = vadd.xlane.f32.xlu0 %v4223_v55 }
 0xee5   : > { %v8388_v59 = vpop.eup %5587  ;;  %5599 = vpow2.f32 %v4130_v44 }
 0xee6   : > { %9141 = vst [vmem:[#allocation22_spill] sm:$0xff] %v8388_v59  ;;  %v8390_v3 = vpop.eup %5589  ;;  %5601 = vpow2.f32 %v4132_v46 }
 0xee7   : > { %v8392_v9 = vpop.eup %5591  ;;  %v4226_v29 = vadd.f32 %v8390_v3, %v8388_v59 }
 0xee8   : > { %9142 = vst [vmem:[#allocation38_spill] sm:$0xff] %v8392_v9  ;;  %v8396_v17 = vpop.eup %5593 }
 0xee9   : > { %9143 = vst [vmem:[#allocation41_spill] sm:$0xff] %v8396_v17  ;;  %4227 = vadd.xlane.f32.xlu1 %v4226_v29  ;;  %v4229_v0 = vadd.f32 %v8396_v17, %v8392_v9 }
 0xeeb   : > { %4230 = vadd.xlane.f32.xlu0 %v4229_v0 }
 0xeed   : > { %v8400_v36 = vpop.eup %5595 }
 0xeee   : > { %9144 = vst [vmem:[#allocation48_spill] sm:$0xff] %v8400_v36  ;;  %v8402_v55 = vpop.eup %5597 }
 0xeef   : > { %9145 = vst [vmem:[#allocation30_spill] sm:$0xff] %v8402_v55  ;;  %v8404_v40 = vpop.eup %5599  ;;  %v4232_v46 = vadd.f32 %v8402_v55, %v8400_v36 }
 0xef0   : > { %9146 = vst [vmem:[#allocation40_spill] sm:$0xff] %v8404_v40  ;;  %v8408_v31 = vpop.eup %5601 }
 0xef1   : > { %9147 = vst [vmem:[#allocation49_spill] sm:$0xff] %v8408_v31  ;;  %4233 = vadd.xlane.f32.xlu1 %v4232_v46  ;;  %v4235_v41 = vadd.f32 %v8408_v31, %v8404_v40 }
 0xef3   : > { %4236 = vadd.xlane.f32.xlu0 %v4235_v41 }
 0xf26   : > { %v4168_v62 = vpop.xlane.xlu1 %4167 }
 0xf27   : > { %5603 = vrcp.f32 %v4168_v62 }
 0xf29   : > { %v4171_v63 = vpop.xlane.xlu0 %4170 }
 0xf2a   : > { %5605 = vrcp.f32 %v4171_v63  ;;  %v3952_v44 = vpop.xlane.xlu1 %3951 }
 0xf2b   : > { %v4022_v29 = vsub.f32 %v8148_v52, %v3952_v44  ;;  %v4023_v0 = vsub.f32 %v8150_v26, %v3952_v44 }
 0xf2d   : > { %v4134_v59 = vmul.f32 1.442695, %v4022_v29  ;;  %v4136_v9 = vmul.f32 1.442695, %v4023_v0  ;;  %v3955_v17 = vpop.xlane.xlu0 %3954 }
 0xf2e   : > { %v4024_v36 = vsub.f32 %v8154_v54, %v3955_v17  ;;  %v4025_v46 = vsub.f32 %v8156_v8, %v3955_v17  ;;  %v4174_v55 = vpop.xlane.xlu1 %4173 }
 0xf2f   : > { %5607 = vpow2.f32 %v4134_v59 }
 0xf30   : > { %5609 = vpow2.f32 %v4136_v9  ;;  %v4138_v41 = vmul.f32 1.442695, %v4024_v36  ;;  %v4140_v40 = vmul.f32 1.442695, %v4025_v46 }
 0xf31   : > { %v5604_v62 = vpop.eup %5603  ;;  %5611 = vrcp.f32 %v4174_v55  ;;  %v4177_v63 = vpop.xlane.xlu0 %4176 }
 0xf32   : > { %5613 = vpow2.f32 %v4138_v41  ;;  %v3958_v31 = vpop.xlane.xlu1 %3957  ;;  %v4295_v54 = vmul.f32 %v5604_v62, %v8206_v27  ;;  %v4294_v8 = vmul.f32 %v5604_v62, %v8204_v32 }
 0xf33   : > { %5615 = vpow2.f32 %v4140_v40  ;;  %v4026_v52 = vsub.f32 %v8160_v57, %v3958_v31  ;;  %v4027_v26 = vsub.f32 %v8162_v2, %v3958_v31 }
 0xf34   : > { %v5606_v44 = vpop.eup %5605  ;;  %5617 = vrcp.f32 %v4177_v63 }
 0xf35   : > { %v4142_v59 = vmul.f32 1.442695, %v4026_v52  ;;  %v4144_v9 = vmul.f32 1.442695, %v4027_v26  ;;  %v3961_v17 = vpop.xlane.xlu0 %3960  ;;  %v4297_v36 = vmul.f32 %v5606_v44, %v8214_v15  ;;  %v4296_v55 = vmul.f32 %v5606_v44, %v8208_v13 }
 0xf36   : > { %v4028_v29 = vsub.f32 %v8166_v24, %v3961_v17  ;;  %v4029_v40 = vsub.f32 %v8168_v30, %v3961_v17  ;;  %v4180_v57 = vpop.xlane.xlu1 %4179 }
 0xf37   : > { %5619 = vpow2.f32 %v4142_v59  ;;  %v4359_v2 = vpack.c.bf16 %v4297_v36, %v4295_v54  ;;  %v4358_v31 = vpack.c.bf16 %v4296_v55, %v4294_v8 }
 0xf38   : > { %5621 = vpow2.f32 %v4144_v9  ;;  %v4146_v0 = vmul.f32 1.442695, %v4028_v29  ;;  %v4148_v27 = vmul.f32 1.442695, %v4029_v40 }
 0xf39   : > { %v8424_v46 = vpop.eup %5607  ;;  %5623 = vrcp.f32 %v4180_v57  ;;  %4390 = vmatprep.subr.bf16.mxu0 %v4359_v2  ;;  %v4183_v32 = vpop.xlane.xlu0 %4182 }
 0xf3a   : > { %v8426_v41 = vpop.eup %5609  ;;  %5625 = vpow2.f32 %v4146_v0  ;;  %4391 = vmatpush1.bf16.xpose.msra.mxu0 %v4358_v31  ;;  %v3964_v13 = vpop.xlane.xlu1 %3963 }
 0xf3b   : > { %v5612_v24 = vpop.eup %5611  ;;  %5627 = vpow2.f32 %v4148_v27  ;;  %v4030_v30 = vsub.f32 %v8172_v7, %v3964_v13  ;;  %v4031_v15 = vsub.f32 %v8174_v34, %v3964_v13  ;;  %v4238_v62 = vadd.f32 %v8426_v41, %v8424_v46 }
 0xf3c   : > { %v8432_v63 = vpop.eup %5613  ;;  %5629 = vrcp.f32 %v4183_v32  ;;  %v4299_v17 = vmul.f32 %v5612_v24, %v8225_v42  ;;  %v4298_v55 = vmul.f32 %v5612_v24, %v8220_v12 }
 0xf3d   : > { %v8434_v52 = vpop.eup %5615  ;;  %v4150_v26 = vmul.f32 1.442695, %v4030_v30  ;;  %v4152_v44 = vmul.f32 1.442695, %v4031_v15  ;;  %4239 = vadd.xlane.f32.xlu1 %v4238_v62  ;;  %v3967_v54 = vpop.xlane.xlu0 %3966 }
 0xf3e   : > { %v5618_v8 = vpop.eup %5617  ;;  %v4032_v59 = vsub.f32 %v8178_v33, %v3967_v54  ;;  %v4033_v9 = vsub.f32 %v8180_v28, %v3967_v54  ;;  %v4186_v7 = vpop.xlane.xlu1 %4185  ;;  %v4241_v34 = vadd.f32 %v8434_v52, %v8432_v63 }
 0xf3f   : > { %5631 = vpow2.f32 %v4150_v26  ;;  %v4301_v36 = vmul.f32 %v5618_v8, %v8233_v58  ;;  %v4300_v29 = vmul.f32 %v5618_v8, %v8227_v6 }
 0xf40   : > { %5633 = vpow2.f32 %v4152_v44  ;;  %v4154_v40 = vmul.f32 1.442695, %v4032_v59  ;;  %v4156_v57 = vmul.f32 1.442695, %v4033_v9  ;;  %4242 = vadd.xlane.f32.xlu0 %v4241_v34 }
 0xf41   : > { %v8444_v33 = vpop.eup %5619  ;;  %5635 = vrcp.f32 %v4186_v7  ;;  %v4361_v28 = vpack.c.bf16 %v4301_v36, %v4299_v17  ;;  %v4189_v2 = vpop.xlane.xlu0 %4188  ;;  %v4360_v31 = vpack.c.bf16 %v4300_v29, %v4298_v55 }
 0xf42   : > { %v8446_v0 = vpop.eup %5621  ;;  %5637 = vpow2.f32 %v4154_v40  ;;  %v3970_v42 = vpop.xlane.xlu1 %3969 }
 0xf43   : > { %v5624_v27 = vpop.eup %5623  ;;  %5639 = vpow2.f32 %v4156_v57  ;;  %4392 = vmatprep.subr.bf16.mxu0 %v4361_v28  ;;  %v4034_v12 = vsub.f32 %v8184_v19, %v3970_v42  ;;  %v4035_v6 = vsub.f32 %v8186_v38, %v3970_v42  ;;  %v4244_v58 = vadd.f32 %v8446_v0, %v8444_v33 }
 0xf44   : > { %v8452_v32 = vpop.eup %5625  ;;  %5641 = vrcp.f32 %v4189_v2  ;;  %4393 = vmatpush1.bf16.xpose.msra.mxu0 %v4360_v31  ;;  %v4303_v54 = vmul.f32 %v5624_v27, %v8247_v21  ;;  %v4302_v59 = vmul.f32 %v5624_v27, %v8242_v22 }
 0xf45   : > { %v8454_v13 = vpop.eup %5627  ;;  %v4158_v24 = vmul.f32 1.442695, %v4034_v12  ;;  %v4160_v30 = vmul.f32 1.442695, %v4035_v6  ;;  %4245 = vadd.xlane.f32.xlu1 %v4244_v58  ;;  %v3973_v15 = vpop.xlane.xlu0 %3972 }
 0xf46   : > { %v5630_v62 = vpop.eup %5629  ;;  %v4036_v26 = vsub.f32 %v8190_v50, %v3973_v15  ;;  %v4037_v19 = vsub.f32 %v8192_v37, %v3973_v15  ;;  %v4192_v44 = vpop.xlane.xlu1 %4191  ;;  %v4247_v38 = vadd.f32 %v8454_v13, %v8452_v32 }
 0xf47   : > { %5643 = vpow2.f32 %v4158_v24  ;;  %v4305_v8 = vmul.f32 %v5630_v62, %v8255_v14  ;;  %v4304_v9 = vmul.f32 %v5630_v62, %v8249_v18 }
 0xf48   : > { %5645 = vpow2.f32 %v4160_v30  ;;  %v4162_v7 = vmul.f32 1.442695, %v4036_v26  ;;  %v4164_v34 = vmul.f32 1.442695, %v4037_v19  ;;  %4248 = vadd.xlane.f32.xlu0 %v4247_v38 }
 0xf49   : > { %v8464_v50 = vpop.eup %5631  ;;  %5647 = vrcp.f32 %v4192_v44  ;;  %v4363_v37 = vpack.c.bf16 %v4305_v8, %v4303_v54  ;;  %v4195_v17 = vpop.xlane.xlu0 %4194  ;;  %v4362_v36 = vpack.c.bf16 %v4304_v9, %v4302_v59 }
 0xf4a   : > { %v8466_v55 = vpop.eup %5633  ;;  %5649 = vpow2.f32 %v4162_v7 }
 0xf4b   : > { %v5636_v21 = vpop.eup %5635  ;;  %5651 = vpow2.f32 %v4164_v34  ;;  %4394 = vmatprep.subr.bf16.mxu0 %v4363_v37  ;;  %v4250_v22 = vadd.f32 %v8466_v55, %v8464_v50 }
 0xf4c   : > { %v8470_v18 = vpop.eup %5637  ;;  %5653 = vrcp.f32 %v4195_v17  ;;  %4395 = vmatpush1.bf16.xpose.msra.mxu0 %v4362_v36  ;;  %v4307_v28 = vmul.f32 %v5636_v21, %v8269_v45  ;;  %v4306_v31 = vmul.f32 %v5636_v21, %v8264_v25 }
 0xf4d   : > { %v8472_v14 = vpop.eup %5639  ;;  %4251 = vadd.xlane.f32.xlu1 %v4250_v22  ;;  %v4574_v22 = vld [vmem:[%s8653_s6] sm:$0xff] }
 0xf4e   : > { %v5642_v29 = vpop.eup %5641  ;;  %v4198_v40 = vpop.xlane.xlu1 %4197  ;;  %v4253_v57 = vadd.f32 %v8472_v14, %v8470_v18 }
 0xf4f   : > { %v4309_v2 = vmul.f32 %v5642_v29, %v8277_v39  ;;  %v4308_v42 = vmul.f32 %v5642_v29, %v8271_v1  ;;  %5655 = vrcp.f32 %v4198_v40 }
 0xf50   : > { %4254 = vadd.xlane.f32.xlu0 %v4253_v57 }
 0xf51   : > { %v8480_v27 = vpop.eup %5643  ;;  %v4365_v12 = vpack.c.bf16 %v4309_v2, %v4307_v28  ;;  %v4201_v6 = vpop.xlane.xlu0 %4200  ;;  %v4364_v58 = vpack.c.bf16 %v4308_v42, %v4306_v31  ;;  %v4576_v28 = vld [vmem:[%s8653_s6 + $0x10] sm:$0xff] }
 0xf52   : > { %v8482_v24 = vpop.eup %5645  ;;  %5657 = vrcp.f32 %v4201_v6 }
 0xf53   : > { %v5648_v30 = vpop.eup %5647  ;;  %4396 = vmatprep.subr.bf16.mxu0 %v4365_v12  ;;  %v4256_v45 = vadd.f32 %v8482_v24, %v8480_v27  ;;  %v9148_v12 = vld [vmem:[#allocation27_spill] sm:$0xff] }
 0xf54   : > { %v8486_v39 = vpop.eup %5649  ;;  %4397 = vmatpush1.bf16.xpose.msra.mxu0 %v4364_v58  ;;  %v4311_v26 = vmul.f32 %v5648_v30, %v8291_v5  ;;  %v4310_v44 = vmul.f32 %v5648_v30, %v8286_v23  ;;  %v9149_v58 = vld [vmem:[#allocation31_spill] sm:$0xff] }
 0xf55   : > { %v8488_v25 = vpop.eup %5651  ;;  %4257 = vadd.xlane.f32.xlu1 %v4256_v45 }
 0xf56   : > { %v5654_v1 = vpop.eup %5653  ;;  %v4204_v15 = vpop.xlane.xlu1 %4203  ;;  %v4259_v62 = vadd.f32 %v8488_v25, %v8486_v39 }
 0xf57   : > { %v4313_v19 = vmul.f32 %v5654_v1, %v8299_v20  ;;  %v4312_v38 = vmul.f32 %v5654_v1, %v8293_v49  ;;  %5659 = vrcp.f32 %v4204_v15  ;;  %v9150_v1 = vld [vmem:[#allocation36_spill] sm:$0xff] }
 0xf58   : > { %4260 = vadd.xlane.f32.xlu0 %v4259_v62  ;;  %v4579_v62 = vld [vmem:[%s8653_s6 + $0x28] sm:$0xff] }
 0xf59   : > { %v4367_v54 = vpack.c.bf16 %v4313_v19, %v4311_v26  ;;  %v4207_v8 = vpop.xlane.xlu0 %4206  ;;  %v4366_v59 = vpack.c.bf16 %v4312_v38, %v4310_v44  ;;  %v5656_v9 = vpop.eup %5655  ;;  %v4578_v19 = vld [vmem:[%s8653_s6 + $0x20] sm:$0xff] }
 0xf5a   : > { %5661 = vrcp.f32 %v4207_v8  ;;  %v4315_v34 = vmul.f32 %v5656_v9, %v8310_v53  ;;  %v4314_v23 = vmul.f32 %v5656_v9, %v8308_v56  ;;  %v4580_v8 = vld [vmem:[%s8653_s6 + $0x30] sm:$0xff] }
 0xf5b   : > { %4398 = vmatprep.subr.bf16.mxu0 %v4367_v54  ;;  %v4581_v54 = vld [vmem:[%s8653_s6 + $0x38] sm:$0xff]  ;;  %v9151_v9 = vld [vmem:[#allocation18_spill] sm:$0xff] }
 0xf5c   : > { %v5658_v7 = vpop.eup %5657  ;;  %4399 = vmatpush1.bf16.xpose.msra.mxu0 %v4366_v59 }
 0xf5d   : > { %v4317_v5 = vmul.f32 %v5658_v7, %v8318_v35  ;;  %v4316_v20 = vmul.f32 %v5658_v7, %v8312_v48 }
 0xf5e   : > { %v4210_v37 = vpop.xlane.xlu1 %4209 }
 0xf5f   : > { %v4369_v49 = vpack.c.bf16 %v4317_v5, %v4315_v34  ;;  %5663 = vrcp.f32 %v4210_v37  ;;  %v4368_v17 = vpack.c.bf16 %v4316_v20, %v4314_v23  ;;  %v9152_v34 = vld [vmem:[#allocation20_spill] sm:$0xff]  ;;  %v9153_v20 = vld [vmem:[#allocation37_spill] sm:$0xff] }
 0xf61   : > { %4400 = vmatprep.subr.bf16.mxu0 %v4369_v49  ;;  %v4213_v36 = vpop.xlane.xlu0 %4212  ;;  %v5660_v21 = vpop.eup %5659  ;;  %v9154_v49 = vld [vmem:[#allocation25_spill] sm:$0xff] }
 0xf62   : > { %5665 = vrcp.f32 %v4213_v36  ;;  %v4319_v53 = vmul.f32 %v5660_v21, %v8326_v61  ;;  %v4318_v40 = vmul.f32 %v5660_v21, %v8324_v16  ;;  %v4575_v61 = vld [vmem:[%s8653_s6 + $0x8] sm:$0xff]  ;;  %v4577_v16 = vld [vmem:[%s8653_s6 + $0x18] sm:$0xff] }
 0xf64   : > { %v5662_v29 = vpop.eup %5661  ;;  %4401 = vmatpush1.bf16.xpose.msra.mxu0 %v4368_v17 }
 0xf65   : > { %v4321_v48 = vmul.f32 %v5662_v29, %v8334_v4  ;;  %v4320_v35 = vmul.f32 %v5662_v29, %v8328_v11 }
 0xf66   : > { %4584 = vperm.xlu1 %4897, %v4574_v22   ;;  %v4216_v56 = vpop.xlane.xlu1 %4215 }
 0xf67   : > { %v4371_v57 = vpack.c.bf16 %v4321_v48, %v4319_v53  ;;  %5667 = vrcp.f32 %v4216_v56  ;;  %v4370_v2 = vpack.c.bf16 %v4320_v35, %v4318_v40 }
 0xf69   : > { %4402 = vmatprep.subr.bf16.mxu0 %v4371_v57  ;;  %v4219_v31 = vpop.xlane.xlu0 %4218  ;;  %v5664_v42 = vpop.eup %5663 }
 0xf6a   : > { %5669 = vrcp.f32 %v4219_v31  ;;  %4594 = vperm.xlu1 %4897, %v4576_v28   ;;  %v4323_v4 = vmul.f32 %v5664_v42, %v8342_v51  ;;  %v4322_v15 = vmul.f32 %v5664_v42, %v9150_v1 }
 0xf6c   : > { %v5666_v11 = vpop.eup %5665  ;;  %4403 = vmatpush1.bf16.xpose.msra.mxu0 %v4370_v2 }
 0xf6d   : > { %v4325_v6 = vmul.f32 %v5666_v11, %v9148_v12  ;;  %v4324_v30 = vmul.f32 %v5666_v11, %v9149_v58  ;;  %v9155_v11 = vld [vmem:[#allocation41_spill] sm:$0xff] }
 0xf6e   : > { %4589 = vperm.xlu0 %4898, %v4575_v61   ;;  %4599 = vperm.xlu1 %4897, %v4577_v16   ;;  %v4222_v45 = vpop.xlane.xlu1 %4221 }
 0xf6f   : > { %v4373_v26 = vpack.c.bf16 %v4325_v6, %v4323_v4  ;;  %5671 = vrcp.f32 %v4222_v45  ;;  %v4372_v51 = vpack.c.bf16 %v4324_v30, %v4322_v15  ;;  %v9156_v4 = vld [vmem:[#allocation38_spill] sm:$0xff]  ;;  %v9159_v15 = vld [vmem:[#allocation49_spill] sm:$0xff] }
 0xf70   : > { %v9158_v45 = vld [vmem:[#allocation30_spill] sm:$0xff] }
 0xf71   : > { %4404 = vmatprep.subr.bf16.mxu0 %v4373_v26  ;;  %v4225_v44 = vpop.xlane.xlu0 %4224  ;;  %v5668_v38 = vpop.eup %5667  ;;  %v9160_v26 = vld [vmem:[#allocation40_spill] sm:$0xff] }
 0xf72   : > { %4609 = vperm.xlu0 %4898, %v4579_v62   ;;  %5673 = vrcp.f32 %v4225_v44  ;;  %4604 = vperm.xlu1 %4897, %v4578_v19   ;;  %v4327_v7 = vmul.f32 %v5668_v38, %v9151_v9  ;;  %v4326_v17 = vmul.f32 %v5668_v38, %v9154_v49 }
 0xf74   : > { %v5670_v59 = vpop.eup %5669  ;;  %4405 = vmatpush1.bf16.xpose.msra.mxu0 %v4372_v51 }
 0xf75   : > { %v4329_v5 = vmul.f32 %v5670_v59, %v9152_v34  ;;  %v4328_v37 = vmul.f32 %v5670_v59, %v9153_v20 }
 0xf76   : > { %4619 = vperm.xlu0 %4898, %v4581_v54   ;;  %4614 = vperm.xlu1 %4897, %v4580_v8   ;;  %v4228_v23 = vpop.xlane.xlu1 %4227 }
 0xf77   : > { %5675 = vrcp.f32 %v4228_v23  ;;  %v4375_v36 = vpack.c.bf16 %v4329_v5, %v4327_v7  ;;  %v4374_v22 = vpack.c.bf16 %v4328_v37, %v4326_v17 }
 0xf78   : > { %v4231_v21 = vpop.xlane.xlu0 %4230 }
 0xf79   : > { %4406 = vmatprep.subr.bf16.mxu0 %v4375_v36  ;;  %5677 = vrcp.f32 %v4231_v21  ;;  %v5672_v29 = vpop.eup %5671 }
 0xf7a   : > { %v4331_v48 = vmul.f32 %v5672_v29, %v8374_v47  ;;  %v4330_v57 = vmul.f32 %v5672_v29, %v8372_v10 }
 0xf7c   : > { %v5674_v53 = vpop.eup %5673  ;;  %4407 = vmatpush1.bf16.xpose.msra.mxu0 %v4374_v22 }
 0xf7d   : > { %v4333_v35 = vmul.f32 %v5674_v53, %v8382_v43  ;;  %v4332_v56 = vmul.f32 %v5674_v53, %v8376_v60  ;;  %v9157_v60 = vld [vmem:[#allocation22_spill] sm:$0xff] }
 0xf7e   : > { %v4234_v40 = vpop.xlane.xlu1 %4233 }
 0xf7f   : > { %5679 = vrcp.f32 %v4234_v40  ;;  %v4377_v28 = vpack.c.bf16 %v4333_v35, %v4331_v48  ;;  %v4376_v31 = vpack.c.bf16 %v4332_v56, %v4330_v57 }
 0xf80   : > { %v4237_v2 = vpop.xlane.xlu0 %4236 }
 0xf81   : > { %v5676_v42 = vpop.eup %5675  ;;  %4408 = vmatprep.subr.bf16.mxu0 %v4377_v28  ;;  %5681 = vrcp.f32 %v4237_v2 }
 0xf82   : > { %v4335_v16 = vmul.f32 %v5676_v42, %v8390_v3  ;;  %v4334_v6 = vmul.f32 %v5676_v42, %v9157_v60  ;;  %v9161_v3 = vld [vmem:[#allocation48_spill] sm:$0xff] }
 0xf83   : > { %v5678_v61 = vpop.eup %5677 }
 0xf84   : > { %4409 = vmatpush1.bf16.xpose.msra.mxu0 %v4376_v31  ;;  %v4337_v47 = vmul.f32 %v5678_v61, %v9155_v11  ;;  %v4336_v43 = vmul.f32 %v5678_v61, %v9156_v4 }
 0xf86   : > { %v4379_v12 = vpack.c.bf16 %v4337_v47, %v4335_v16  ;;  %v4378_v10 = vpack.c.bf16 %v4336_v43, %v4334_v6  ;;  %v9165_v43 = vld [vmem:[#allocation29_spill] sm:$0xff]  ;;  %v9168_v6 = vld [vmem:[#allocation19_spill] sm:$0xff] }
 0xf88   : > { %4410 = vmatprep.subr.bf16.mxu0 %v4379_v12  ;;  %v9166_v12 = vld [vmem:[#allocation32_spill] sm:$0xff] }
 0xf89   : > { %v5680_v58 = vpop.eup %5679  ;;  %v9167_v60 = vpack.c.bf16 %v9165_v43, %v9166_v12 }
 0xf8a   : > { %v4339_v1 = vmul.f32 %v5680_v58, %v9158_v45  ;;  %v4338_v44 = vmul.f32 %v5680_v58, %v9161_v3  ;;  %v9176_v45 = vld [vmem:[#allocation33_spill] sm:$0xff] }
 0xf8b   : > { %v5682_v30 = vpop.eup %5681 }
 0xf8c   : > { %4411 = vmatpush1.bf16.xpose.msra.mxu0 %v4378_v10  ;;  %v4341_v62 = vmul.f32 %v5682_v30, %v9159_v15  ;;  %v4340_v19 = vmul.f32 %v5682_v30, %v9160_v26  ;;  %v9175_v30 = vld [vmem:[#allocation34_spill] sm:$0xff]  ;;  %v9178_v15 = vld [vmem:[#allocation21_spill] sm:$0xff] }
 0xf8e   : > { %v4381_v51 = vpack.c.bf16 %v4341_v62, %v4339_v1  ;;  %v4380_v38 = vpack.c.bf16 %v4340_v19, %v4338_v44  ;;  %v9177_v1 = vpack.c.bf16 %v9175_v30, %v9176_v45  ;;  %v9179_v62 = vld [vmem:[#allocation51_spill] sm:$0xff]  ;;  %v9190_v30 = vld [vmem:[#allocation8_spill] sm:$0xff] }
 0xf8f   : > { %v9180_v26 = vpack.c.bf16 %v9178_v15, %v9179_v62  ;;  %v9181_v19 = vld [vmem:[#allocation23_spill] sm:$0xff] }
 0xf90   : > { %4412 = vmatprep.subr.bf16.mxu0 %v4381_v51  ;;  %v9182_v51 = vld [vmem:[#allocation52_spill] sm:$0xff] }
 0xf91   : > { %v9183_v3 = vpack.c.bf16 %v9181_v19, %v9182_v51 }
 0xf94   : > { %4413 = vmatpush1.bf16.xpose.msra.mxu0 %v4380_v38 }
 0xfca   : > { %v4240_v54 = vpop.xlane.xlu1 %4239 }
 0xfcb   : > { %5683 = vrcp.f32 %v4240_v54 }
 0xfcd   : > { %v4243_v8 = vpop.xlane.xlu0 %4242 }
 0xfce   : > { %5685 = vrcp.f32 %v4243_v8 }
 0xfd2   : > { %v4246_v59 = vpop.xlane.xlu1 %4245 }
 0xfd3   : > { %5687 = vrcp.f32 %v4246_v59 }
 0xfd5   : > { %v4249_v9 = vpop.xlane.xlu0 %4248  ;;  %v5684_v7 = vpop.eup %5683 }
 0xfd6   : > { %5689 = vrcp.f32 %v4249_v9  ;;  %v4343_v5 = vmul.f32 %v5684_v7, %v8426_v41  ;;  %v4342_v37 = vmul.f32 %v5684_v7, %v8424_v46  ;;  %v4911_v7 = vld [vmem:[%s8652_s5] sm:$0xff]  }
 0xfd8   : > { %v5686_v34 = vpop.eup %5685 }
 0xfd9   : > { %v4345_v20 = vmul.f32 %v5686_v34, %v8434_v52  ;;  %v4344_v23 = vmul.f32 %v5686_v34, %v8432_v63  ;;  %v4912_v34 = vld [vmem:[%s8652_s5 + $0x8] sm:$0xff]  }
 0xfda   : > { %v4252_v49 = vpop.xlane.xlu1 %4251 }
 0xfdb   : > { %v4383_v17 = vpack.c.bf16 %v4345_v20, %v4343_v5  ;;  %v4382_v36 = vpack.c.bf16 %v4344_v23, %v4342_v37  ;;  %5691 = vrcp.f32 %v4252_v49  ;;  %v4913_v5 = vld [vmem:[%s8652_s5 + $0x10] sm:$0xff]   ;;  %v4914_v20 = vld [vmem:[%s8652_s5 + $0x18] sm:$0xff]   ;;  %v5699_v49 = vld [vmem:[%s5770_s29] sm:$0xff] }
 0xfdd   : > { %4414 = vmatprep.subr.bf16.mxu0 %v4383_v17  ;;  %v4255_v21 = vpop.xlane.xlu0 %4254  ;;  %v5688_v22 = vpop.eup %5687 }
 0xfde   : > { %5693 = vrcp.f32 %v4255_v21  ;;  %4415 = vmatpush1.bf16.xpose.msra.mxu0 %v4382_v36  ;;  %v4347_v53 = vmul.f32 %v5688_v22, %v8446_v0  ;;  %v4346_v52 = vmul.f32 %v5688_v22, %v8444_v33  ;;  %v5700_v21 = vld [vmem:[%s5770_s29 + $0x8] sm:$0xff] }
 0xfe0   : > { %v5690_v29 = vpop.eup %5689 }
 0xfe1   : > { %v4349_v41 = vmul.f32 %v5690_v29, %v8454_v13  ;;  %v4348_v46 = vmul.f32 %v5690_v29, %v8452_v32 }
 0xfe2   : > { %v4258_v48 = vpop.xlane.xlu1 %4257 }
 0xfe3   : > { %v4385_v63 = vpack.c.bf16 %v4349_v41, %v4347_v53  ;;  %v4384_v35 = vpack.c.bf16 %v4348_v46, %v4346_v52  ;;  %5695 = vrcp.f32 %v4258_v48  ;;  %v5701_v41 = vld [vmem:[%s5770_s29 + $0x10] sm:$0xff] }
 0xfe5   : > { %4416 = vmatprep.subr.bf16.mxu0 %v4385_v63  ;;  %v4261_v56 = vpop.xlane.xlu0 %4260  ;;  %v5692_v40 = vpop.eup %5691 }
 0xfe6   : > { %5697 = vrcp.f32 %v4261_v56  ;;  %4417 = vmatpush1.bf16.xpose.msra.mxu0 %v4384_v35  ;;  %v4351_v28 = vmul.f32 %v5692_v40, %v8466_v55  ;;  %v4350_v13 = vmul.f32 %v5692_v40, %v8464_v50  ;;  %v9162_v50 = vld [vmem:[#allocation17_spill] sm:$0xff]  ;;  %v4585_v37 = vpop.permute.xlu1 %4584  ;;  %v5702_v35 = vld [vmem:[%s5770_s29 + $0x18] sm:$0xff] }
 0xfe8   : > { %v5694_v57 = vpop.eup %5693 }
 0xfe9   : > { %v4353_v0 = vmul.f32 %v5694_v57, %v8472_v14  ;;  %v4352_v33 = vmul.f32 %v5694_v57, %v8470_v18  ;;  %v9163_v18 = vld [vmem:[#allocation35_spill] sm:$0xff] }
 0xfea   : > { %v9164_v4 = vpack.c.bf16 %v9162_v50, %v9163_v18  ;;  %v4595_v57 = vpop.permute.xlu1 %4594  ;;  %v9187_v50 = vld [vmem:[#allocation5_spill] sm:$0xff] }
 0xfeb   : > { %v4387_v2 = vpack.c.bf16 %v4353_v0, %v4351_v28  ;;  %v4386_v32 = vpack.c.bf16 %v4352_v33, %v4350_v13  ;;  %v9184_v13 = vld [vmem:[#allocation6_spill] sm:$0xff] }
 0xfed   : > { %4418 = vmatprep.subr.bf16.mxu0 %v4387_v2  ;;  %v5696_v31 = vpop.eup %5695  ;;  %v4590_v48 = vpop.permute.xlu0 %4589 }
 0xfee   : > { %4419 = vmatpush1.bf16.xpose.msra.mxu0 %v4386_v32  ;;  %v4355_v61 = vmul.f32 %v5696_v31, %v8482_v24  ;;  %v4354_v11 = vmul.f32 %v5696_v31, %v8480_v27  ;;  %v9169_v24 = vld [vmem:[#allocation16_spill] sm:$0xff]  ;;  %v9172_v27 = vld [vmem:[#allocation39_spill] sm:$0xff] }
 0xfef   : > { %v9170_v10 = vpack.c.bf16 %v9168_v6, %v9169_v24  ;;  %v9185_v32 = vld [vmem:[#allocation7_spill] sm:$0xff] }
 0xff0   : > { %v5698_v42 = vpop.eup %5697 }
 0xff1   : > { %v4357_v16 = vmul.f32 %v5698_v42, %v8488_v25  ;;  %v4356_v55 = vmul.f32 %v5698_v42, %v8486_v39  ;;  %v9171_v25 = vmov 0   ;;  %v9173_v39 = vld [vmem:[#allocation57_spill] sm:$0xff]  ;;  %v4610_v15 = vpop.permute.xlu0 %4609 }
 0xff2   : > { %v9174_v58 = vpack.c.bf16 %v9172_v27, %v9173_v39 }
 0xff3   : > { %v4389_v47 = vpack.c.bf16 %v4357_v16, %v4355_v61  ;;  %v4388_v14 = vpack.c.bf16 %v4356_v55, %v4354_v11  ;;  %v9186_v16 = vld [vmem:[#allocation4_spill] sm:$0xff] }
 0xff5   : > { %4420 = vmatprep.subr.bf16.mxu0 %v4389_v47  ;;  %v4600_v47 = vpop.permute.xlu1 %4599 }
 0xff6   : > { %4421 = vmatpush1.bf16.xpose.msra.mxu0 %v4388_v14 }
 0xff7   : > { %4485 = vmatprep.subr.bf16.mxu0 %v9164_v4 }
 0xffd   : > { %4423 = vmatmul.mubr.bf16.vlgmr.msra.gmra.mrb[140].mxu0 %v9167_v60  ;;  %v9188_v60 = vld [vmem:[#allocation10_spill] sm:$0xff] }
 0xffe   : > { %4486 = vmatpush1.bf16.msra.mxu0 %v9170_v10  ;;  %4517 = vmatprep.mubr.bf16.mxu0 %v9171_v25  ;;  %v4605_v10 = vpop.permute.xlu1 %4604 }
 0xfff   : > { %4487 = vmatprep.subr.bf16.mxu0 %v9174_v58 }
0x1002   : > { %4488 = vmatpush1.bf16.msra.mxu0 %v9177_v1 }
0x1003   : > { %4489 = vmatprep.subr.bf16.mxu0 %v9180_v26  ;;  %v9191_v26 = vld [vmem:[#allocation9_spill] sm:$0xff] }
0x1006   : > { %4490 = vmatpush1.bf16.msra.mxu0 %v9183_v3 }
0x10d0   : > { %v4424_v44 = vpop.f32.mrb[140].mxu0 }
0x10d1   : > { %v4426_v38 = vpop.f32.mrb[141].mxu0 }
0x10d2   : > { %v4428_v54 = vpop.f32.mrb[142].mxu0 }
0x10d3   : > { %v4433_v8 = vpack.c.bf16 %v4428_v54, %v4424_v44  ;;  %v4430_v59 = vpop.f32.mrb[143].mxu0 }
0x10d4   : > { %v4434_v9 = vpack.c.bf16 %v4430_v59, %v4426_v38  ;;  %v9192_v38 = vld [vmem:[#allocation14_spill] sm:$0xff]  ;;  %v4615_v59 = vpop.permute.xlu1 %4614 }
0x10d6   : > { %4491 = vmatprep.subr.bf16.mxu0 %v4434_v9  ;;  %v9193_v9 = vld [vmem:[#allocation15_spill] sm:$0xff] }
0x10d7   : > { %4492 = vmatpush1.bf16.msra.mxu0 %v4433_v8 }
0x10da   : > { %4818 = vmatmul.mubr.msk.bf16.vlgmr.msra.gmra.mrb[144].mxu0 %vm377_vm0, %v4911_v7 }
0x10db   : > { %4527 = vmatprep.mubr.bf16.mxu0 %v9171_v25 }
0x10e2   : > { %4819 = vmatmul.mubr.msk.bf16.gmra.mrb[148].mxu0 %vm377_vm0, %v4912_v34 }
0x10e3   : > { %4537 = vmatprep.mubr.bf16.mxu0 %v9171_v25 }
0x10ea   : > { %4820 = vmatmul.mubr.msk.bf16.gmra.mrb[152].mxu0 %vm377_vm0, %v4913_v5 }
0x10eb   : > { %4547 = vmatprep.mubr.bf16.mxu0 %v9171_v25  ;;  %v9189_v25 = vld [vmem:[#allocation11_spill] sm:$0xff] }
0x10f2   : > { %4821 = vmatmul.mubr.msk.bf16.gmra.mrb[156].mxu0 %vm377_vm0, %v4914_v20  ;;  %v9194_v20 = vld [vmem:[#allocation12_spill] sm:$0xff] }
0x11ad   : > { %v4519_v23 = vpop.f32.mrb[144].mxu0 }
0x11ae   : > { %v4558_v17 = vadd.f32 %v5699_v49, %v4519_v23  ;;  %v4521_v36 = vpop.f32.mrb[145].mxu0  ;;  %v4620_v49 = vpop.permute.xlu0 %4619 }
0x11af   : > { %v4559_v22 = vadd.f32 %v5700_v21, %v4521_v36  ;;  %v4523_v29 = vpop.f32.mrb[146].mxu0  ;;  %v9195_v36 = vld [vmem:[#allocation13_spill] sm:$0xff] }
0x11b0   : > { %v4622_v53 = vadd.f32 %v4585_v37, %v4558_v17  ;;  %v4560_v52 = vadd.f32 %v5701_v41, %v4523_v29  ;;  %v4525_v46 = vpop.f32.mrb[147].mxu0 }
0x11b1   : > { %v4623_v63 = vadd.f32 %v4585_v37, %v4559_v22  ;;  %v4561_v56 = vadd.f32 %v5702_v35, %v4525_v46 }
0x11b2   : > { %4638 = vst [vmem:[%s8611_s12] sm:$0xff] %v4622_v53  ;;  %v4624_v40 = vadd.f32 %v4590_v48, %v4560_v52 }
0x11b3   : > { %4639 = vst [vmem:[%s8611_s12 + $0x8] sm:$0xff] %v4623_v63  ;;  %v4625_v28 = vadd.f32 %v4590_v48, %v4561_v56 }
0x11b4   : > { %4640 = vst [vmem:[%s8611_s12 + $0x10] sm:$0xff] %v4624_v40 }
0x11b5   : > { %4641 = vst [vmem:[%s8611_s12 + $0x18] sm:$0xff] %v4625_v28  ;;  %v4529_v0 = vpop.f32.mrb[148].mxu0 }
0x11b6   : > { %v4562_v33 = vadd.f32 %v4529_v0, %v9184_v13  ;;  %v4531_v2 = vpop.f32.mrb[149].mxu0 }
0x11b7   : > { %v4563_v31 = vadd.f32 %v4531_v2, %v9185_v32  ;;  %v4533_v42 = vpop.f32.mrb[150].mxu0 }
0x11b8   : > { %v4626_v61 = vadd.f32 %v4595_v57, %v4562_v33  ;;  %v4564_v11 = vadd.f32 %v4533_v42, %v9186_v16  ;;  %v4535_v55 = vpop.f32.mrb[151].mxu0 }
0x11b9   : > { %v4627_v14 = vadd.f32 %v4595_v57, %v4563_v31  ;;  %v4565_v18 = vadd.f32 %v4535_v55, %v9187_v50 }
0x11ba   : > { %4642 = vst [vmem:[%s8611_s12 + $0x20] sm:$0xff] %v4626_v61  ;;  %v4628_v4 = vadd.f32 %v4600_v47, %v4564_v11 }
0x11bb   : > { %4643 = vst [vmem:[%s8611_s12 + $0x28] sm:$0xff] %v4627_v14  ;;  %v4629_v43 = vadd.f32 %v4600_v47, %v4565_v18 }
0x11bc   : > { %4644 = vst [vmem:[%s8611_s12 + $0x30] sm:$0xff] %v4628_v4 }
0x11bd   : > { %4645 = vst [vmem:[%s8611_s12 + $0x38] sm:$0xff] %v4629_v43  ;;  %v4539_v12 = vpop.f32.mrb[152].mxu0 }
0x11be   : > { %v4566_v6 = vadd.f32 %v4539_v12, %v9188_v60  ;;  %v4541_v24 = vpop.f32.mrb[153].mxu0 }
0x11bf   : > { %v4567_v27 = vadd.f32 %v4541_v24, %v9189_v25  ;;  %v4543_v39 = vpop.f32.mrb[154].mxu0 }
0x11c0   : > { %v4630_v58 = vadd.f32 %v4605_v10, %v4566_v6  ;;  %v4568_v45 = vadd.f32 %v4543_v39, %v9190_v30  ;;  %v4545_v1 = vpop.f32.mrb[155].mxu0 }
0x11c1   : > { %v4631_v62 = vadd.f32 %v4605_v10, %v4567_v27  ;;  %v4569_v19 = vadd.f32 %v4545_v1, %v9191_v26 }
0x11c2   : > { %4646 = vst [vmem:[%s8611_s12 + $0x40] sm:$0xff] %v4630_v58  ;;  %v4632_v51 = vadd.f32 %v4610_v15, %v4568_v45 }
0x11c3   : > { %4647 = vst [vmem:[%s8611_s12 + $0x48] sm:$0xff] %v4631_v62  ;;  %v4633_v3 = vadd.f32 %v4610_v15, %v4569_v19 }
0x11c4   : > { %4648 = vst [vmem:[%s8611_s12 + $0x50] sm:$0xff] %v4632_v51 }
0x11c5   : > { %4649 = vst [vmem:[%s8611_s12 + $0x58] sm:$0xff] %v4633_v3  ;;  %v4549_v44 = vpop.f32.mrb[156].mxu0 }
0x11c6   : > { %v4570_v54 = vadd.f32 %v4549_v44, %v9192_v38  ;;  %v4551_v8 = vpop.f32.mrb[157].mxu0 }
0x11c7   : > { %v4571_v7 = vadd.f32 %v4551_v8, %v9193_v9  ;;  %v4553_v34 = vpop.f32.mrb[158].mxu0 }
0x11c8   : > { %v4634_v5 = vadd.f32 %v4615_v59, %v4570_v54  ;;  %v4572_v37 = vadd.f32 %v4553_v34, %v9194_v20  ;;  %v4555_v23 = vpop.f32.mrb[159].mxu0 }
0x11c9   : > { %v4635_v17 = vadd.f32 %v4615_v59, %v4571_v7  ;;  %v4573_v21 = vadd.f32 %v4555_v23, %v9195_v36 }
0x11ca   : > { %4650 = vst [vmem:[%s8611_s12 + $0x60] sm:$0xff] %v4634_v5  ;;  %v4636_v22 = vadd.f32 %v4620_v49, %v4572_v37 }
0x11cb   : > { %4651 = vst [vmem:[%s8611_s12 + $0x68] sm:$0xff] %v4635_v17  ;;  %v4637_v29 = vadd.f32 %v4620_v49, %v4573_v21 }
0x11cc   : > { %4652 = vst [vmem:[%s8611_s12 + $0x70] sm:$0xff] %v4636_v22 }
0x11cd   : > { %4653 = vst [vmem:[%s8611_s12 + $0x78] sm:$0xff] %v4637_v29 }
0x11ce PF: > { %s17_s24 = sadd.s32 1, %s5709_s24  }
0x11cf   : > { %p14_p4 = scmp.ge.s32.totalorder %s17_s24, 4  }
0x11d1   :  { %16 = sbr.rel (!%p14_p4) target bundleno = 1 (0x1), region = 78 }

</bundles_post_ra>
